<compile_context>
chip_gen: v7x
topology: tpu7x:2x2x1
jax: 0.10.0
libtpu: 0.0.40
codegen_flags: <defaults>
</compile_context>

<pallas_src>
import functools
import math

import jax
import jax.numpy as jnp
from jax.experimental import pallas as pl
from jax.experimental.pallas import tpu as pltpu

SRC_PAD_IDX = 0
TRG_PAD_IDX = 0
NEG_INF = -1e9
LN_EPS = 1e-5
VMEM_LIMIT = 64 * 1024 * 1024   # <= v7x physical VMEM; v5e/v6e have 128 MiB


def _nbytes(*arrs):
    return int(sum(math.prod(a.shape) * jnp.dtype(a.dtype).itemsize
                   for a in arrs))


def _pick_tile(dim, pref, align):
    """Largest valid tile: either the full dim or an `align`-multiple divisor.

    Falls back to the full dimension when no aligned divisor <= pref exists
    (always legal; only a VMEM concern for very large unpadded dims).
    """
    if dim <= pref:
        return dim
    t = (pref // align) * align
    while t >= align:
        if dim % t == 0:
            return t
        t -= align
    return dim


# ----------------------- generic tiled linear kernel -----------------------

def _linear_kernel(x_ref, w_ref, b_ref, o_ref, acc_ref, *, act):
    @pl.when(pl.program_id(2) == 0)
    def _():
        acc_ref[...] = jnp.zeros_like(acc_ref)

    acc_ref[...] += jnp.dot(
        x_ref[...].astype(jnp.bfloat16),
        w_ref[...].astype(jnp.bfloat16),
        preferred_element_type=jnp.float32,
    )

    @pl.when(pl.program_id(2) == pl.num_programs(2) - 1)
    def _():
        o = acc_ref[...] + b_ref[...]
        if act == "relu":
            o = jnp.maximum(o, 0.0)
        o_ref[...] = o.astype(o_ref.dtype)


def linear(x, w, b, act=None, tm=256, tn=512, tk=512):
    """x: (M, K) bf16/f32, w: (K, N) bf16, b: (N,) f32 -> (M, N) f32."""
    M, K = x.shape
    N = w.shape[1]
    tm = _pick_tile(M, tm, 16)
    tn = _pick_tile(N, tn, 128)
    tk = _pick_tile(K, tk, 128)
    grid = (M // tm, N // tn, K // tk)
    b2 = b.reshape(1, N)
    cost = pl.CostEstimate(
        flops=int(2 * M * N * K),
        transcendentals=0,
        bytes_accessed=_nbytes(x, w, b2) + M * N * 4,
    )
    return pl.pallas_call(
        functools.partial(_linear_kernel, act=act),
        out_shape=jax.ShapeDtypeStruct((M, N), jnp.float32),
        grid=grid,
        in_specs=[
            pl.BlockSpec((tm, tk), lambda i, j, k: (i, k)),
            pl.BlockSpec((tk, tn), lambda i, j, k: (k, j)),
            pl.BlockSpec((1, tn), lambda i, j, k: (0, j)),
        ],
        out_specs=pl.BlockSpec((tm, tn), lambda i, j, k: (i, j)),
        scratch_shapes=[pltpu.VMEM((tm, tn), jnp.float32)],
        compiler_params=pltpu.CompilerParams(
            dimension_semantics=("parallel", "parallel", "arbitrary"),
            vmem_limit_bytes=VMEM_LIMIT),
        cost_estimate=cost,
    )(x, w, b2)


# --------------- fused attention sub-layer (QKV+MHA+proj+LN) ---------------

def _attn_block_kernel(x_ref, kv_ref, bias_ref, wqkv_ref, bqkv_ref,
                       wo_ref, bo_ref, g_ref, beta_ref, o_ref,
                       *, n_heads, causal, self_attn, eps):
    tq = x_ref.shape[1]
    Lk = kv_ref.shape[1]
    D = x_ref.shape[2]
    Dh = D // n_heads
    scale = 1.0 / math.sqrt(Dh)

    x16 = x_ref[0]                       # (tq, D) bf16
    wqkv = wqkv_ref[...]                 # (D, 3D) bf16
    bqkv = bqkv_ref[...]                 # (1, 3D) f32

    # Fused single QKV matmul only when the query tile covers all keys of a
    # self-attention layer (otherwise K/V must come from the full kv_ref).
    fuse_qkv = self_attn and (tq == Lk)
    if fuse_qkv:
        qkv = jnp.dot(x16, wqkv, preferred_element_type=jnp.float32) + bqkv
        q = qkv[:, :D]
        k = qkv[:, D:2 * D]
        v = qkv[:, 2 * D:]
    else:
        kv16 = kv_ref[0]                 # (Lk, D) bf16
        q = jnp.dot(x16, wqkv[:, :D],
                    preferred_element_type=jnp.float32) + bqkv[:, :D]
        kvp = jnp.dot(kv16, wqkv[:, D:],
                      preferred_element_type=jnp.float32) + bqkv[:, D:]
        k = kvp[:, :D]
        v = kvp[:, D:]

    # Fold key-padding bias and (optional) causal bias into one additive bias,
    # added once per head.  Mask is built in-kernel from iota; only the tiny
    # (1, Lk) key bias is ever materialized in HBM.
    key_bias = bias_ref[0]               # (1, Lk) f32
    if causal:
        q_start = pl.program_id(1) * tq
        row = q_start + jax.lax.broadcasted_iota(jnp.int32, (tq, Lk), 0)
        col = jax.lax.broadcasted_iota(jnp.int32, (tq, Lk), 1)
        bias = key_bias + jnp.where(col > row, NEG_INF, 0.0
                                    ).astype(jnp.float32)   # (tq, Lk)
    else:
        bias = key_bias                  # (1, Lk), broadcasts over rows

    # scale folded into q before the bf16 cast (saves one VPU mul per head)
    q16 = (q * scale).astype(jnp.bfloat16)
    k16 = k.astype(jnp.bfloat16)
    v16 = v.astype(jnp.bfloat16)
    wo16 = wo_ref[...]                   # (D, D) bf16

    # Per-head output-projection accumulation: no lane-dim concatenate.
    proj = jnp.zeros((tq, D), jnp.float32)
    for h in range(n_heads):             # static unroll; everything in VMEM
        sl = slice(h * Dh, (h + 1) * Dh)
        s = jax.lax.dot_general(q16[:, sl], k16[:, sl],
                                (((1,), (1,)), ((), ())),
                                preferred_element_type=jnp.float32)
        s = s + bias
        m = jnp.max(s, axis=-1, keepdims=True)
        p = jnp.exp(s - m)
        p = p * pl.reciprocal(jnp.sum(p, axis=-1, keepdims=True), approx=True)
        head = jnp.dot(p.astype(jnp.bfloat16), v16[:, sl],
                       preferred_element_type=jnp.float32)      # (tq, Dh)
        proj = proj + jnp.dot(head.astype(jnp.bfloat16), wo16[sl, :],
                              preferred_element_type=jnp.float32)
    proj = proj + bo_ref[...]

    # fused residual + layernorm epilogue (f32 elementwise; bf16 store)
    y = x16.astype(jnp.float32) + proj
    mu = jnp.mean(y, axis=-1, keepdims=True)
    var = jnp.mean((y - mu) ** 2, axis=-1, keepdims=True)
    y = (y - mu) * jax.lax.rsqrt(var + eps)
    o_ref[0] = (y * g_ref[...] + beta_ref[...]).astype(o_ref.dtype)


def attn_block(x_q, x_kv, key_bias, ap, ln_g, ln_b, n_heads, causal,
               self_attn, tq_pref=256):
    """Fused attention sub-layer. key_bias: (B, 1, Lk) additive (0 / -1e9).

    Grid = (batch, query tile): >B parallel steps and bounded (tq, Lk) score
    memory.  TODO(synk): for very long Lk a flash-style key-blocked inner loop
    would further cap VMEM; sequence lengths here are short so the full-Lk
    score tile is kept.
    """
    B, Lq, D = x_q.shape
    Lk = x_kv.shape[1]
    tq = _pick_tile(Lq, tq_pref, 16)
    nq = Lq // tq
    kernel = functools.partial(
        _attn_block_kernel, n_heads=n_heads, causal=causal,
        self_attn=self_attn, eps=LN_EPS)
    qkv_flops = (2 * Lq * D * 3 * D) if (self_attn and nq == 1) else \
        (2 * Lq * D * D + nq * 2 * Lk * D * 2 * D)
    cost = pl.CostEstimate(
        flops=int(B * (qkv_flops + 4 * Lq * Lk * D + 2 * Lq * D * D)),
        transcendentals=int(B * n_heads * Lq * Lk),
        bytes_accessed=_nbytes(x_q, x_kv, key_bias, ap["wqkv"], ap["wo"])
        + B * Lq * D * 2,
    )
    return pl.pallas_call(
        kernel,
        out_shape=jax.ShapeDtypeStruct((B, Lq, D), jnp.bfloat16),
        grid=(B, nq),
        in_specs=[
            pl.BlockSpec((1, tq, D), lambda b, qi: (b, qi, 0)),
            pl.BlockSpec((1, Lk, D), lambda b, qi: (b, 0, 0)),
            pl.BlockSpec((1, 1, Lk), lambda b, qi: (b, 0, 0)),
            pl.BlockSpec((D, 3 * D), lambda b, qi: (0, 0)),
            pl.BlockSpec((1, 3 * D), lambda b, qi: (0, 0)),
            pl.BlockSpec((D, D), lambda b, qi: (0, 0)),
            pl.BlockSpec((1, D), lambda b, qi: (0, 0)),
            pl.BlockSpec((1, D), lambda b, qi: (0, 0)),
            pl.BlockSpec((1, D), lambda b, qi: (0, 0)),
        ],
        out_specs=pl.BlockSpec((1, tq, D), lambda b, qi: (b, qi, 0)),
        compiler_params=pltpu.CompilerParams(
            dimension_semantics=("parallel", "parallel"),
            vmem_limit_bytes=VMEM_LIMIT),
        cost_estimate=cost,
    )(x_q, x_kv, key_bias,
      ap["wqkv"], ap["bqkv"].reshape(1, 3 * D),
      ap["wo"], ap["bo"].reshape(1, D),
      ln_g.reshape(1, D), ln_b.reshape(1, D))


# ------------------- fused FFN sub-layer (MLP+res+LN) ----------------------

def _ffn_block_kernel(x_ref, w1_ref, b1_ref, w2_ref, b2_ref,
                      g_ref, beta_ref, o_ref, *, eps):
    x16 = x_ref[0]                       # (tl, D) bf16
    h = jnp.dot(x16, w1_ref[...], preferred_element_type=jnp.float32) \
        + b1_ref[...]
    h = jnp.maximum(h, 0.0)
    f = jnp.dot(h.astype(jnp.bfloat16), w2_ref[...],
                preferred_element_type=jnp.float32) + b2_ref[...]
    y = x16.astype(jnp.float32) + f
    mu = jnp.mean(y, axis=-1, keepdims=True)
    var = jnp.mean((y - mu) ** 2, axis=-1, keepdims=True)
    y = (y - mu) * jax.lax.rsqrt(var + eps)
    o_ref[0] = (y * g_ref[...] + beta_ref[...]).astype(o_ref.dtype)


def ffn_block(x, fp, ln_g, ln_b, tl_pref=256):
    B, L, D = x.shape
    F = fp["w1"].shape[1]
    tl = _pick_tile(L, tl_pref, 16)
    nl = L // tl
    cost = pl.CostEstimate(
        flops=int(B * L * 4 * D * F),
        transcendentals=0,
        bytes_accessed=_nbytes(x, fp["w1"], fp["w2"]) + B * L * D * 2,
    )
    return pl.pallas_call(
        functools.partial(_ffn_block_kernel, eps=LN_EPS),
        out_shape=jax.ShapeDtypeStruct((B, L, D), jnp.bfloat16),
        grid=(B, nl),
        in_specs=[
            pl.BlockSpec((1, tl, D), lambda b, li: (b, li, 0)),
            pl.BlockSpec((D, F), lambda b, li: (0, 0)),
            pl.BlockSpec((1, F), lambda b, li: (0, 0)),
            pl.BlockSpec((F, D), lambda b, li: (0, 0)),
            pl.BlockSpec((1, D), lambda b, li: (0, 0)),
            pl.BlockSpec((1, D), lambda b, li: (0, 0)),
            pl.BlockSpec((1, D), lambda b, li: (0, 0)),
        ],
        out_specs=pl.BlockSpec((1, tl, D), lambda b, li: (b, li, 0)),
        compiler_params=pltpu.CompilerParams(
            dimension_semantics=("parallel", "parallel"),
            vmem_limit_bytes=VMEM_LIMIT),
        cost_estimate=cost,
    )(x, fp["w1"], fp["b1"].reshape(1, F), fp["w2"], fp["b2"].reshape(1, D),
      ln_g.reshape(1, D), ln_b.reshape(1, D))


# ------------------------------ model glue --------------------------------

def encoder_layer(x, src_key_bias, p, n_heads):
    x = attn_block(x, x, src_key_bias, p["attn"], p["ln1_g"], p["ln1_b"],
                   n_heads, causal=False, self_attn=True)
    x = ffn_block(x, p["ffn"], p["ln2_g"], p["ln2_b"])
    return x


def decoder_layer(x, enc_src, trg_key_bias, src_key_bias, p, n_heads):
    x = attn_block(x, x, trg_key_bias, p["self_attn"], p["ln1_g"], p["ln1_b"],
                   n_heads, causal=True, self_attn=True)
    x = attn_block(x, enc_src, src_key_bias, p["cross_attn"],
                   p["ln2_g"], p["ln2_b"], n_heads, causal=False,
                   self_attn=False)
    x = ffn_block(x, p["ffn"], p["ln3_g"], p["ln3_b"])
    return x


def encode(src, src_key_bias, p, n_heads):
    B, Ls = src.shape
    # TODO(synk): embedding gather + positional add kept in XLA (one fusion);
    # a data-dependent gather has no clean BlockSpec equivalent.
    x = p["tok_emb"][src] + p["pos_emb"][jnp.arange(Ls)][None, :, :]
    for lp in p["layers"]:
        x = encoder_layer(x, src_key_bias, lp, n_heads)
    return x


def decode(trg, enc_src, trg_key_bias, src_key_bias, p, n_heads, out_dim):
    B, Lt = trg.shape
    D = p["tok_emb"].shape[1]
    x = p["tok_emb"][trg] + p["pos_emb"][jnp.arange(Lt)][None, :, :]
    for lp in p["layers"]:
        x = decoder_layer(x, enc_src, trg_key_bias, src_key_bias, lp, n_heads)
    # fc_out weight lane dim is padded to the N tile; out_dim is a STATIC int
    # so the slice below is legal under jit.
    logits = linear(x.reshape(B * Lt, D), p["fc_out_w"], p["fc_out_b"])
    return logits[:, :out_dim].reshape(B, Lt, out_dim)


def s2s_forward(src, trg, params, n_heads, out_dim):
    """Mirrors S2S.forward: build masks, run encoder then decoder."""
    # make_src_mask / make_trg_mask: True == masked (padding / future).
    # Only tiny (B, 1, L) additive key biases are materialized here; the
    # causal part is built in-kernel from iota.
    src_key_bias = jnp.where(src == SRC_PAD_IDX, NEG_INF, 0.0
                             ).astype(jnp.float32)[:, None, :]   # (B, 1, Ls)
    trg_key_bias = jnp.where(trg == TRG_PAD_IDX, NEG_INF, 0.0
                             ).astype(jnp.float32)[:, None, :]   # (B, 1, Lt)

    enc_src = encode(src, src_key_bias, params["encoder"], n_heads)
    output = decode(trg, enc_src, trg_key_bias, src_key_bias,
                    params["decoder"], n_heads, out_dim)
    return output


# ------------------------- deterministic params ----------------------------

def init_params(key, src_vocab, trg_vocab, d_model, ffn_dim,
                n_enc_layers, n_dec_layers, max_len, out_dim):
    keys = iter(jax.random.split(key, 512))

    def w(shape, scale=0.02, dtype=jnp.bfloat16):
        return (jax.random.normal(next(keys), shape, dtype=jnp.float32)
                * scale).astype(dtype)

    def attn_params():
        return dict(
            wqkv=w((d_model, 3 * d_model)),
            bqkv=jnp.zeros((3 * d_model,), jnp.float32),
            wo=w((d_model, d_model)),
            bo=jnp.zeros((d_model,), jnp.float32))

    def ffn_params():
        return dict(
            w1=w((d_model, ffn_dim)), b1=jnp.zeros((ffn_dim,), jnp.float32),
            w2=w((ffn_dim, d_model)), b2=jnp.zeros((d_model,), jnp.float32))

    def enc_layer():
        return dict(attn=attn_params(), ffn=ffn_params(),
                    ln1_g=jnp.ones((d_model,), jnp.float32),
                    ln1_b=jnp.zeros((d_model,), jnp.float32),
                    ln2_g=jnp.ones((d_model,), jnp.float32),
                    ln2_b=jnp.zeros((d_model,), jnp.float32))

    def dec_layer():
        return dict(self_attn=attn_params(), cross_attn=attn_params(),
                    ffn=ffn_params(),
                    ln1_g=jnp.ones((d_model,), jnp.float32),
                    ln1_b=jnp.zeros((d_model,), jnp.float32),
                    ln2_g=jnp.ones((d_model,), jnp.float32),
                    ln2_b=jnp.zeros((d_model,), jnp.float32),
                    ln3_g=jnp.ones((d_model,), jnp.float32),
                    ln3_b=jnp.zeros((d_model,), jnp.float32))

    # Pad the output-projection lane dim to a multiple of the linear() N tile
    # (512) so the tiled matmul keeps lane-dense, full-width N tiles; padded
    # columns are zero and sliced off in decode().
    out_pad = ((out_dim + 511) // 512) * 512
    fc_out_w = jnp.zeros((d_model, out_pad), jnp.bfloat16)
    fc_out_w = fc_out_w.at[:, :out_dim].set(w((d_model, out_dim)))

    encoder = dict(tok_emb=w((src_vocab, d_model)),
                   pos_emb=w((max_len, d_model)),
                   layers=[enc_layer() for _ in range(n_enc_layers)])
    decoder = dict(tok_emb=w((trg_vocab, d_model)),
                   pos_emb=w((max_len, d_model)),
                   layers=[dec_layer() for _ in range(n_dec_layers)],
                   fc_out_w=fc_out_w,
                   fc_out_b=jnp.zeros((out_pad,), jnp.float32))
    # NOTE: out_dim is intentionally NOT stored in the pytree (kept static).
    return dict(encoder=encoder, decoder=decoder)


# --------------------------------- main ------------------------------------

if __name__ == "__main__":
    B, Ls, Lt = 2, 8, 8
    d_model, n_heads, ffn_dim = 32, 4, 64
    src_vocab, trg_vocab, out_dim = 20, 12, 12
    max_len = 16

    key = jax.random.PRNGKey(0)
    k_params, k_src, k_trg = jax.random.split(key, 3)

    params = init_params(k_params, src_vocab, trg_vocab, d_model, ffn_dim,
                         n_enc_layers=1, n_dec_layers=1,
                         max_len=max_len, out_dim=out_dim)

    src = jax.random.randint(k_src, (B, Ls), 1, src_vocab, dtype=jnp.int32)
    trg = jax.random.randint(k_trg, (B, Lt), 1, trg_vocab, dtype=jnp.int32)
    # introduce some padding tokens to exercise the masks
    src = src.at[:, -2:].set(SRC_PAD_IDX)
    trg = trg.at[:, -1].set(TRG_PAD_IDX)

    # jit the whole forward: one dispatch; out_dim and n_heads are static.
    forward = jax.jit(lambda s, t, p: s2s_forward(s, t, p, n_heads, out_dim))
    out = forward(src, trg, params)
    out = jax.block_until_ready(out)

    assert out.shape == (B, Lt, out_dim), out.shape
    assert bool(jnp.all(jnp.isfinite(out)))
    print("KERNEL_OK")
</pallas_src>

<mosaic_0001>
module attributes {stable_mosaic.version = 11 : i64} {
  func.func @_attn_block_kernel(%arg0: i32, %arg1: i32, %arg2: memref<1x8x32xbf16, #tpu.memory_space<vmem>>, %arg3: memref<1x8x32xbf16, #tpu.memory_space<vmem>>, %arg4: memref<1x1x8xf32, #tpu.memory_space<vmem>>, %arg5: memref<32x96xbf16, #tpu.memory_space<vmem>>, %arg6: memref<1x96xf32, #tpu.memory_space<vmem>>, %arg7: memref<32x32xbf16, #tpu.memory_space<vmem>>, %arg8: memref<1x32xf32, #tpu.memory_space<vmem>>, %arg9: memref<1x32xf32, #tpu.memory_space<vmem>>, %arg10: memref<1x32xf32, #tpu.memory_space<vmem>>, %arg11: memref<1x8x32xbf16, #tpu.memory_space<vmem>>) attributes {dimension_semantics = [#tpu.dimension_semantics<parallel>, #tpu.dimension_semantics<parallel>], iteration_bounds = array<i64: 2, 1>, scalar_prefetch = 0 : i64, scratch_operands = 0 : i64, tpu.core_type = #tpu.core_type<tc>, window_params = [{transform_indices = @transform_0, window_bounds = array<i64: 1, 8, 32>}, {transform_indices = @transform_1, window_bounds = array<i64: 1, 8, 32>}, {transform_indices = @transform_2, window_bounds = array<i64: 1, 1, 8>}, {pipeline_mode = #tpu.pipeline_mode<synchronous>, transform_indices = @transform_3, window_bounds = array<i64: 32, 96>}, {pipeline_mode = #tpu.pipeline_mode<synchronous>, transform_indices = @transform_4, window_bounds = array<i64: 1, 96>}, {pipeline_mode = #tpu.pipeline_mode<synchronous>, transform_indices = @transform_5, window_bounds = array<i64: 32, 32>}, {pipeline_mode = #tpu.pipeline_mode<synchronous>, transform_indices = @transform_6, window_bounds = array<i64: 1, 32>}, {pipeline_mode = #tpu.pipeline_mode<synchronous>, transform_indices = @transform_7, window_bounds = array<i64: 1, 32>}, {pipeline_mode = #tpu.pipeline_mode<synchronous>, transform_indices = @transform_8, window_bounds = array<i64: 1, 32>}, {transform_indices = @transform_9, window_bounds = array<i64: 1, 8, 32>}]} {
    %c0 = arith.constant 0 : index
    %c0_0 = arith.constant 0 : index
    %c0_1 = arith.constant 0 : index
    %0 = vector.load %arg2[%c0, %c0_0, %c0_1] : memref<1x8x32xbf16, #tpu.memory_space<vmem>>, vector<1x8x32xbf16>
    %1 = vector.shape_cast %0 : vector<1x8x32xbf16> to vector<8x32xbf16>
    %c0_2 = arith.constant 0 : index
    %c0_3 = arith.constant 0 : index
    %2 = vector.load %arg5[%c0_2, %c0_3] : memref<32x96xbf16, #tpu.memory_space<vmem>>, vector<32x96xbf16>
    %c0_4 = arith.constant 0 : index
    %c0_5 = arith.constant 0 : index
    %3 = vector.load %arg6[%c0_4, %c0_5] : memref<1x96xf32, #tpu.memory_space<vmem>>, vector<1x96xf32>
    %cst = arith.constant dense<0.000000e+00> : vector<8x96xf32>
    %4 = tpu.matmul %1, %2, %cst {dimension_numbers = #tpu.dot_dimension_numbers<[1], [0], [0], [1], [0, 0, 1, 1], [], []>} : vector<8x32xbf16>, vector<32x96xbf16>, vector<8x96xf32> -> vector<8x96xf32>
    %5 = vector.broadcast %3 : vector<1x96xf32> to vector<8x96xf32>
    %6 = arith.addf %4, %5 : vector<8x96xf32>
    %7 = vector.extract_strided_slice %6 {offsets = [0, 0], sizes = [8, 32], strides = [1, 1]} : vector<8x96xf32> to vector<8x32xf32>
    %8 = vector.extract_strided_slice %6 {offsets = [0, 32], sizes = [8, 32], strides = [1, 1]} : vector<8x96xf32> to vector<8x32xf32>
    %9 = vector.extract_strided_slice %6 {offsets = [0, 64], sizes = [8, 32], strides = [1, 1]} : vector<8x96xf32> to vector<8x32xf32>
    %c0_6 = arith.constant 0 : index
    %c0_7 = arith.constant 0 : index
    %c0_8 = arith.constant 0 : index
    %10 = vector.load %arg4[%c0_6, %c0_7, %c0_8] : memref<1x1x8xf32, #tpu.memory_space<vmem>>, vector<1x1x8xf32>
    %11 = vector.shape_cast %10 : vector<1x1x8xf32> to vector<1x8xf32>
    %cst_9 = arith.constant 0.353553385 : f32
    %12 = vector.broadcast %cst_9 : f32 to vector<8x32xf32>
    %13 = arith.mulf %7, %12 : vector<8x32xf32>
    %14 = arith.truncf %13 : vector<8x32xf32> to vector<8x32xbf16>
    %15 = arith.truncf %8 : vector<8x32xf32> to vector<8x32xbf16>
    %16 = arith.truncf %9 : vector<8x32xf32> to vector<8x32xbf16>
    %c0_10 = arith.constant 0 : index
    %c0_11 = arith.constant 0 : index
    %17 = vector.load %arg7[%c0_10, %c0_11] : memref<32x32xbf16, #tpu.memory_space<vmem>>, vector<32x32xbf16>
    %cst_12 = arith.constant 0.000000e+00 : f32
    %18 = vector.broadcast %cst_12 : f32 to vector<8x32xf32>
    %19 = vector.extract_strided_slice %14 {offsets = [0, 0], sizes = [8, 8], strides = [1, 1]} : vector<8x32xbf16> to vector<8x8xbf16>
    %20 = vector.extract_strided_slice %15 {offsets = [0, 0], sizes = [8, 8], strides = [1, 1]} : vector<8x32xbf16> to vector<8x8xbf16>
    %cst_13 = arith.constant dense<0.000000e+00> : vector<8x8xf32>
    %21 = tpu.matmul %19, %20, %cst_13 {dimension_numbers = #tpu.dot_dimension_numbers<[1], [1], [0], [0], [0, 0, 1, 0], [], []>} : vector<8x8xbf16>, vector<8x8xbf16>, vector<8x8xf32> -> vector<8x8xf32>
    %22 = vector.broadcast %11 : vector<1x8xf32> to vector<8x8xf32>
    %23 = arith.addf %21, %22 : vector<8x8xf32>
    %cst_14 = arith.constant dense<0xFF800000> : vector<8xf32>
    %24 = vector.multi_reduction <maximumf>, %23, %cst_14 [1] : vector<8x8xf32> to vector<8xf32>
    %25 = vector.shape_cast %24 : vector<8xf32> to vector<8x1xf32>
    %26 = vector.broadcast %25 : vector<8x1xf32> to vector<8x8xf32>
    %27 = arith.subf %23, %26 : vector<8x8xf32>
    %28 = math.exp %27 : vector<8x8xf32>
    %cst_15 = arith.constant dense<0.000000e+00> : vector<8xf32>
    %29 = vector.multi_reduction <add>, %28, %cst_15 [1] : vector<8x8xf32> to vector<8xf32>
    %30 = vector.shape_cast %29 : vector<8xf32> to vector<8x1xf32>
    %31 = tpu.reciprocal %30 {approx = true} : vector<8x1xf32> -> vector<8x1xf32>
    %32 = vector.broadcast %31 : vector<8x1xf32> to vector<8x8xf32>
    %33 = arith.mulf %28, %32 : vector<8x8xf32>
    %34 = arith.truncf %33 : vector<8x8xf32> to vector<8x8xbf16>
    %35 = vector.extract_strided_slice %16 {offsets = [0, 0], sizes = [8, 8], strides = [1, 1]} : vector<8x32xbf16> to vector<8x8xbf16>
    %cst_16 = arith.constant dense<0.000000e+00> : vector<8x8xf32>
    %36 = tpu.matmul %34, %35, %cst_16 {dimension_numbers = #tpu.dot_dimension_numbers<[1], [0], [0], [1], [0, 0, 1, 1], [], []>} : vector<8x8xbf16>, vector<8x8xbf16>, vector<8x8xf32> -> vector<8x8xf32>
    %37 = arith.truncf %36 : vector<8x8xf32> to vector<8x8xbf16>
    %38 = vector.extract_strided_slice %17 {offsets = [0, 0], sizes = [8, 32], strides = [1, 1]} : vector<32x32xbf16> to vector<8x32xbf16>
    %cst_17 = arith.constant dense<0.000000e+00> : vector<8x32xf32>
    %39 = tpu.matmul %37, %38, %cst_17 {dimension_numbers = #tpu.dot_dimension_numbers<[1], [0], [0], [1], [0, 0, 1, 1], [], []>} : vector<8x8xbf16>, vector<8x32xbf16>, vector<8x32xf32> -> vector<8x32xf32>
    %40 = arith.addf %18, %39 : vector<8x32xf32>
    %41 = vector.extract_strided_slice %14 {offsets = [0, 8], sizes = [8, 8], strides = [1, 1]} : vector<8x32xbf16> to vector<8x8xbf16>
    %42 = vector.extract_strided_slice %15 {offsets = [0, 8], sizes = [8, 8], strides = [1, 1]} : vector<8x32xbf16> to vector<8x8xbf16>
    %cst_18 = arith.constant dense<0.000000e+00> : vector<8x8xf32>
    %43 = tpu.matmul %41, %42, %cst_18 {dimension_numbers = #tpu.dot_dimension_numbers<[1], [1], [0], [0], [0, 0, 1, 0], [], []>} : vector<8x8xbf16>, vector<8x8xbf16>, vector<8x8xf32> -> vector<8x8xf32>
    %44 = vector.broadcast %11 : vector<1x8xf32> to vector<8x8xf32>
    %45 = arith.addf %43, %44 : vector<8x8xf32>
    %cst_19 = arith.constant dense<0xFF800000> : vector<8xf32>
    %46 = vector.multi_reduction <maximumf>, %45, %cst_19 [1] : vector<8x8xf32> to vector<8xf32>
    %47 = vector.shape_cast %46 : vector<8xf32> to vector<8x1xf32>
    %48 = vector.broadcast %47 : vector<8x1xf32> to vector<8x8xf32>
    %49 = arith.subf %45, %48 : vector<8x8xf32>
    %50 = math.exp %49 : vector<8x8xf32>
    %cst_20 = arith.constant dense<0.000000e+00> : vector<8xf32>
    %51 = vector.multi_reduction <add>, %50, %cst_20 [1] : vector<8x8xf32> to vector<8xf32>
    %52 = vector.shape_cast %51 : vector<8xf32> to vector<8x1xf32>
    %53 = tpu.reciprocal %52 {approx = true} : vector<8x1xf32> -> vector<8x1xf32>
    %54 = vector.broadcast %53 : vector<8x1xf32> to vector<8x8xf32>
    %55 = arith.mulf %50, %54 : vector<8x8xf32>
    %56 = arith.truncf %55 : vector<8x8xf32> to vector<8x8xbf16>
    %57 = vector.extract_strided_slice %16 {offsets = [0, 8], sizes = [8, 8], strides = [1, 1]} : vector<8x32xbf16> to vector<8x8xbf16>
    %cst_21 = arith.constant dense<0.000000e+00> : vector<8x8xf32>
    %58 = tpu.matmul %56, %57, %cst_21 {dimension_numbers = #tpu.dot_dimension_numbers<[1], [0], [0], [1], [0, 0, 1, 1], [], []>} : vector<8x8xbf16>, vector<8x8xbf16>, vector<8x8xf32> -> vector<8x8xf32>
    %59 = arith.truncf %58 : vector<8x8xf32> to vector<8x8xbf16>
    %60 = vector.extract_strided_slice %17 {offsets = [8, 0], sizes = [8, 32], strides = [1, 1]} : vector<32x32xbf16> to vector<8x32xbf16>
    %cst_22 = arith.constant dense<0.000000e+00> : vector<8x32xf32>
    %61 = tpu.matmul %59, %60, %cst_22 {dimension_numbers = #tpu.dot_dimension_numbers<[1], [0], [0], [1], [0, 0, 1, 1], [], []>} : vector<8x8xbf16>, vector<8x32xbf16>, vector<8x32xf32> -> vector<8x32xf32>
    %62 = arith.addf %40, %61 : vector<8x32xf32>
    %63 = vector.extract_strided_slice %14 {offsets = [0, 16], sizes = [8, 8], strides = [1, 1]} : vector<8x32xbf16> to vector<8x8xbf16>
    %64 = vector.extract_strided_slice %15 {offsets = [0, 16], sizes = [8, 8], strides = [1, 1]} : vector<8x32xbf16> to vector<8x8xbf16>
    %cst_23 = arith.constant dense<0.000000e+00> : vector<8x8xf32>
    %65 = tpu.matmul %63, %64, %cst_23 {dimension_numbers = #tpu.dot_dimension_numbers<[1], [1], [0], [0], [0, 0, 1, 0], [], []>} : vector<8x8xbf16>, vector<8x8xbf16>, vector<8x8xf32> -> vector<8x8xf32>
    %66 = vector.broadcast %11 : vector<1x8xf32> to vector<8x8xf32>
    %67 = arith.addf %65, %66 : vector<8x8xf32>
    %cst_24 = arith.constant dense<0xFF800000> : vector<8xf32>
    %68 = vector.multi_reduction <maximumf>, %67, %cst_24 [1] : vector<8x8xf32> to vector<8xf32>
    %69 = vector.shape_cast %68 : vector<8xf32> to vector<8x1xf32>
    %70 = vector.broadcast %69 : vector<8x1xf32> to vector<8x8xf32>
    %71 = arith.subf %67, %70 : vector<8x8xf32>
    %72 = math.exp %71 : vector<8x8xf32>
    %cst_25 = arith.constant dense<0.000000e+00> : vector<8xf32>
    %73 = vector.multi_reduction <add>, %72, %cst_25 [1] : vector<8x8xf32> to vector<8xf32>
    %74 = vector.shape_cast %73 : vector<8xf32> to vector<8x1xf32>
    %75 = tpu.reciprocal %74 {approx = true} : vector<8x1xf32> -> vector<8x1xf32>
    %76 = vector.broadcast %75 : vector<8x1xf32> to vector<8x8xf32>
    %77 = arith.mulf %72, %76 : vector<8x8xf32>
    %78 = arith.truncf %77 : vector<8x8xf32> to vector<8x8xbf16>
    %79 = vector.extract_strided_slice %16 {offsets = [0, 16], sizes = [8, 8], strides = [1, 1]} : vector<8x32xbf16> to vector<8x8xbf16>
    %cst_26 = arith.constant dense<0.000000e+00> : vector<8x8xf32>
    %80 = tpu.matmul %78, %79, %cst_26 {dimension_numbers = #tpu.dot_dimension_numbers<[1], [0], [0], [1], [0, 0, 1, 1], [], []>} : vector<8x8xbf16>, vector<8x8xbf16>, vector<8x8xf32> -> vector<8x8xf32>
    %81 = arith.truncf %80 : vector<8x8xf32> to vector<8x8xbf16>
    %82 = vector.extract_strided_slice %17 {offsets = [16, 0], sizes = [8, 32], strides = [1, 1]} : vector<32x32xbf16> to vector<8x32xbf16>
    %cst_27 = arith.constant dense<0.000000e+00> : vector<8x32xf32>
    %83 = tpu.matmul %81, %82, %cst_27 {dimension_numbers = #tpu.dot_dimension_numbers<[1], [0], [0], [1], [0, 0, 1, 1], [], []>} : vector<8x8xbf16>, vector<8x32xbf16>, vector<8x32xf32> -> vector<8x32xf32>
    %84 = arith.addf %62, %83 : vector<8x32xf32>
    %85 = vector.extract_strided_slice %14 {offsets = [0, 24], sizes = [8, 8], strides = [1, 1]} : vector<8x32xbf16> to vector<8x8xbf16>
    %86 = vector.extract_strided_slice %15 {offsets = [0, 24], sizes = [8, 8], strides = [1, 1]} : vector<8x32xbf16> to vector<8x8xbf16>
    %cst_28 = arith.constant dense<0.000000e+00> : vector<8x8xf32>
    %87 = tpu.matmul %85, %86, %cst_28 {dimension_numbers = #tpu.dot_dimension_numbers<[1], [1], [0], [0], [0, 0, 1, 0], [], []>} : vector<8x8xbf16>, vector<8x8xbf16>, vector<8x8xf32> -> vector<8x8xf32>
    %88 = vector.broadcast %11 : vector<1x8xf32> to vector<8x8xf32>
    %89 = arith.addf %87, %88 : vector<8x8xf32>
    %cst_29 = arith.constant dense<0xFF800000> : vector<8xf32>
    %90 = vector.multi_reduction <maximumf>, %89, %cst_29 [1] : vector<8x8xf32> to vector<8xf32>
    %91 = vector.shape_cast %90 : vector<8xf32> to vector<8x1xf32>
    %92 = vector.broadcast %91 : vector<8x1xf32> to vector<8x8xf32>
    %93 = arith.subf %89, %92 : vector<8x8xf32>
    %94 = math.exp %93 : vector<8x8xf32>
    %cst_30 = arith.constant dense<0.000000e+00> : vector<8xf32>
    %95 = vector.multi_reduction <add>, %94, %cst_30 [1] : vector<8x8xf32> to vector<8xf32>
    %96 = vector.shape_cast %95 : vector<8xf32> to vector<8x1xf32>
    %97 = tpu.reciprocal %96 {approx = true} : vector<8x1xf32> -> vector<8x1xf32>
    %98 = vector.broadcast %97 : vector<8x1xf32> to vector<8x8xf32>
    %99 = arith.mulf %94, %98 : vector<8x8xf32>
    %100 = arith.truncf %99 : vector<8x8xf32> to vector<8x8xbf16>
    %101 = vector.extract_strided_slice %16 {offsets = [0, 24], sizes = [8, 8], strides = [1, 1]} : vector<8x32xbf16> to vector<8x8xbf16>
    %cst_31 = arith.constant dense<0.000000e+00> : vector<8x8xf32>
    %102 = tpu.matmul %100, %101, %cst_31 {dimension_numbers = #tpu.dot_dimension_numbers<[1], [0], [0], [1], [0, 0, 1, 1], [], []>} : vector<8x8xbf16>, vector<8x8xbf16>, vector<8x8xf32> -> vector<8x8xf32>
    %103 = arith.truncf %102 : vector<8x8xf32> to vector<8x8xbf16>
    %104 = vector.extract_strided_slice %17 {offsets = [24, 0], sizes = [8, 32], strides = [1, 1]} : vector<32x32xbf16> to vector<8x32xbf16>
    %cst_32 = arith.constant dense<0.000000e+00> : vector<8x32xf32>
    %105 = tpu.matmul %103, %104, %cst_32 {dimension_numbers = #tpu.dot_dimension_numbers<[1], [0], [0], [1], [0, 0, 1, 1], [], []>} : vector<8x8xbf16>, vector<8x32xbf16>, vector<8x32xf32> -> vector<8x32xf32>
    %106 = arith.addf %84, %105 : vector<8x32xf32>
    %c0_33 = arith.constant 0 : index
    %c0_34 = arith.constant 0 : index
    %107 = vector.load %arg8[%c0_33, %c0_34] : memref<1x32xf32, #tpu.memory_space<vmem>>, vector<1x32xf32>
    %108 = vector.broadcast %107 : vector<1x32xf32> to vector<8x32xf32>
    %109 = arith.addf %106, %108 : vector<8x32xf32>
    %110 = arith.extf %1 : vector<8x32xbf16> to vector<8x32xf32>
    %111 = arith.addf %110, %109 : vector<8x32xf32>
    %cst_35 = arith.constant dense<0.000000e+00> : vector<8xf32>
    %112 = vector.multi_reduction <add>, %111, %cst_35 [1] : vector<8x32xf32> to vector<8xf32>
    %113 = vector.shape_cast %112 : vector<8xf32> to vector<8x1xf32>
    %cst_36 = arith.constant 3.200000e+01 : f32
    %114 = vector.broadcast %cst_36 : f32 to vector<8x1xf32>
    %115 = arith.divf %113, %114 : vector<8x1xf32>
    %116 = vector.broadcast %115 : vector<8x1xf32> to vector<8x32xf32>
    %117 = arith.subf %111, %116 : vector<8x32xf32>
    %118 = arith.mulf %117, %117 : vector<8x32xf32>
    %cst_37 = arith.constant dense<0.000000e+00> : vector<8xf32>
    %119 = vector.multi_reduction <add>, %118, %cst_37 [1] : vector<8x32xf32> to vector<8xf32>
    %120 = vector.shape_cast %119 : vector<8xf32> to vector<8x1xf32>
    %cst_38 = arith.constant 3.200000e+01 : f32
    %121 = vector.broadcast %cst_38 : f32 to vector<8x1xf32>
    %122 = arith.divf %120, %121 : vector<8x1xf32>
    %123 = vector.broadcast %115 : vector<8x1xf32> to vector<8x32xf32>
    %124 = arith.subf %111, %123 : vector<8x32xf32>
    %cst_39 = arith.constant 9.99999974E-6 : f32
    %125 = vector.broadcast %cst_39 : f32 to vector<8x1xf32>
    %126 = arith.addf %122, %125 : vector<8x1xf32>
    %127 = math.rsqrt %126 : vector<8x1xf32>
    %128 = vector.broadcast %127 : vector<8x1xf32> to vector<8x32xf32>
    %129 = arith.mulf %124, %128 : vector<8x32xf32>
    %c0_40 = arith.constant 0 : index
    %c0_41 = arith.constant 0 : index
    %130 = vector.load %arg9[%c0_40, %c0_41] : memref<1x32xf32, #tpu.memory_space<vmem>>, vector<1x32xf32>
    %131 = vector.broadcast %130 : vector<1x32xf32> to vector<8x32xf32>
    %132 = arith.mulf %129, %131 : vector<8x32xf32>
    %c0_42 = arith.constant 0 : index
    %c0_43 = arith.constant 0 : index
    %133 = vector.load %arg10[%c0_42, %c0_43] : memref<1x32xf32, #tpu.memory_space<vmem>>, vector<1x32xf32>
    %134 = vector.broadcast %133 : vector<1x32xf32> to vector<8x32xf32>
    %135 = arith.addf %132, %134 : vector<8x32xf32>
    %136 = arith.truncf %135 : vector<8x32xf32> to vector<8x32xbf16>
    %c0_44 = arith.constant 0 : index
    %c0_45 = arith.constant 0 : index
    %c0_46 = arith.constant 0 : index
    %137 = vector.load %arg11[%c0_44, %c0_45, %c0_46] : memref<1x8x32xbf16, #tpu.memory_space<vmem>>, vector<1x8x32xbf16>
    %138 = vector.shape_cast %137 : vector<1x8x32xbf16> to vector<8x32xbf16>
    %139 = vector.shape_cast %136 : vector<8x32xbf16> to vector<1x8x32xbf16>
    tpu.vector_store %arg11[%c0_44, %c0_45, %c0_46], %139 {strides = array<i32>} : memref<1x8x32xbf16, #tpu.memory_space<vmem>>, vector<1x8x32xbf16>,
    return
  }
  func.func @transform_0(%arg0: i32, %arg1: i32) -> (i32, i32, i32) {
    %c0_i32 = arith.constant 0 : i32
    %c0_i32_0 = arith.constant 0 : i32
    return %arg0, %arg1, %c0_i32 : i32, i32, i32
  }
  func.func @transform_1(%arg0: i32, %arg1: i32) -> (i32, i32, i32) {
    %c0_i32 = arith.constant 0 : i32
    %c0_i32_0 = arith.constant 0 : i32
    %c0_i32_1 = arith.constant 0 : i32
    return %arg0, %c0_i32, %c0_i32_0 : i32, i32, i32
  }
  func.func @transform_2(%arg0: i32, %arg1: i32) -> (i32, i32, i32) {
    %c0_i32 = arith.constant 0 : i32
    %c0_i32_0 = arith.constant 0 : i32
    %c0_i32_1 = arith.constant 0 : i32
    return %arg0, %c0_i32, %c0_i32_0 : i32, i32, i32
  }
  func.func @transform_3(%arg0: i32, %arg1: i32) -> (i32, i32) {
    %c0_i32 = arith.constant 0 : i32
    %c0_i32_0 = arith.constant 0 : i32
    %c0_i32_1 = arith.constant 0 : i32
    return %c0_i32, %c0_i32_0 : i32, i32
  }
  func.func @transform_4(%arg0: i32, %arg1: i32) -> (i32, i32) {
    %c0_i32 = arith.constant 0 : i32
    %c0_i32_0 = arith.constant 0 : i32
    %c0_i32_1 = arith.constant 0 : i32
    return %c0_i32, %c0_i32_0 : i32, i32
  }
  func.func @transform_5(%arg0: i32, %arg1: i32) -> (i32, i32) {
    %c0_i32 = arith.constant 0 : i32
    %c0_i32_0 = arith.constant 0 : i32
    %c0_i32_1 = arith.constant 0 : i32
    return %c0_i32, %c0_i32_0 : i32, i32
  }
  func.func @transform_6(%arg0: i32, %arg1: i32) -> (i32, i32) {
    %c0_i32 = arith.constant 0 : i32
    %c0_i32_0 = arith.constant 0 : i32
    %c0_i32_1 = arith.constant 0 : i32
    return %c0_i32, %c0_i32_0 : i32, i32
  }
  func.func @transform_7(%arg0: i32, %arg1: i32) -> (i32, i32) {
    %c0_i32 = arith.constant 0 : i32
    %c0_i32_0 = arith.constant 0 : i32
    %c0_i32_1 = arith.constant 0 : i32
    return %c0_i32, %c0_i32_0 : i32, i32
  }
  func.func @transform_8(%arg0: i32, %arg1: i32) -> (i32, i32) {
    %c0_i32 = arith.constant 0 : i32
    %c0_i32_0 = arith.constant 0 : i32
    %c0_i32_1 = arith.constant 0 : i32
    return %c0_i32, %c0_i32_0 : i32, i32
  }
  func.func @transform_9(%arg0: i32, %arg1: i32) -> (i32, i32, i32) {
    %c0_i32 = arith.constant 0 : i32
    %c0_i32_0 = arith.constant 0 : i32
    return %arg0, %arg1, %c0_i32 : i32, i32, i32
  }
}

module attributes {stable_mosaic.version = 11 : i64} {
  func.func @_ffn_block_kernel(%arg0: i32, %arg1: i32, %arg2: memref<1x8x32xbf16, #tpu.memory_space<vmem>>, %arg3: memref<32x64xbf16, #tpu.memory_space<vmem>>, %arg4: memref<1x64xf32, #tpu.memory_space<vmem>>, %arg5: memref<64x32xbf16, #tpu.memory_space<vmem>>, %arg6: memref<1x32xf32, #tpu.memory_space<vmem>>, %arg7: memref<1x32xf32, #tpu.memory_space<vmem>>, %arg8: memref<1x32xf32, #tpu.memory_space<vmem>>, %arg9: memref<1x8x32xbf16, #tpu.memory_space<vmem>>) attributes {dimension_semantics = [#tpu.dimension_semantics<parallel>, #tpu.dimension_semantics<parallel>], iteration_bounds = array<i64: 2, 1>, scalar_prefetch = 0 : i64, scratch_operands = 0 : i64, tpu.core_type = #tpu.core_type<tc>, window_params = [{transform_indices = @transform_0, window_bounds = array<i64: 1, 8, 32>}, {pipeline_mode = #tpu.pipeline_mode<synchronous>, transform_indices = @transform_1, window_bounds = array<i64: 32, 64>}, {pipeline_mode = #tpu.pipeline_mode<synchronous>, transform_indices = @transform_2, window_bounds = array<i64: 1, 64>}, {pipeline_mode = #tpu.pipeline_mode<synchronous>, transform_indices = @transform_3, window_bounds = array<i64: 64, 32>}, {pipeline_mode = #tpu.pipeline_mode<synchronous>, transform_indices = @transform_4, window_bounds = array<i64: 1, 32>}, {pipeline_mode = #tpu.pipeline_mode<synchronous>, transform_indices = @transform_5, window_bounds = array<i64: 1, 32>}, {pipeline_mode = #tpu.pipeline_mode<synchronous>, transform_indices = @transform_6, window_bounds = array<i64: 1, 32>}, {transform_indices = @transform_7, window_bounds = array<i64: 1, 8, 32>}]} {
    %c0 = arith.constant 0 : index
    %c0_0 = arith.constant 0 : index
    %c0_1 = arith.constant 0 : index
    %0 = vector.load %arg2[%c0, %c0_0, %c0_1] : memref<1x8x32xbf16, #tpu.memory_space<vmem>>, vector<1x8x32xbf16>
    %1 = vector.shape_cast %0 : vector<1x8x32xbf16> to vector<8x32xbf16>
    %c0_2 = arith.constant 0 : index
    %c0_3 = arith.constant 0 : index
    %2 = vector.load %arg3[%c0_2, %c0_3] : memref<32x64xbf16, #tpu.memory_space<vmem>>, vector<32x64xbf16>
    %cst = arith.constant dense<0.000000e+00> : vector<8x64xf32>
    %3 = tpu.matmul %1, %2, %cst {dimension_numbers = #tpu.dot_dimension_numbers<[1], [0], [0], [1], [0, 0, 1, 1], [], []>} : vector<8x32xbf16>, vector<32x64xbf16>, vector<8x64xf32> -> vector<8x64xf32>
    %c0_4 = arith.constant 0 : index
    %c0_5 = arith.constant 0 : index
    %4 = vector.load %arg4[%c0_4, %c0_5] : memref<1x64xf32, #tpu.memory_space<vmem>>, vector<1x64xf32>
    %5 = vector.broadcast %4 : vector<1x64xf32> to vector<8x64xf32>
    %6 = arith.addf %3, %5 : vector<8x64xf32>
    %cst_6 = arith.constant 0.000000e+00 : f32
    %7 = vector.broadcast %cst_6 : f32 to vector<8x64xf32>
    %8 = arith.maximumf %6, %7 : vector<8x64xf32>
    %9 = arith.truncf %8 : vector<8x64xf32> to vector<8x64xbf16>
    %c0_7 = arith.constant 0 : index
    %c0_8 = arith.constant 0 : index
    %10 = vector.load %arg5[%c0_7, %c0_8] : memref<64x32xbf16, #tpu.memory_space<vmem>>, vector<64x32xbf16>
    %cst_9 = arith.constant dense<0.000000e+00> : vector<8x32xf32>
    %11 = tpu.matmul %9, %10, %cst_9 {dimension_numbers = #tpu.dot_dimension_numbers<[1], [0], [0], [1], [0, 0, 1, 1], [], []>} : vector<8x64xbf16>, vector<64x32xbf16>, vector<8x32xf32> -> vector<8x32xf32>
    %c0_10 = arith.constant 0 : index
    %c0_11 = arith.constant 0 : index
    %12 = vector.load %arg6[%c0_10, %c0_11] : memref<1x32xf32, #tpu.memory_space<vmem>>, vector<1x32xf32>
    %13 = vector.broadcast %12 : vector<1x32xf32> to vector<8x32xf32>
    %14 = arith.addf %11, %13 : vector<8x32xf32>
    %15 = arith.extf %1 : vector<8x32xbf16> to vector<8x32xf32>
    %16 = arith.addf %15, %14 : vector<8x32xf32>
    %cst_12 = arith.constant dense<0.000000e+00> : vector<8xf32>
    %17 = vector.multi_reduction <add>, %16, %cst_12 [1] : vector<8x32xf32> to vector<8xf32>
    %18 = vector.shape_cast %17 : vector<8xf32> to vector<8x1xf32>
    %cst_13 = arith.constant 3.200000e+01 : f32
    %19 = vector.broadcast %cst_13 : f32 to vector<8x1xf32>
    %20 = arith.divf %18, %19 : vector<8x1xf32>
    %21 = vector.broadcast %20 : vector<8x1xf32> to vector<8x32xf32>
    %22 = arith.subf %16, %21 : vector<8x32xf32>
    %23 = arith.mulf %22, %22 : vector<8x32xf32>
    %cst_14 = arith.constant dense<0.000000e+00> : vector<8xf32>
    %24 = vector.multi_reduction <add>, %23, %cst_14 [1] : vector<8x32xf32> to vector<8xf32>
    %25 = vector.shape_cast %24 : vector<8xf32> to vector<8x1xf32>
    %cst_15 = arith.constant 3.200000e+01 : f32
    %26 = vector.broadcast %cst_15 : f32 to vector<8x1xf32>
    %27 = arith.divf %25, %26 : vector<8x1xf32>
    %28 = vector.broadcast %20 : vector<8x1xf32> to vector<8x32xf32>
    %29 = arith.subf %16, %28 : vector<8x32xf32>
    %cst_16 = arith.constant 9.99999974E-6 : f32
    %30 = vector.broadcast %cst_16 : f32 to vector<8x1xf32>
    %31 = arith.addf %27, %30 : vector<8x1xf32>
    %32 = math.rsqrt %31 : vector<8x1xf32>
    %33 = vector.broadcast %32 : vector<8x1xf32> to vector<8x32xf32>
    %34 = arith.mulf %29, %33 : vector<8x32xf32>
    %c0_17 = arith.constant 0 : index
    %c0_18 = arith.constant 0 : index
    %35 = vector.load %arg7[%c0_17, %c0_18] : memref<1x32xf32, #tpu.memory_space<vmem>>, vector<1x32xf32>
    %36 = vector.broadcast %35 : vector<1x32xf32> to vector<8x32xf32>
    %37 = arith.mulf %34, %36 : vector<8x32xf32>
    %c0_19 = arith.constant 0 : index
    %c0_20 = arith.constant 0 : index
    %38 = vector.load %arg8[%c0_19, %c0_20] : memref<1x32xf32, #tpu.memory_space<vmem>>, vector<1x32xf32>
    %39 = vector.broadcast %38 : vector<1x32xf32> to vector<8x32xf32>
    %40 = arith.addf %37, %39 : vector<8x32xf32>
    %41 = arith.truncf %40 : vector<8x32xf32> to vector<8x32xbf16>
    %c0_21 = arith.constant 0 : index
    %c0_22 = arith.constant 0 : index
    %c0_23 = arith.constant 0 : index
    %42 = vector.load %arg9[%c0_21, %c0_22, %c0_23] : memref<1x8x32xbf16, #tpu.memory_space<vmem>>, vector<1x8x32xbf16>
    %43 = vector.shape_cast %42 : vector<1x8x32xbf16> to vector<8x32xbf16>
    %44 = vector.shape_cast %41 : vector<8x32xbf16> to vector<1x8x32xbf16>
    tpu.vector_store %arg9[%c0_21, %c0_22, %c0_23], %44 {strides = array<i32>} : memref<1x8x32xbf16, #tpu.memory_space<vmem>>, vector<1x8x32xbf16>,
    return
  }
  func.func @transform_0(%arg0: i32, %arg1: i32) -> (i32, i32, i32) {
    %c0_i32 = arith.constant 0 : i32
    %c0_i32_0 = arith.constant 0 : i32
    return %arg0, %arg1, %c0_i32 : i32, i32, i32
  }
  func.func @transform_1(%arg0: i32, %arg1: i32) -> (i32, i32) {
    %c0_i32 = arith.constant 0 : i32
    %c0_i32_0 = arith.constant 0 : i32
    %c0_i32_1 = arith.constant 0 : i32
    return %c0_i32, %c0_i32_0 : i32, i32
  }
  func.func @transform_2(%arg0: i32, %arg1: i32) -> (i32, i32) {
    %c0_i32 = arith.constant 0 : i32
    %c0_i32_0 = arith.constant 0 : i32
    %c0_i32_1 = arith.constant 0 : i32
    return %c0_i32, %c0_i32_0 : i32, i32
  }
  func.func @transform_3(%arg0: i32, %arg1: i32) -> (i32, i32) {
    %c0_i32 = arith.constant 0 : i32
    %c0_i32_0 = arith.constant 0 : i32
    %c0_i32_1 = arith.constant 0 : i32
    return %c0_i32, %c0_i32_0 : i32, i32
  }
  func.func @transform_4(%arg0: i32, %arg1: i32) -> (i32, i32) {
    %c0_i32 = arith.constant 0 : i32
    %c0_i32_0 = arith.constant 0 : i32
    %c0_i32_1 = arith.constant 0 : i32
    return %c0_i32, %c0_i32_0 : i32, i32
  }
  func.func @transform_5(%arg0: i32, %arg1: i32) -> (i32, i32) {
    %c0_i32 = arith.constant 0 : i32
    %c0_i32_0 = arith.constant 0 : i32
    %c0_i32_1 = arith.constant 0 : i32
    return %c0_i32, %c0_i32_0 : i32, i32
  }
  func.func @transform_6(%arg0: i32, %arg1: i32) -> (i32, i32) {
    %c0_i32 = arith.constant 0 : i32
    %c0_i32_0 = arith.constant 0 : i32
    %c0_i32_1 = arith.constant 0 : i32
    return %c0_i32, %c0_i32_0 : i32, i32
  }
  func.func @transform_7(%arg0: i32, %arg1: i32) -> (i32, i32, i32) {
    %c0_i32 = arith.constant 0 : i32
    %c0_i32_0 = arith.constant 0 : i32
    return %arg0, %arg1, %c0_i32 : i32, i32, i32
  }
}

module attributes {stable_mosaic.version = 11 : i64} {
  func.func @_attn_block_kernel(%arg0: i32, %arg1: i32, %arg2: memref<1x8x32xbf16, #tpu.memory_space<vmem>>, %arg3: memref<1x8x32xbf16, #tpu.memory_space<vmem>>, %arg4: memref<1x1x8xf32, #tpu.memory_space<vmem>>, %arg5: memref<32x96xbf16, #tpu.memory_space<vmem>>, %arg6: memref<1x96xf32, #tpu.memory_space<vmem>>, %arg7: memref<32x32xbf16, #tpu.memory_space<vmem>>, %arg8: memref<1x32xf32, #tpu.memory_space<vmem>>, %arg9: memref<1x32xf32, #tpu.memory_space<vmem>>, %arg10: memref<1x32xf32, #tpu.memory_space<vmem>>, %arg11: memref<1x8x32xbf16, #tpu.memory_space<vmem>>) attributes {dimension_semantics = [#tpu.dimension_semantics<parallel>, #tpu.dimension_semantics<parallel>], iteration_bounds = array<i64: 2, 1>, scalar_prefetch = 0 : i64, scratch_operands = 0 : i64, tpu.core_type = #tpu.core_type<tc>, window_params = [{transform_indices = @transform_0, window_bounds = array<i64: 1, 8, 32>}, {transform_indices = @transform_1, window_bounds = array<i64: 1, 8, 32>}, {transform_indices = @transform_2, window_bounds = array<i64: 1, 1, 8>}, {pipeline_mode = #tpu.pipeline_mode<synchronous>, transform_indices = @transform_3, window_bounds = array<i64: 32, 96>}, {pipeline_mode = #tpu.pipeline_mode<synchronous>, transform_indices = @transform_4, window_bounds = array<i64: 1, 96>}, {pipeline_mode = #tpu.pipeline_mode<synchronous>, transform_indices = @transform_5, window_bounds = array<i64: 32, 32>}, {pipeline_mode = #tpu.pipeline_mode<synchronous>, transform_indices = @transform_6, window_bounds = array<i64: 1, 32>}, {pipeline_mode = #tpu.pipeline_mode<synchronous>, transform_indices = @transform_7, window_bounds = array<i64: 1, 32>}, {pipeline_mode = #tpu.pipeline_mode<synchronous>, transform_indices = @transform_8, window_bounds = array<i64: 1, 32>}, {transform_indices = @transform_9, window_bounds = array<i64: 1, 8, 32>}]} {
    %c0 = arith.constant 0 : index
    %c0_0 = arith.constant 0 : index
    %c0_1 = arith.constant 0 : index
    %0 = vector.load %arg2[%c0, %c0_0, %c0_1] : memref<1x8x32xbf16, #tpu.memory_space<vmem>>, vector<1x8x32xbf16>
    %1 = vector.shape_cast %0 : vector<1x8x32xbf16> to vector<8x32xbf16>
    %c0_2 = arith.constant 0 : index
    %c0_3 = arith.constant 0 : index
    %2 = vector.load %arg5[%c0_2, %c0_3] : memref<32x96xbf16, #tpu.memory_space<vmem>>, vector<32x96xbf16>
    %c0_4 = arith.constant 0 : index
    %c0_5 = arith.constant 0 : index
    %3 = vector.load %arg6[%c0_4, %c0_5] : memref<1x96xf32, #tpu.memory_space<vmem>>, vector<1x96xf32>
    %c0_6 = arith.constant 0 : index
    %c0_7 = arith.constant 0 : index
    %c0_8 = arith.constant 0 : index
    %4 = vector.load %arg3[%c0_6, %c0_7, %c0_8] : memref<1x8x32xbf16, #tpu.memory_space<vmem>>, vector<1x8x32xbf16>
    %5 = vector.shape_cast %4 : vector<1x8x32xbf16> to vector<8x32xbf16>
    %6 = vector.extract_strided_slice %2 {offsets = [0, 0], sizes = [32, 32], strides = [1, 1]} : vector<32x96xbf16> to vector<32x32xbf16>
    %cst = arith.constant dense<0.000000e+00> : vector<8x32xf32>
    %7 = tpu.matmul %1, %6, %cst {dimension_numbers = #tpu.dot_dimension_numbers<[1], [0], [0], [1], [0, 0, 1, 1], [], []>} : vector<8x32xbf16>, vector<32x32xbf16>, vector<8x32xf32> -> vector<8x32xf32>
    %8 = vector.extract_strided_slice %3 {offsets = [0, 0], sizes = [1, 32], strides = [1, 1]} : vector<1x96xf32> to vector<1x32xf32>
    %9 = vector.broadcast %8 : vector<1x32xf32> to vector<8x32xf32>
    %10 = arith.addf %7, %9 : vector<8x32xf32>
    %11 = vector.extract_strided_slice %2 {offsets = [0, 32], sizes = [32, 64], strides = [1, 1]} : vector<32x96xbf16> to vector<32x64xbf16>
    %cst_9 = arith.constant dense<0.000000e+00> : vector<8x64xf32>
    %12 = tpu.matmul %5, %11, %cst_9 {dimension_numbers = #tpu.dot_dimension_numbers<[1], [0], [0], [1], [0, 0, 1, 1], [], []>} : vector<8x32xbf16>, vector<32x64xbf16>, vector<8x64xf32> -> vector<8x64xf32>
    %13 = vector.extract_strided_slice %3 {offsets = [0, 32], sizes = [1, 64], strides = [1, 1]} : vector<1x96xf32> to vector<1x64xf32>
    %14 = vector.broadcast %13 : vector<1x64xf32> to vector<8x64xf32>
    %15 = arith.addf %12, %14 : vector<8x64xf32>
    %16 = vector.extract_strided_slice %15 {offsets = [0, 0], sizes = [8, 32], strides = [1, 1]} : vector<8x64xf32> to vector<8x32xf32>
    %17 = vector.extract_strided_slice %15 {offsets = [0, 32], sizes = [8, 32], strides = [1, 1]} : vector<8x64xf32> to vector<8x32xf32>
    %c0_10 = arith.constant 0 : index
    %c0_11 = arith.constant 0 : index
    %c0_12 = arith.constant 0 : index
    %18 = vector.load %arg4[%c0_10, %c0_11, %c0_12] : memref<1x1x8xf32, #tpu.memory_space<vmem>>, vector<1x1x8xf32>
    %19 = vector.shape_cast %18 : vector<1x1x8xf32> to vector<1x8xf32>
    %cst_13 = arith.constant 0.353553385 : f32
    %20 = vector.broadcast %cst_13 : f32 to vector<8x32xf32>
    %21 = arith.mulf %10, %20 : vector<8x32xf32>
    %22 = arith.truncf %21 : vector<8x32xf32> to vector<8x32xbf16>
    %23 = arith.truncf %16 : vector<8x32xf32> to vector<8x32xbf16>
    %24 = arith.truncf %17 : vector<8x32xf32> to vector<8x32xbf16>
    %c0_14 = arith.constant 0 : index
    %c0_15 = arith.constant 0 : index
    %25 = vector.load %arg7[%c0_14, %c0_15] : memref<32x32xbf16, #tpu.memory_space<vmem>>, vector<32x32xbf16>
    %cst_16 = arith.constant 0.000000e+00 : f32
    %26 = vector.broadcast %cst_16 : f32 to vector<8x32xf32>
    %27 = vector.extract_strided_slice %22 {offsets = [0, 0], sizes = [8, 8], strides = [1, 1]} : vector<8x32xbf16> to vector<8x8xbf16>
    %28 = vector.extract_strided_slice %23 {offsets = [0, 0], sizes = [8, 8], strides = [1, 1]} : vector<8x32xbf16> to vector<8x8xbf16>
    %cst_17 = arith.constant dense<0.000000e+00> : vector<8x8xf32>
    %29 = tpu.matmul %27, %28, %cst_17 {dimension_numbers = #tpu.dot_dimension_numbers<[1], [1], [0], [0], [0, 0, 1, 0], [], []>} : vector<8x8xbf16>, vector<8x8xbf16>, vector<8x8xf32> -> vector<8x8xf32>
    %30 = vector.broadcast %19 : vector<1x8xf32> to vector<8x8xf32>
    %31 = arith.addf %29, %30 : vector<8x8xf32>
    %cst_18 = arith.constant dense<0xFF800000> : vector<8xf32>
    %32 = vector.multi_reduction <maximumf>, %31, %cst_18 [1] : vector<8x8xf32> to vector<8xf32>
    %33 = vector.shape_cast %32 : vector<8xf32> to vector<8x1xf32>
    %34 = vector.broadcast %33 : vector<8x1xf32> to vector<8x8xf32>
    %35 = arith.subf %31, %34 : vector<8x8xf32>
    %36 = math.exp %35 : vector<8x8xf32>
    %cst_19 = arith.constant dense<0.000000e+00> : vector<8xf32>
    %37 = vector.multi_reduction <add>, %36, %cst_19 [1] : vector<8x8xf32> to vector<8xf32>
    %38 = vector.shape_cast %37 : vector<8xf32> to vector<8x1xf32>
    %39 = tpu.reciprocal %38 {approx = true} : vector<8x1xf32> -> vector<8x1xf32>
    %40 = vector.broadcast %39 : vector<8x1xf32> to vector<8x8xf32>
    %41 = arith.mulf %36, %40 : vector<8x8xf32>
    %42 = arith.truncf %41 : vector<8x8xf32> to vector<8x8xbf16>
    %43 = vector.extract_strided_slice %24 {offsets = [0, 0], sizes = [8, 8], strides = [1, 1]} : vector<8x32xbf16> to vector<8x8xbf16>
    %cst_20 = arith.constant dense<0.000000e+00> : vector<8x8xf32>
    %44 = tpu.matmul %42, %43, %cst_20 {dimension_numbers = #tpu.dot_dimension_numbers<[1], [0], [0], [1], [0, 0, 1, 1], [], []>} : vector<8x8xbf16>, vector<8x8xbf16>, vector<8x8xf32> -> vector<8x8xf32>
    %45 = arith.truncf %44 : vector<8x8xf32> to vector<8x8xbf16>
    %46 = vector.extract_strided_slice %25 {offsets = [0, 0], sizes = [8, 32], strides = [1, 1]} : vector<32x32xbf16> to vector<8x32xbf16>
    %cst_21 = arith.constant dense<0.000000e+00> : vector<8x32xf32>
    %47 = tpu.matmul %45, %46, %cst_21 {dimension_numbers = #tpu.dot_dimension_numbers<[1], [0], [0], [1], [0, 0, 1, 1], [], []>} : vector<8x8xbf16>, vector<8x32xbf16>, vector<8x32xf32> -> vector<8x32xf32>
    %48 = arith.addf %26, %47 : vector<8x32xf32>
    %49 = vector.extract_strided_slice %22 {offsets = [0, 8], sizes = [8, 8], strides = [1, 1]} : vector<8x32xbf16> to vector<8x8xbf16>
    %50 = vector.extract_strided_slice %23 {offsets = [0, 8], sizes = [8, 8], strides = [1, 1]} : vector<8x32xbf16> to vector<8x8xbf16>
    %cst_22 = arith.constant dense<0.000000e+00> : vector<8x8xf32>
    %51 = tpu.matmul %49, %50, %cst_22 {dimension_numbers = #tpu.dot_dimension_numbers<[1], [1], [0], [0], [0, 0, 1, 0], [], []>} : vector<8x8xbf16>, vector<8x8xbf16>, vector<8x8xf32> -> vector<8x8xf32>
    %52 = vector.broadcast %19 : vector<1x8xf32> to vector<8x8xf32>
    %53 = arith.addf %51, %52 : vector<8x8xf32>
    %cst_23 = arith.constant dense<0xFF800000> : vector<8xf32>
    %54 = vector.multi_reduction <maximumf>, %53, %cst_23 [1] : vector<8x8xf32> to vector<8xf32>
    %55 = vector.shape_cast %54 : vector<8xf32> to vector<8x1xf32>
    %56 = vector.broadcast %55 : vector<8x1xf32> to vector<8x8xf32>
    %57 = arith.subf %53, %56 : vector<8x8xf32>
    %58 = math.exp %57 : vector<8x8xf32>
    %cst_24 = arith.constant dense<0.000000e+00> : vector<8xf32>
    %59 = vector.multi_reduction <add>, %58, %cst_24 [1] : vector<8x8xf32> to vector<8xf32>
    %60 = vector.shape_cast %59 : vector<8xf32> to vector<8x1xf32>
    %61 = tpu.reciprocal %60 {approx = true} : vector<8x1xf32> -> vector<8x1xf32>
    %62 = vector.broadcast %61 : vector<8x1xf32> to vector<8x8xf32>
    %63 = arith.mulf %58, %62 : vector<8x8xf32>
    %64 = arith.truncf %63 : vector<8x8xf32> to vector<8x8xbf16>
    %65 = vector.extract_strided_slice %24 {offsets = [0, 8], sizes = [8, 8], strides = [1, 1]} : vector<8x32xbf16> to vector<8x8xbf16>
    %cst_25 = arith.constant dense<0.000000e+00> : vector<8x8xf32>
    %66 = tpu.matmul %64, %65, %cst_25 {dimension_numbers = #tpu.dot_dimension_numbers<[1], [0], [0], [1], [0, 0, 1, 1], [], []>} : vector<8x8xbf16>, vector<8x8xbf16>, vector<8x8xf32> -> vector<8x8xf32>
    %67 = arith.truncf %66 : vector<8x8xf32> to vector<8x8xbf16>
    %68 = vector.extract_strided_slice %25 {offsets = [8, 0], sizes = [8, 32], strides = [1, 1]} : vector<32x32xbf16> to vector<8x32xbf16>
    %cst_26 = arith.constant dense<0.000000e+00> : vector<8x32xf32>
    %69 = tpu.matmul %67, %68, %cst_26 {dimension_numbers = #tpu.dot_dimension_numbers<[1], [0], [0], [1], [0, 0, 1, 1], [], []>} : vector<8x8xbf16>, vector<8x32xbf16>, vector<8x32xf32> -> vector<8x32xf32>
    %70 = arith.addf %48, %69 : vector<8x32xf32>
    %71 = vector.extract_strided_slice %22 {offsets = [0, 16], sizes = [8, 8], strides = [1, 1]} : vector<8x32xbf16> to vector<8x8xbf16>
    %72 = vector.extract_strided_slice %23 {offsets = [0, 16], sizes = [8, 8], strides = [1, 1]} : vector<8x32xbf16> to vector<8x8xbf16>
    %cst_27 = arith.constant dense<0.000000e+00> : vector<8x8xf32>
    %73 = tpu.matmul %71, %72, %cst_27 {dimension_numbers = #tpu.dot_dimension_numbers<[1], [1], [0], [0], [0, 0, 1, 0], [], []>} : vector<8x8xbf16>, vector<8x8xbf16>, vector<8x8xf32> -> vector<8x8xf32>
    %74 = vector.broadcast %19 : vector<1x8xf32> to vector<8x8xf32>
    %75 = arith.addf %73, %74 : vector<8x8xf32>
    %cst_28 = arith.constant dense<0xFF800000> : vector<8xf32>
    %76 = vector.multi_reduction <maximumf>, %75, %cst_28 [1] : vector<8x8xf32> to vector<8xf32>
    %77 = vector.shape_cast %76 : vector<8xf32> to vector<8x1xf32>
    %78 = vector.broadcast %77 : vector<8x1xf32> to vector<8x8xf32>
    %79 = arith.subf %75, %78 : vector<8x8xf32>
    %80 = math.exp %79 : vector<8x8xf32>
    %cst_29 = arith.constant dense<0.000000e+00> : vector<8xf32>
    %81 = vector.multi_reduction <add>, %80, %cst_29 [1] : vector<8x8xf32> to vector<8xf32>
    %82 = vector.shape_cast %81 : vector<8xf32> to vector<8x1xf32>
    %83 = tpu.reciprocal %82 {approx = true} : vector<8x1xf32> -> vector<8x1xf32>
    %84 = vector.broadcast %83 : vector<8x1xf32> to vector<8x8xf32>
    %85 = arith.mulf %80, %84 : vector<8x8xf32>
    %86 = arith.truncf %85 : vector<8x8xf32> to vector<8x8xbf16>
    %87 = vector.extract_strided_slice %24 {offsets = [0, 16], sizes = [8, 8], strides = [1, 1]} : vector<8x32xbf16> to vector<8x8xbf16>
    %cst_30 = arith.constant dense<0.000000e+00> : vector<8x8xf32>
    %88 = tpu.matmul %86, %87, %cst_30 {dimension_numbers = #tpu.dot_dimension_numbers<[1], [0], [0], [1], [0, 0, 1, 1], [], []>} : vector<8x8xbf16>, vector<8x8xbf16>, vector<8x8xf32> -> vector<8x8xf32>
    %89 = arith.truncf %88 : vector<8x8xf32> to vector<8x8xbf16>
    %90 = vector.extract_strided_slice %25 {offsets = [16, 0], sizes = [8, 32], strides = [1, 1]} : vector<32x32xbf16> to vector<8x32xbf16>
    %cst_31 = arith.constant dense<0.000000e+00> : vector<8x32xf32>
    %91 = tpu.matmul %89, %90, %cst_31 {dimension_numbers = #tpu.dot_dimension_numbers<[1], [0], [0], [1], [0, 0, 1, 1], [], []>} : vector<8x8xbf16>, vector<8x32xbf16>, vector<8x32xf32> -> vector<8x32xf32>
    %92 = arith.addf %70, %91 : vector<8x32xf32>
    %93 = vector.extract_strided_slice %22 {offsets = [0, 24], sizes = [8, 8], strides = [1, 1]} : vector<8x32xbf16> to vector<8x8xbf16>
    %94 = vector.extract_strided_slice %23 {offsets = [0, 24], sizes = [8, 8], strides = [1, 1]} : vector<8x32xbf16> to vector<8x8xbf16>
    %cst_32 = arith.constant dense<0.000000e+00> : vector<8x8xf32>
    %95 = tpu.matmul %93, %94, %cst_32 {dimension_numbers = #tpu.dot_dimension_numbers<[1], [1], [0], [0], [0, 0, 1, 0], [], []>} : vector<8x8xbf16>, vector<8x8xbf16>, vector<8x8xf32> -> vector<8x8xf32>
    %96 = vector.broadcast %19 : vector<1x8xf32> to vector<8x8xf32>
    %97 = arith.addf %95, %96 : vector<8x8xf32>
    %cst_33 = arith.constant dense<0xFF800000> : vector<8xf32>
    %98 = vector.multi_reduction <maximumf>, %97, %cst_33 [1] : vector<8x8xf32> to vector<8xf32>
    %99 = vector.shape_cast %98 : vector<8xf32> to vector<8x1xf32>
    %100 = vector.broadcast %99 : vector<8x1xf32> to vector<8x8xf32>
    %101 = arith.subf %97, %100 : vector<8x8xf32>
    %102 = math.exp %101 : vector<8x8xf32>
    %cst_34 = arith.constant dense<0.000000e+00> : vector<8xf32>
    %103 = vector.multi_reduction <add>, %102, %cst_34 [1] : vector<8x8xf32> to vector<8xf32>
    %104 = vector.shape_cast %103 : vector<8xf32> to vector<8x1xf32>
    %105 = tpu.reciprocal %104 {approx = true} : vector<8x1xf32> -> vector<8x1xf32>
    %106 = vector.broadcast %105 : vector<8x1xf32> to vector<8x8xf32>
    %107 = arith.mulf %102, %106 : vector<8x8xf32>
    %108 = arith.truncf %107 : vector<8x8xf32> to vector<8x8xbf16>
    %109 = vector.extract_strided_slice %24 {offsets = [0, 24], sizes = [8, 8], strides = [1, 1]} : vector<8x32xbf16> to vector<8x8xbf16>
    %cst_35 = arith.constant dense<0.000000e+00> : vector<8x8xf32>
    %110 = tpu.matmul %108, %109, %cst_35 {dimension_numbers = #tpu.dot_dimension_numbers<[1], [0], [0], [1], [0, 0, 1, 1], [], []>} : vector<8x8xbf16>, vector<8x8xbf16>, vector<8x8xf32> -> vector<8x8xf32>
    %111 = arith.truncf %110 : vector<8x8xf32> to vector<8x8xbf16>
    %112 = vector.extract_strided_slice %25 {offsets = [24, 0], sizes = [8, 32], strides = [1, 1]} : vector<32x32xbf16> to vector<8x32xbf16>
    %cst_36 = arith.constant dense<0.000000e+00> : vector<8x32xf32>
    %113 = tpu.matmul %111, %112, %cst_36 {dimension_numbers = #tpu.dot_dimension_numbers<[1], [0], [0], [1], [0, 0, 1, 1], [], []>} : vector<8x8xbf16>, vector<8x32xbf16>, vector<8x32xf32> -> vector<8x32xf32>
    %114 = arith.addf %92, %113 : vector<8x32xf32>
    %c0_37 = arith.constant 0 : index
    %c0_38 = arith.constant 0 : index
    %115 = vector.load %arg8[%c0_37, %c0_38] : memref<1x32xf32, #tpu.memory_space<vmem>>, vector<1x32xf32>
    %116 = vector.broadcast %115 : vector<1x32xf32> to vector<8x32xf32>
    %117 = arith.addf %114, %116 : vector<8x32xf32>
    %118 = arith.extf %1 : vector<8x32xbf16> to vector<8x32xf32>
    %119 = arith.addf %118, %117 : vector<8x32xf32>
    %cst_39 = arith.constant dense<0.000000e+00> : vector<8xf32>
    %120 = vector.multi_reduction <add>, %119, %cst_39 [1] : vector<8x32xf32> to vector<8xf32>
    %121 = vector.shape_cast %120 : vector<8xf32> to vector<8x1xf32>
    %cst_40 = arith.constant 3.200000e+01 : f32
    %122 = vector.broadcast %cst_40 : f32 to vector<8x1xf32>
    %123 = arith.divf %121, %122 : vector<8x1xf32>
    %124 = vector.broadcast %123 : vector<8x1xf32> to vector<8x32xf32>
    %125 = arith.subf %119, %124 : vector<8x32xf32>
    %126 = arith.mulf %125, %125 : vector<8x32xf32>
    %cst_41 = arith.constant dense<0.000000e+00> : vector<8xf32>
    %127 = vector.multi_reduction <add>, %126, %cst_41 [1] : vector<8x32xf32> to vector<8xf32>
    %128 = vector.shape_cast %127 : vector<8xf32> to vector<8x1xf32>
    %cst_42 = arith.constant 3.200000e+01 : f32
    %129 = vector.broadcast %cst_42 : f32 to vector<8x1xf32>
    %130 = arith.divf %128, %129 : vector<8x1xf32>
    %131 = vector.broadcast %123 : vector<8x1xf32> to vector<8x32xf32>
    %132 = arith.subf %119, %131 : vector<8x32xf32>
    %cst_43 = arith.constant 9.99999974E-6 : f32
    %133 = vector.broadcast %cst_43 : f32 to vector<8x1xf32>
    %134 = arith.addf %130, %133 : vector<8x1xf32>
    %135 = math.rsqrt %134 : vector<8x1xf32>
    %136 = vector.broadcast %135 : vector<8x1xf32> to vector<8x32xf32>
    %137 = arith.mulf %132, %136 : vector<8x32xf32>
    %c0_44 = arith.constant 0 : index
    %c0_45 = arith.constant 0 : index
    %138 = vector.load %arg9[%c0_44, %c0_45] : memref<1x32xf32, #tpu.memory_space<vmem>>, vector<1x32xf32>
    %139 = vector.broadcast %138 : vector<1x32xf32> to vector<8x32xf32>
    %140 = arith.mulf %137, %139 : vector<8x32xf32>
    %c0_46 = arith.constant 0 : index
    %c0_47 = arith.constant 0 : index
    %141 = vector.load %arg10[%c0_46, %c0_47] : memref<1x32xf32, #tpu.memory_space<vmem>>, vector<1x32xf32>
    %142 = vector.broadcast %141 : vector<1x32xf32> to vector<8x32xf32>
    %143 = arith.addf %140, %142 : vector<8x32xf32>
    %144 = arith.truncf %143 : vector<8x32xf32> to vector<8x32xbf16>
    %c0_48 = arith.constant 0 : index
    %c0_49 = arith.constant 0 : index
    %c0_50 = arith.constant 0 : index
    %145 = vector.load %arg11[%c0_48, %c0_49, %c0_50] : memref<1x8x32xbf16, #tpu.memory_space<vmem>>, vector<1x8x32xbf16>
    %146 = vector.shape_cast %145 : vector<1x8x32xbf16> to vector<8x32xbf16>
    %147 = vector.shape_cast %144 : vector<8x32xbf16> to vector<1x8x32xbf16>
    tpu.vector_store %arg11[%c0_48, %c0_49, %c0_50], %147 {strides = array<i32>} : memref<1x8x32xbf16, #tpu.memory_space<vmem>>, vector<1x8x32xbf16>,
    return
  }
  func.func @transform_0(%arg0: i32, %arg1: i32) -> (i32, i32, i32) {
    %c0_i32 = arith.constant 0 : i32
    %c0_i32_0 = arith.constant 0 : i32
    return %arg0, %arg1, %c0_i32 : i32, i32, i32
  }
  func.func @transform_1(%arg0: i32, %arg1: i32) -> (i32, i32, i32) {
    %c0_i32 = arith.constant 0 : i32
    %c0_i32_0 = arith.constant 0 : i32
    %c0_i32_1 = arith.constant 0 : i32
    return %arg0, %c0_i32, %c0_i32_0 : i32, i32, i32
  }
  func.func @transform_2(%arg0: i32, %arg1: i32) -> (i32, i32, i32) {
    %c0_i32 = arith.constant 0 : i32
    %c0_i32_0 = arith.constant 0 : i32
    %c0_i32_1 = arith.constant 0 : i32
    return %arg0, %c0_i32, %c0_i32_0 : i32, i32, i32
  }
  func.func @transform_3(%arg0: i32, %arg1: i32) -> (i32, i32) {
    %c0_i32 = arith.constant 0 : i32
    %c0_i32_0 = arith.constant 0 : i32
    %c0_i32_1 = arith.constant 0 : i32
    return %c0_i32, %c0_i32_0 : i32, i32
  }
  func.func @transform_4(%arg0: i32, %arg1: i32) -> (i32, i32) {
    %c0_i32 = arith.constant 0 : i32
    %c0_i32_0 = arith.constant 0 : i32
    %c0_i32_1 = arith.constant 0 : i32
    return %c0_i32, %c0_i32_0 : i32, i32
  }
  func.func @transform_5(%arg0: i32, %arg1: i32) -> (i32, i32) {
    %c0_i32 = arith.constant 0 : i32
    %c0_i32_0 = arith.constant 0 : i32
    %c0_i32_1 = arith.constant 0 : i32
    return %c0_i32, %c0_i32_0 : i32, i32
  }
  func.func @transform_6(%arg0: i32, %arg1: i32) -> (i32, i32) {
    %c0_i32 = arith.constant 0 : i32
    %c0_i32_0 = arith.constant 0 : i32
    %c0_i32_1 = arith.constant 0 : i32
    return %c0_i32, %c0_i32_0 : i32, i32
  }
  func.func @transform_7(%arg0: i32, %arg1: i32) -> (i32, i32) {
    %c0_i32 = arith.constant 0 : i32
    %c0_i32_0 = arith.constant 0 : i32
    %c0_i32_1 = arith.constant 0 : i32
    return %c0_i32, %c0_i32_0 : i32, i32
  }
  func.func @transform_8(%arg0: i32, %arg1: i32) -> (i32, i32) {
    %c0_i32 = arith.constant 0 : i32
    %c0_i32_0 = arith.constant 0 : i32
    %c0_i32_1 = arith.constant 0 : i32
    return %c0_i32, %c0_i32_0 : i32, i32
  }
  func.func @transform_9(%arg0: i32, %arg1: i32) -> (i32, i32, i32) {
    %c0_i32 = arith.constant 0 : i32
    %c0_i32_0 = arith.constant 0 : i32
    return %arg0, %arg1, %c0_i32 : i32, i32, i32
  }
}

module attributes {stable_mosaic.version = 11 : i64} {
  func.func @_attn_block_kernel(%arg0: i32, %arg1: i32, %arg2: memref<1x8x32xbf16, #tpu.memory_space<vmem>>, %arg3: memref<1x8x32xbf16, #tpu.memory_space<vmem>>, %arg4: memref<1x1x8xf32, #tpu.memory_space<vmem>>, %arg5: memref<32x96xbf16, #tpu.memory_space<vmem>>, %arg6: memref<1x96xf32, #tpu.memory_space<vmem>>, %arg7: memref<32x32xbf16, #tpu.memory_space<vmem>>, %arg8: memref<1x32xf32, #tpu.memory_space<vmem>>, %arg9: memref<1x32xf32, #tpu.memory_space<vmem>>, %arg10: memref<1x32xf32, #tpu.memory_space<vmem>>, %arg11: memref<1x8x32xbf16, #tpu.memory_space<vmem>>) attributes {dimension_semantics = [#tpu.dimension_semantics<parallel>, #tpu.dimension_semantics<parallel>], iteration_bounds = array<i64: 2, 1>, scalar_prefetch = 0 : i64, scratch_operands = 0 : i64, tpu.core_type = #tpu.core_type<tc>, window_params = [{transform_indices = @transform_0, window_bounds = array<i64: 1, 8, 32>}, {transform_indices = @transform_1, window_bounds = array<i64: 1, 8, 32>}, {transform_indices = @transform_2, window_bounds = array<i64: 1, 1, 8>}, {pipeline_mode = #tpu.pipeline_mode<synchronous>, transform_indices = @transform_3, window_bounds = array<i64: 32, 96>}, {pipeline_mode = #tpu.pipeline_mode<synchronous>, transform_indices = @transform_4, window_bounds = array<i64: 1, 96>}, {pipeline_mode = #tpu.pipeline_mode<synchronous>, transform_indices = @transform_5, window_bounds = array<i64: 32, 32>}, {pipeline_mode = #tpu.pipeline_mode<synchronous>, transform_indices = @transform_6, window_bounds = array<i64: 1, 32>}, {pipeline_mode = #tpu.pipeline_mode<synchronous>, transform_indices = @transform_7, window_bounds = array<i64: 1, 32>}, {pipeline_mode = #tpu.pipeline_mode<synchronous>, transform_indices = @transform_8, window_bounds = array<i64: 1, 32>}, {transform_indices = @transform_9, window_bounds = array<i64: 1, 8, 32>}]} {
    %c0 = arith.constant 0 : index
    %c0_0 = arith.constant 0 : index
    %c0_1 = arith.constant 0 : index
    %0 = vector.load %arg2[%c0, %c0_0, %c0_1] : memref<1x8x32xbf16, #tpu.memory_space<vmem>>, vector<1x8x32xbf16>
    %1 = vector.shape_cast %0 : vector<1x8x32xbf16> to vector<8x32xbf16>
    %c0_2 = arith.constant 0 : index
    %c0_3 = arith.constant 0 : index
    %2 = vector.load %arg5[%c0_2, %c0_3] : memref<32x96xbf16, #tpu.memory_space<vmem>>, vector<32x96xbf16>
    %c0_4 = arith.constant 0 : index
    %c0_5 = arith.constant 0 : index
    %3 = vector.load %arg6[%c0_4, %c0_5] : memref<1x96xf32, #tpu.memory_space<vmem>>, vector<1x96xf32>
    %cst = arith.constant dense<0.000000e+00> : vector<8x96xf32>
    %4 = tpu.matmul %1, %2, %cst {dimension_numbers = #tpu.dot_dimension_numbers<[1], [0], [0], [1], [0, 0, 1, 1], [], []>} : vector<8x32xbf16>, vector<32x96xbf16>, vector<8x96xf32> -> vector<8x96xf32>
    %5 = vector.broadcast %3 : vector<1x96xf32> to vector<8x96xf32>
    %6 = arith.addf %4, %5 : vector<8x96xf32>
    %7 = vector.extract_strided_slice %6 {offsets = [0, 0], sizes = [8, 32], strides = [1, 1]} : vector<8x96xf32> to vector<8x32xf32>
    %8 = vector.extract_strided_slice %6 {offsets = [0, 32], sizes = [8, 32], strides = [1, 1]} : vector<8x96xf32> to vector<8x32xf32>
    %9 = vector.extract_strided_slice %6 {offsets = [0, 64], sizes = [8, 32], strides = [1, 1]} : vector<8x96xf32> to vector<8x32xf32>
    %c0_6 = arith.constant 0 : index
    %c0_7 = arith.constant 0 : index
    %c0_8 = arith.constant 0 : index
    %10 = vector.load %arg4[%c0_6, %c0_7, %c0_8] : memref<1x1x8xf32, #tpu.memory_space<vmem>>, vector<1x1x8xf32>
    %11 = vector.shape_cast %10 : vector<1x1x8xf32> to vector<1x8xf32>
    %c8_i32 = arith.constant 8 : i32
    %12 = arith.muli %arg1, %c8_i32 : i32
    %13 = tpu.iota {dimensions = array<i32: 0>} : vector<8x8xi32>
    %14 = vector.broadcast %12 : i32 to vector<8x8xi32>
    %15 = arith.addi %14, %13 : vector<8x8xi32>
    %16 = tpu.iota {dimensions = array<i32: 1>} : vector<8x8xi32>
    %17 = arith.cmpi sgt, %16, %15 : vector<8x8xi32>
    %cst_9 = arith.constant -1.000000e+09 : f32
    %cst_10 = arith.constant 0.000000e+00 : f32
    %18 = vector.broadcast %cst_9 : f32 to vector<8x8xf32>
    %19 = vector.broadcast %cst_10 : f32 to vector<8x8xf32>
    %20 = arith.select %17, %18, %19 : vector<8x8xi1>, vector<8x8xf32>
    %21 = vector.broadcast %11 : vector<1x8xf32> to vector<8x8xf32>
    %22 = arith.addf %21, %20 : vector<8x8xf32>
    %cst_11 = arith.constant 0.353553385 : f32
    %23 = vector.broadcast %cst_11 : f32 to vector<8x32xf32>
    %24 = arith.mulf %7, %23 : vector<8x32xf32>
    %25 = arith.truncf %24 : vector<8x32xf32> to vector<8x32xbf16>
    %26 = arith.truncf %8 : vector<8x32xf32> to vector<8x32xbf16>
    %27 = arith.truncf %9 : vector<8x32xf32> to vector<8x32xbf16>
    %c0_12 = arith.constant 0 : index
    %c0_13 = arith.constant 0 : index
    %28 = vector.load %arg7[%c0_12, %c0_13] : memref<32x32xbf16, #tpu.memory_space<vmem>>, vector<32x32xbf16>
    %cst_14 = arith.constant 0.000000e+00 : f32
    %29 = vector.broadcast %cst_14 : f32 to vector<8x32xf32>
    %30 = vector.extract_strided_slice %25 {offsets = [0, 0], sizes = [8, 8], strides = [1, 1]} : vector<8x32xbf16> to vector<8x8xbf16>
    %31 = vector.extract_strided_slice %26 {offsets = [0, 0], sizes = [8, 8], strides = [1, 1]} : vector<8x32xbf16> to vector<8x8xbf16>
    %cst_15 = arith.constant dense<0.000000e+00> : vector<8x8xf32>
    %32 = tpu.matmul %30, %31, %cst_15 {dimension_numbers = #tpu.dot_dimension_numbers<[1], [1], [0], [0], [0, 0, 1, 0], [], []>} : vector<8x8xbf16>, vector<8x8xbf16>, vector<8x8xf32> -> vector<8x8xf32>
    %33 = arith.addf %32, %22 : vector<8x8xf32>
    %cst_16 = arith.constant dense<0xFF800000> : vector<8xf32>
    %34 = vector.multi_reduction <maximumf>, %33, %cst_16 [1] : vector<8x8xf32> to vector<8xf32>
    %35 = vector.shape_cast %34 : vector<8xf32> to vector<8x1xf32>
    %36 = vector.broadcast %35 : vector<8x1xf32> to vector<8x8xf32>
    %37 = arith.subf %33, %36 : vector<8x8xf32>
    %38 = math.exp %37 : vector<8x8xf32>
    %cst_17 = arith.constant dense<0.000000e+00> : vector<8xf32>
    %39 = vector.multi_reduction <add>, %38, %cst_17 [1] : vector<8x8xf32> to vector<8xf32>
    %40 = vector.shape_cast %39 : vector<8xf32> to vector<8x1xf32>
    %41 = tpu.reciprocal %40 {approx = true} : vector<8x1xf32> -> vector<8x1xf32>
    %42 = vector.broadcast %41 : vector<8x1xf32> to vector<8x8xf32>
    %43 = arith.mulf %38, %42 : vector<8x8xf32>
    %44 = arith.truncf %43 : vector<8x8xf32> to vector<8x8xbf16>
    %45 = vector.extract_strided_slice %27 {offsets = [0, 0], sizes = [8, 8], strides = [1, 1]} : vector<8x32xbf16> to vector<8x8xbf16>
    %cst_18 = arith.constant dense<0.000000e+00> : vector<8x8xf32>
    %46 = tpu.matmul %44, %45, %cst_18 {dimension_numbers = #tpu.dot_dimension_numbers<[1], [0], [0], [1], [0, 0, 1, 1], [], []>} : vector<8x8xbf16>, vector<8x8xbf16>, vector<8x8xf32> -> vector<8x8xf32>
    %47 = arith.truncf %46 : vector<8x8xf32> to vector<8x8xbf16>
    %48 = vector.extract_strided_slice %28 {offsets = [0, 0], sizes = [8, 32], strides = [1, 1]} : vector<32x32xbf16> to vector<8x32xbf16>
    %cst_19 = arith.constant dense<0.000000e+00> : vector<8x32xf32>
    %49 = tpu.matmul %47, %48, %cst_19 {dimension_numbers = #tpu.dot_dimension_numbers<[1], [0], [0], [1], [0, 0, 1, 1], [], []>} : vector<8x8xbf16>, vector<8x32xbf16>, vector<8x32xf32> -> vector<8x32xf32>
    %50 = arith.addf %29, %49 : vector<8x32xf32>
    %51 = vector.extract_strided_slice %25 {offsets = [0, 8], sizes = [8, 8], strides = [1, 1]} : vector<8x32xbf16> to vector<8x8xbf16>
    %52 = vector.extract_strided_slice %26 {offsets = [0, 8], sizes = [8, 8], strides = [1, 1]} : vector<8x32xbf16> to vector<8x8xbf16>
    %cst_20 = arith.constant dense<0.000000e+00> : vector<8x8xf32>
    %53 = tpu.matmul %51, %52, %cst_20 {dimension_numbers = #tpu.dot_dimension_numbers<[1], [1], [0], [0], [0, 0, 1, 0], [], []>} : vector<8x8xbf16>, vector<8x8xbf16>, vector<8x8xf32> -> vector<8x8xf32>
    %54 = arith.addf %53, %22 : vector<8x8xf32>
    %cst_21 = arith.constant dense<0xFF800000> : vector<8xf32>
    %55 = vector.multi_reduction <maximumf>, %54, %cst_21 [1] : vector<8x8xf32> to vector<8xf32>
    %56 = vector.shape_cast %55 : vector<8xf32> to vector<8x1xf32>
    %57 = vector.broadcast %56 : vector<8x1xf32> to vector<8x8xf32>
    %58 = arith.subf %54, %57 : vector<8x8xf32>
    %59 = math.exp %58 : vector<8x8xf32>
    %cst_22 = arith.constant dense<0.000000e+00> : vector<8xf32>
    %60 = vector.multi_reduction <add>, %59, %cst_22 [1] : vector<8x8xf32> to vector<8xf32>
    %61 = vector.shape_cast %60 : vector<8xf32> to vector<8x1xf32>
    %62 = tpu.reciprocal %61 {approx = true} : vector<8x1xf32> -> vector<8x1xf32>
    %63 = vector.broadcast %62 : vector<8x1xf32> to vector<8x8xf32>
    %64 = arith.mulf %59, %63 : vector<8x8xf32>
    %65 = arith.truncf %64 : vector<8x8xf32> to vector<8x8xbf16>
    %66 = vector.extract_strided_slice %27 {offsets = [0, 8], sizes = [8, 8], strides = [1, 1]} : vector<8x32xbf16> to vector<8x8xbf16>
    %cst_23 = arith.constant dense<0.000000e+00> : vector<8x8xf32>
    %67 = tpu.matmul %65, %66, %cst_23 {dimension_numbers = #tpu.dot_dimension_numbers<[1], [0], [0], [1], [0, 0, 1, 1], [], []>} : vector<8x8xbf16>, vector<8x8xbf16>, vector<8x8xf32> -> vector<8x8xf32>
    %68 = arith.truncf %67 : vector<8x8xf32> to vector<8x8xbf16>
    %69 = vector.extract_strided_slice %28 {offsets = [8, 0], sizes = [8, 32], strides = [1, 1]} : vector<32x32xbf16> to vector<8x32xbf16>
    %cst_24 = arith.constant dense<0.000000e+00> : vector<8x32xf32>
    %70 = tpu.matmul %68, %69, %cst_24 {dimension_numbers = #tpu.dot_dimension_numbers<[1], [0], [0], [1], [0, 0, 1, 1], [], []>} : vector<8x8xbf16>, vector<8x32xbf16>, vector<8x32xf32> -> vector<8x32xf32>
    %71 = arith.addf %50, %70 : vector<8x32xf32>
    %72 = vector.extract_strided_slice %25 {offsets = [0, 16], sizes = [8, 8], strides = [1, 1]} : vector<8x32xbf16> to vector<8x8xbf16>
    %73 = vector.extract_strided_slice %26 {offsets = [0, 16], sizes = [8, 8], strides = [1, 1]} : vector<8x32xbf16> to vector<8x8xbf16>
    %cst_25 = arith.constant dense<0.000000e+00> : vector<8x8xf32>
    %74 = tpu.matmul %72, %73, %cst_25 {dimension_numbers = #tpu.dot_dimension_numbers<[1], [1], [0], [0], [0, 0, 1, 0], [], []>} : vector<8x8xbf16>, vector<8x8xbf16>, vector<8x8xf32> -> vector<8x8xf32>
    %75 = arith.addf %74, %22 : vector<8x8xf32>
    %cst_26 = arith.constant dense<0xFF800000> : vector<8xf32>
    %76 = vector.multi_reduction <maximumf>, %75, %cst_26 [1] : vector<8x8xf32> to vector<8xf32>
    %77 = vector.shape_cast %76 : vector<8xf32> to vector<8x1xf32>
    %78 = vector.broadcast %77 : vector<8x1xf32> to vector<8x8xf32>
    %79 = arith.subf %75, %78 : vector<8x8xf32>
    %80 = math.exp %79 : vector<8x8xf32>
    %cst_27 = arith.constant dense<0.000000e+00> : vector<8xf32>
    %81 = vector.multi_reduction <add>, %80, %cst_27 [1] : vector<8x8xf32> to vector<8xf32>
    %82 = vector.shape_cast %81 : vector<8xf32> to vector<8x1xf32>
    %83 = tpu.reciprocal %82 {approx = true} : vector<8x1xf32> -> vector<8x1xf32>
    %84 = vector.broadcast %83 : vector<8x1xf32> to vector<8x8xf32>
    %85 = arith.mulf %80, %84 : vector<8x8xf32>
    %86 = arith.truncf %85 : vector<8x8xf32> to vector<8x8xbf16>
    %87 = vector.extract_strided_slice %27 {offsets = [0, 16], sizes = [8, 8], strides = [1, 1]} : vector<8x32xbf16> to vector<8x8xbf16>
    %cst_28 = arith.constant dense<0.000000e+00> : vector<8x8xf32>
    %88 = tpu.matmul %86, %87, %cst_28 {dimension_numbers = #tpu.dot_dimension_numbers<[1], [0], [0], [1], [0, 0, 1, 1], [], []>} : vector<8x8xbf16>, vector<8x8xbf16>, vector<8x8xf32> -> vector<8x8xf32>
    %89 = arith.truncf %88 : vector<8x8xf32> to vector<8x8xbf16>
    %90 = vector.extract_strided_slice %28 {offsets = [16, 0], sizes = [8, 32], strides = [1, 1]} : vector<32x32xbf16> to vector<8x32xbf16>
    %cst_29 = arith.constant dense<0.000000e+00> : vector<8x32xf32>
    %91 = tpu.matmul %89, %90, %cst_29 {dimension_numbers = #tpu.dot_dimension_numbers<[1], [0], [0], [1], [0, 0, 1, 1], [], []>} : vector<8x8xbf16>, vector<8x32xbf16>, vector<8x32xf32> -> vector<8x32xf32>
    %92 = arith.addf %71, %91 : vector<8x32xf32>
    %93 = vector.extract_strided_slice %25 {offsets = [0, 24], sizes = [8, 8], strides = [1, 1]} : vector<8x32xbf16> to vector<8x8xbf16>
    %94 = vector.extract_strided_slice %26 {offsets = [0, 24], sizes = [8, 8], strides = [1, 1]} : vector<8x32xbf16> to vector<8x8xbf16>
    %cst_30 = arith.constant dense<0.000000e+00> : vector<8x8xf32>
    %95 = tpu.matmul %93, %94, %cst_30 {dimension_numbers = #tpu.dot_dimension_numbers<[1], [1], [0], [0], [0, 0, 1, 0], [], []>} : vector<8x8xbf16>, vector<8x8xbf16>, vector<8x8xf32> -> vector<8x8xf32>
    %96 = arith.addf %95, %22 : vector<8x8xf32>
    %cst_31 = arith.constant dense<0xFF800000> : vector<8xf32>
    %97 = vector.multi_reduction <maximumf>, %96, %cst_31 [1] : vector<8x8xf32> to vector<8xf32>
    %98 = vector.shape_cast %97 : vector<8xf32> to vector<8x1xf32>
    %99 = vector.broadcast %98 : vector<8x1xf32> to vector<8x8xf32>
    %100 = arith.subf %96, %99 : vector<8x8xf32>
    %101 = math.exp %100 : vector<8x8xf32>
    %cst_32 = arith.constant dense<0.000000e+00> : vector<8xf32>
    %102 = vector.multi_reduction <add>, %101, %cst_32 [1] : vector<8x8xf32> to vector<8xf32>
    %103 = vector.shape_cast %102 : vector<8xf32> to vector<8x1xf32>
    %104 = tpu.reciprocal %103 {approx = true} : vector<8x1xf32> -> vector<8x1xf32>
    %105 = vector.broadcast %104 : vector<8x1xf32> to vector<8x8xf32>
    %106 = arith.mulf %101, %105 : vector<8x8xf32>
    %107 = arith.truncf %106 : vector<8x8xf32> to vector<8x8xbf16>
    %108 = vector.extract_strided_slice %27 {offsets = [0, 24], sizes = [8, 8], strides = [1, 1]} : vector<8x32xbf16> to vector<8x8xbf16>
    %cst_33 = arith.constant dense<0.000000e+00> : vector<8x8xf32>
    %109 = tpu.matmul %107, %108, %cst_33 {dimension_numbers = #tpu.dot_dimension_numbers<[1], [0], [0], [1], [0, 0, 1, 1], [], []>} : vector<8x8xbf16>, vector<8x8xbf16>, vector<8x8xf32> -> vector<8x8xf32>
    %110 = arith.truncf %109 : vector<8x8xf32> to vector<8x8xbf16>
    %111 = vector.extract_strided_slice %28 {offsets = [24, 0], sizes = [8, 32], strides = [1, 1]} : vector<32x32xbf16> to vector<8x32xbf16>
    %cst_34 = arith.constant dense<0.000000e+00> : vector<8x32xf32>
    %112 = tpu.matmul %110, %111, %cst_34 {dimension_numbers = #tpu.dot_dimension_numbers<[1], [0], [0], [1], [0, 0, 1, 1], [], []>} : vector<8x8xbf16>, vector<8x32xbf16>, vector<8x32xf32> -> vector<8x32xf32>
    %113 = arith.addf %92, %112 : vector<8x32xf32>
    %c0_35 = arith.constant 0 : index
    %c0_36 = arith.constant 0 : index
    %114 = vector.load %arg8[%c0_35, %c0_36] : memref<1x32xf32, #tpu.memory_space<vmem>>, vector<1x32xf32>
    %115 = vector.broadcast %114 : vector<1x32xf32> to vector<8x32xf32>
    %116 = arith.addf %113, %115 : vector<8x32xf32>
    %117 = arith.extf %1 : vector<8x32xbf16> to vector<8x32xf32>
    %118 = arith.addf %117, %116 : vector<8x32xf32>
    %cst_37 = arith.constant dense<0.000000e+00> : vector<8xf32>
    %119 = vector.multi_reduction <add>, %118, %cst_37 [1] : vector<8x32xf32> to vector<8xf32>
    %120 = vector.shape_cast %119 : vector<8xf32> to vector<8x1xf32>
    %cst_38 = arith.constant 3.200000e+01 : f32
    %121 = vector.broadcast %cst_38 : f32 to vector<8x1xf32>
    %122 = arith.divf %120, %121 : vector<8x1xf32>
    %123 = vector.broadcast %122 : vector<8x1xf32> to vector<8x32xf32>
    %124 = arith.subf %118, %123 : vector<8x32xf32>
    %125 = arith.mulf %124, %124 : vector<8x32xf32>
    %cst_39 = arith.constant dense<0.000000e+00> : vector<8xf32>
    %126 = vector.multi_reduction <add>, %125, %cst_39 [1] : vector<8x32xf32> to vector<8xf32>
    %127 = vector.shape_cast %126 : vector<8xf32> to vector<8x1xf32>
    %cst_40 = arith.constant 3.200000e+01 : f32
    %128 = vector.broadcast %cst_40 : f32 to vector<8x1xf32>
    %129 = arith.divf %127, %128 : vector<8x1xf32>
    %130 = vector.broadcast %122 : vector<8x1xf32> to vector<8x32xf32>
    %131 = arith.subf %118, %130 : vector<8x32xf32>
    %cst_41 = arith.constant 9.99999974E-6 : f32
    %132 = vector.broadcast %cst_41 : f32 to vector<8x1xf32>
    %133 = arith.addf %129, %132 : vector<8x1xf32>
    %134 = math.rsqrt %133 : vector<8x1xf32>
    %135 = vector.broadcast %134 : vector<8x1xf32> to vector<8x32xf32>
    %136 = arith.mulf %131, %135 : vector<8x32xf32>
    %c0_42 = arith.constant 0 : index
    %c0_43 = arith.constant 0 : index
    %137 = vector.load %arg9[%c0_42, %c0_43] : memref<1x32xf32, #tpu.memory_space<vmem>>, vector<1x32xf32>
    %138 = vector.broadcast %137 : vector<1x32xf32> to vector<8x32xf32>
    %139 = arith.mulf %136, %138 : vector<8x32xf32>
    %c0_44 = arith.constant 0 : index
    %c0_45 = arith.constant 0 : index
    %140 = vector.load %arg10[%c0_44, %c0_45] : memref<1x32xf32, #tpu.memory_space<vmem>>, vector<1x32xf32>
    %141 = vector.broadcast %140 : vector<1x32xf32> to vector<8x32xf32>
    %142 = arith.addf %139, %141 : vector<8x32xf32>
    %143 = arith.truncf %142 : vector<8x32xf32> to vector<8x32xbf16>
    %c0_46 = arith.constant 0 : index
    %c0_47 = arith.constant 0 : index
    %c0_48 = arith.constant 0 : index
    %144 = vector.load %arg11[%c0_46, %c0_47, %c0_48] : memref<1x8x32xbf16, #tpu.memory_space<vmem>>, vector<1x8x32xbf16>
    %145 = vector.shape_cast %144 : vector<1x8x32xbf16> to vector<8x32xbf16>
    %146 = vector.shape_cast %143 : vector<8x32xbf16> to vector<1x8x32xbf16>
    tpu.vector_store %arg11[%c0_46, %c0_47, %c0_48], %146 {strides = array<i32>} : memref<1x8x32xbf16, #tpu.memory_space<vmem>>, vector<1x8x32xbf16>,
    return
  }
  func.func @transform_0(%arg0: i32, %arg1: i32) -> (i32, i32, i32) {
    %c0_i32 = arith.constant 0 : i32
    %c0_i32_0 = arith.constant 0 : i32
    return %arg0, %arg1, %c0_i32 : i32, i32, i32
  }
  func.func @transform_1(%arg0: i32, %arg1: i32) -> (i32, i32, i32) {
    %c0_i32 = arith.constant 0 : i32
    %c0_i32_0 = arith.constant 0 : i32
    %c0_i32_1 = arith.constant 0 : i32
    return %arg0, %c0_i32, %c0_i32_0 : i32, i32, i32
  }
  func.func @transform_2(%arg0: i32, %arg1: i32) -> (i32, i32, i32) {
    %c0_i32 = arith.constant 0 : i32
    %c0_i32_0 = arith.constant 0 : i32
    %c0_i32_1 = arith.constant 0 : i32
    return %arg0, %c0_i32, %c0_i32_0 : i32, i32, i32
  }
  func.func @transform_3(%arg0: i32, %arg1: i32) -> (i32, i32) {
    %c0_i32 = arith.constant 0 : i32
    %c0_i32_0 = arith.constant 0 : i32
    %c0_i32_1 = arith.constant 0 : i32
    return %c0_i32, %c0_i32_0 : i32, i32
  }
  func.func @transform_4(%arg0: i32, %arg1: i32) -> (i32, i32) {
    %c0_i32 = arith.constant 0 : i32
    %c0_i32_0 = arith.constant 0 : i32
    %c0_i32_1 = arith.constant 0 : i32
    return %c0_i32, %c0_i32_0 : i32, i32
  }
  func.func @transform_5(%arg0: i32, %arg1: i32) -> (i32, i32) {
    %c0_i32 = arith.constant 0 : i32
    %c0_i32_0 = arith.constant 0 : i32
    %c0_i32_1 = arith.constant 0 : i32
    return %c0_i32, %c0_i32_0 : i32, i32
  }
  func.func @transform_6(%arg0: i32, %arg1: i32) -> (i32, i32) {
    %c0_i32 = arith.constant 0 : i32
    %c0_i32_0 = arith.constant 0 : i32
    %c0_i32_1 = arith.constant 0 : i32
    return %c0_i32, %c0_i32_0 : i32, i32
  }
  func.func @transform_7(%arg0: i32, %arg1: i32) -> (i32, i32) {
    %c0_i32 = arith.constant 0 : i32
    %c0_i32_0 = arith.constant 0 : i32
    %c0_i32_1 = arith.constant 0 : i32
    return %c0_i32, %c0_i32_0 : i32, i32
  }
  func.func @transform_8(%arg0: i32, %arg1: i32) -> (i32, i32) {
    %c0_i32 = arith.constant 0 : i32
    %c0_i32_0 = arith.constant 0 : i32
    %c0_i32_1 = arith.constant 0 : i32
    return %c0_i32, %c0_i32_0 : i32, i32
  }
  func.func @transform_9(%arg0: i32, %arg1: i32) -> (i32, i32, i32) {
    %c0_i32 = arith.constant 0 : i32
    %c0_i32_0 = arith.constant 0 : i32
    return %arg0, %arg1, %c0_i32 : i32, i32, i32
  }
}

module attributes {stable_mosaic.version = 11 : i64} {
  func.func @_linear_kernel(%arg0: i32, %arg1: i32, %arg2: i32, %arg3: memref<16x32xbf16, #tpu.memory_space<vmem>>, %arg4: memref<32x512xbf16, #tpu.memory_space<vmem>>, %arg5: memref<1x512xf32, #tpu.memory_space<vmem>>, %arg6: memref<16x512xf32, #tpu.memory_space<vmem>>, %arg7: memref<16x512xf32, #tpu.memory_space<vmem>>) attributes {dimension_semantics = [#tpu.dimension_semantics<parallel>, #tpu.dimension_semantics<parallel>, #tpu.dimension_semantics<arbitrary>], iteration_bounds = array<i64: 1, 1, 1>, scalar_prefetch = 0 : i64, scratch_operands = 1 : i64, tpu.core_type = #tpu.core_type<tc>, window_params = [{transform_indices = @transform_0, window_bounds = array<i64: 16, 32>}, {transform_indices = @transform_1, window_bounds = array<i64: 32, 512>}, {transform_indices = @transform_2, window_bounds = array<i64: 1, 512>}, {transform_indices = @transform_3, window_bounds = array<i64: 16, 512>}]} {
    %c0_i32 = arith.constant 0 : i32
    %0 = arith.cmpi eq, %arg2, %c0_i32 : i32
    %1 = arith.extui %0 : i1 to i32
    %c0_i32_0 = arith.constant 0 : i32
    %2 = arith.cmpi ne, %1, %c0_i32_0 : i32
    scf.if %2 {
      %cst_10 = arith.constant 0.000000e+00 : f32
      %12 = vector.broadcast %cst_10 : f32 to vector<16x512xf32>
      %c0_11 = arith.constant 0 : index
      %c0_12 = arith.constant 0 : index
      %13 = vector.load %arg7[%c0_11, %c0_12] : memref<16x512xf32, #tpu.memory_space<vmem>>, vector<16x512xf32>
      tpu.vector_store %arg7[%c0_11, %c0_12], %12 {strides = array<i32>} : memref<16x512xf32, #tpu.memory_space<vmem>>, vector<16x512xf32>,
    } else {
    }
    %c0 = arith.constant 0 : index
    %c0_1 = arith.constant 0 : index
    %3 = vector.load %arg7[%c0, %c0_1] : memref<16x512xf32, #tpu.memory_space<vmem>>, vector<16x512xf32>
    %c0_2 = arith.constant 0 : index
    %c0_3 = arith.constant 0 : index
    %4 = vector.load %arg3[%c0_2, %c0_3] : memref<16x32xbf16, #tpu.memory_space<vmem>>, vector<16x32xbf16>
    %c0_4 = arith.constant 0 : index
    %c0_5 = arith.constant 0 : index
    %5 = vector.load %arg4[%c0_4, %c0_5] : memref<32x512xbf16, #tpu.memory_space<vmem>>, vector<32x512xbf16>
    %cst = arith.constant dense<0.000000e+00> : vector<16x512xf32>
    %6 = tpu.matmul %4, %5, %cst {dimension_numbers = #tpu.dot_dimension_numbers<[1], [0], [0], [1], [0, 0, 1, 1], [], []>} : vector<16x32xbf16>, vector<32x512xbf16>, vector<16x512xf32> -> vector<16x512xf32>
    %7 = arith.addf %3, %6 : vector<16x512xf32>
    %c0_6 = arith.constant 0 : index
    %c0_7 = arith.constant 0 : index
    %8 = vector.load %arg7[%c0_6, %c0_7] : memref<16x512xf32, #tpu.memory_space<vmem>>, vector<16x512xf32>
    tpu.vector_store %arg7[%c0_6, %c0_7], %7 {strides = array<i32>} : memref<16x512xf32, #tpu.memory_space<vmem>>, vector<16x512xf32>,
    %c0_i32_8 = arith.constant 0 : i32
    %9 = arith.cmpi eq, %arg2, %c0_i32_8 : i32
    %10 = arith.extui %9 : i1 to i32
    %c0_i32_9 = arith.constant 0 : i32
    %11 = arith.cmpi ne, %10, %c0_i32_9 : i32
    scf.if %11 {
      %c0_10 = arith.constant 0 : index
      %c0_11 = arith.constant 0 : index
      %12 = vector.load %arg7[%c0_10, %c0_11] : memref<16x512xf32, #tpu.memory_space<vmem>>, vector<16x512xf32>
      %c0_12 = arith.constant 0 : index
      %c0_13 = arith.constant 0 : index
      %13 = vector.load %arg5[%c0_12, %c0_13] : memref<1x512xf32, #tpu.memory_space<vmem>>, vector<1x512xf32>
      %14 = vector.broadcast %13 : vector<1x512xf32> to vector<16x512xf32>
      %15 = arith.addf %12, %14 : vector<16x512xf32>
      %c0_14 = arith.constant 0 : index
      %c0_15 = arith.constant 0 : index
      %16 = vector.load %arg6[%c0_14, %c0_15] : memref<16x512xf32, #tpu.memory_space<vmem>>, vector<16x512xf32>
      tpu.vector_store %arg6[%c0_14, %c0_15], %15 {strides = array<i32>} : memref<16x512xf32, #tpu.memory_space<vmem>>, vector<16x512xf32>,
    } else {
    }
    return
  }
  func.func @transform_0(%arg0: i32, %arg1: i32, %arg2: i32) -> (i32, i32) {
    %c0_i32 = arith.constant 0 : i32
    return %arg0, %arg2 : i32, i32
  }
  func.func @transform_1(%arg0: i32, %arg1: i32, %arg2: i32) -> (i32, i32) {
    %c0_i32 = arith.constant 0 : i32
    return %arg2, %arg1 : i32, i32
  }
  func.func @transform_2(%arg0: i32, %arg1: i32, %arg2: i32) -> (i32, i32) {
    %c0_i32 = arith.constant 0 : i32
    %c0_i32_0 = arith.constant 0 : i32
    return %c0_i32, %arg1 : i32, i32
  }
  func.func @transform_3(%arg0: i32, %arg1: i32, %arg2: i32) -> (i32, i32) {
    %c0_i32 = arith.constant 0 : i32
    return %arg0, %arg1 : i32, i32
  }
}

</mosaic_0001>

<bundles_post_ra>
// kernel: _lambda_.7
= control target key start
LH: loop header
LB: loop body
LE: loop exit
PB: predicated region body
PF: predicated region fallthrough
CT: control target
= control target key end

     0   :  { %s1619_s0 = inlined_call_operand.hbm [shape: bf16[2,8,32], index: 0, kind: input, shape index: {}]   ;;  %s1620_s1 = inlined_call_operand.hbm [shape: bf16[32,64], index: 1, kind: input, shape index: {}]   ;;  %s1621_s2 = inlined_call_operand.hbm [shape: f32[1,64], index: 2, kind: input, shape index: {}]   ;;  %s1622_s3 = inlined_call_operand.hbm [shape: bf16[64,32], index: 3, kind: input, shape index: {}]   ;;  %s1623_s4 = inlined_call_operand.hbm [shape: f32[1,32], index: 4, kind: input, shape index: {}]   ;;  %s1624_s5 = inlined_call_operand.hbm [shape: f32[1,32], index: 5, kind: input, shape index: {}]   ;;  %s1625_s6 = inlined_call_operand.hbm [shape: f32[1,32], index: 6, kind: input, shape index: {}]   ;;  %s1626_s7 = inlined_call_operand.hbm [shape: bf16[2,8,32], index: 7, kind: output, shape index: {}]  }
   0x1   :  { %1633 = sst [smem:[#allocation20_spill]] %s1620_s1 }
   0x2   :  { %1634 = sst [smem:[#allocation21_spill]] %s1626_s7 }
   0x3   :  { %12 = vsyncpa [#allocation3], 0 }
   0x4   :  { %14 = vsyncpa [#allocation3 + $0x1], 0 }
   0x5   :  { %15 = vsyncpa [#allocation6], 0 }
   0x6   :  { %16 = vsyncpa [#allocation9], 0 }
   0x7   :  { %17 = vsyncpa [#allocation12], 0 }
   0x8   :  { %18 = vsyncpa [#allocation4], 0 }
   0x9   :  { %20 = vsyncpa [#allocation4 + $0x1], 0  ;;  %s1277_s24 = smov 0   ;;  %s1279_s25 = smov 0  }
   0xa   :  { %s1281_s26 = smov 0   ;;  %s1283_s27 = smov 0  }
   0xb   :  { %s1285_s28 = smov 0   ;;  %s1287_s29 = smov 0  }
   0xc LB: > { %s1627_s30 = sadd.s32 4294967295, %s1223_s29   ;;  %p733_p0 = scmp.ge.s32.totalorder %s1223_s29, 1  ;;  %s1223_s29 = sphi %s1287_s29, %s26_s29   ;;  %s1219_s28 = sphi %s1285_s28, %s1657_s28   ;;  %s1215_s27 = sphi %s1283_s27, %s1656_s27   ;;  %s1211_s26 = sphi %s1281_s26, %s1655_s26   ;;  %s1207_s25 = sphi %s1279_s25, %s1654_s25   ;;  %s1203_s24 = sphi %s1277_s24, %s1653_s24  }
   0xd   : > { %p1311_p1 = scmp.eq.s32.totalorder %s1627_s30, 0  ;;  %p225_p2 = scmp.lt.s32.totalorder %s1223_s29, 3 }
   0xe   : > { %s1225_s10 = smov [#allocation5]   ;;  %s1226_s13 = smov [#allocation8]  }
   0xf   : > { %s1635_s8 = scalar_select %p1311_p1, 1, 0 }
  0x10   : > { %p1316_p3 = pnand %p733_p0, %p225_p2  ;;  %s237_s11 = sshll.u32 %s1225_s10, 4  ;;  %s1320_s11 = int_to_ptr.vmem [resolvable:$true] %s237_s11 }
  0x11   : > { %s261_s14 = sshll.u32 %s1226_s13, 4  ;;  %s1227_s15 = smov [#allocation11]   ;;  %s1331_s14 = int_to_ptr.vmem [resolvable:$true] %s261_s14 }
  0x12   : > { %s1636_s9 = scalar_select %p1316_p3, 1, 0 }
  0x13   : > { %p824_p4 = pneg %p1316_p3  ;;  %s1333_s16 = sshll.u32 %s1227_s15, 4  ;;  %s287_s16 = int_to_ptr.vmem [resolvable:$true] %s1333_s16 }
  0x14   : > { %s1638_s1 = sld [smem:[#allocation20_spill]] }
  0x15   : > { %p1327_p6 = pnand %p824_p4, %p1311_p1 }
  0x17   : > { %p1343_p8 = pneg %p1327_p6 }
  0x1a   : > { %s931_s19 = scalar_lea.hbm %s1638_s1, 256 }
  0x1b   : > { %p932_p7 = scmp.ne.s32.totalorder %s1638_s1, %s931_s19  ;;  %p938_p11 = scmp.lt.u32.totalorder %s931_s19, %s1638_s1 }
  0x1d   : > { %p934_p9 = pnand %p1343_p8, %p932_p7 }
  0x1f   : > { %p935_p10 = pneg %p934_p9 }
  0x21   : > { %p940_p12 = pnand %p938_p11, %p935_p10 }
  0x23   : > { %943 = shalt.err (!%p940_p12)
}
  0x24   : > { %s944_s13 = scalar_lea.vmem %s1320_s11, 256  ;;  %p952_p4 = scmp.lt.s32.totalorder %s1320_s11, %s1320_s11 }
  0x25   : > { %p945_p13 = scmp.ne.s32.totalorder %s1320_s11, %s944_s13  ;;  %p953_p5 = scmp.lt.s32.totalorder %s944_s13, %s944_s13 }
  0x27   : > { %p947_p0 = pnand %p945_p13, %p1343_p8  ;;  %p954_p7 = por %p953_p5, %p952_p4 }
  0x29   : > { %p948_p2 = pneg %p947_p0 }
  0x2b   : > { %p955_p9 = pnand %p954_p7, %p948_p2 }
  0x2d   : > { %958 = shalt.err (!%p955_p9)
}
  0x2e   : > { %s1228_s15 = smov 64   ;;  %s1229_s17 = smov 4  }
  0x2f   : > { %827 = dma.hbm_to_vmem [thread:$0]  (!%p1327_p6), %s1638_s1, 256, %s1320_s11, [#allocation6], %s1228_s15, %s1228_s15, %s1229_s17  }
  0x30   : > { %s959_s23 = scalar_lea.hbm %s1622_s3, 512 }
  0x31   : > { %p960_p5 = scmp.ne.s32.totalorder %s1622_s3, %s959_s23  ;;  %p966_p12 = scmp.lt.u32.totalorder %s959_s23, %s1622_s3 }
  0x33   : > { %p962_p10 = pnand %p960_p5, %p1343_p8 }
  0x35   : > { %p963_p11 = pneg %p962_p10 }
  0x37   : > { %p968_p13 = pnand %p966_p12, %p963_p11 }
  0x39   : > { %971 = shalt.err (!%p968_p13)
}
  0x3a   : > { %s972_s11 = scalar_lea.vmem %s1331_s14, 512  ;;  %p980_p7 = scmp.lt.s32.totalorder %s1331_s14, %s1331_s14 }
  0x3b   : > { %p973_p0 = scmp.ne.s32.totalorder %s1331_s14, %s972_s11  ;;  %p981_p9 = scmp.lt.s32.totalorder %s972_s11, %s972_s11 }
  0x3d   : > { %p975_p2 = pnand %p973_p0, %p1343_p8  ;;  %p982_p5 = por %p981_p9, %p980_p7 }
  0x3f   : > { %p976_p4 = pneg %p975_p2 }
  0x41   : > { %p983_p10 = pnand %p982_p5, %p976_p4 }
  0x43   : > { %986 = shalt.err (!%p983_p10)
}
  0x44   : > { %833 = dma.hbm_to_vmem [thread:$0]  (!%p1327_p6), %s1622_s3, 512, %s1331_s14, [#allocation9], %s1228_s15, %s1228_s15, %s1229_s17  }
  0x45   : > { %s987_s20 = scalar_lea.hbm %s1624_s5, 16 }
  0x46   : > { %p988_p11 = scmp.ne.s32.totalorder %s1624_s5, %s987_s20  ;;  %p994_p0 = scmp.lt.u32.totalorder %s987_s20, %s1624_s5 }
  0x48   : > { %p990_p12 = pnand %p988_p11, %p1343_p8 }
  0x4a   : > { %p991_p13 = pneg %p990_p12 }
  0x4c   : > { %p996_p2 = pnand %p994_p0, %p991_p13 }
  0x4e   : > { %999 = shalt.err (!%p996_p2)
}
  0x4f   : > { %s1000_s11 = scalar_lea.vmem %s287_s16, 16  ;;  %s1007_s14 = scalar_lea.vmem %s287_s16, 32 }
  0x50   : > { %p1001_p4 = scmp.ne.s32.totalorder %s287_s16, %s1000_s11  ;;  %p1008_p5 = scmp.lt.s32.totalorder %s287_s16, %s287_s16 }
  0x51   : > { %p1009_p10 = scmp.lt.s32.totalorder %s1007_s14, %s1000_s11 }
  0x52   : > { %p1003_p7 = pnand %p1001_p4, %p1343_p8 }
  0x53   : > { %p1010_p3 = por %p1009_p10, %p1008_p5 }
  0x54   : > { %p1004_p9 = pneg %p1003_p7 }
  0x56   : > { %p1011_p1 = pnand %p1010_p3, %p1004_p9 }
  0x58   : > { %1014 = shalt.err (!%p1011_p1)
}
  0x59   : > { %839 = dma.hbm_to_vmem [thread:$0]  (!%p1327_p6), %s1624_s5, 16, %s287_s16, [#allocation12]  }
  0x5a   : > { %s1230_s7 = smov [#allocation7]   ;;  %s1231_s18 = smov [#allocation10]  }
  0x5b   : > { %s251_s30 = sshll.u32 %s1230_s7, 4  ;;  %s275_s19 = sshll.u32 %s1231_s18, 4  ;;  %s252_s30 = int_to_ptr.vmem [resolvable:$true] %s251_s30  ;;  %s276_s19 = int_to_ptr.vmem [resolvable:$true] %s275_s19 }
  0x5c   : > { %s1015_s23 = scalar_lea.hbm %s1621_s2, 16 }
  0x5d   : > { %p1016_p1 = scmp.ne.s32.totalorder %s1621_s2, %s1015_s23  ;;  %p1022_p12 = scmp.lt.u32.totalorder %s1015_s23, %s1621_s2 }
  0x5f   : > { %p1018_p3 = pnand %p1016_p1, %p1343_p8 }
  0x61   : > { %p1019_p11 = pneg %p1018_p3 }
  0x63   : > { %p1024_p13 = pnand %p1022_p12, %p1019_p11 }
  0x65   : > { %1027 = shalt.err (!%p1024_p13)
}
  0x66   : > { %s1028_s16 = scalar_lea.vmem %s252_s30, 16  ;;  %s1035_s15 = scalar_lea.vmem %s252_s30, 32 }
  0x67   : > { %p1029_p0 = scmp.ne.s32.totalorder %s252_s30, %s1028_s16  ;;  %p1036_p7 = scmp.lt.s32.totalorder %s252_s30, %s252_s30 }
  0x68   : > { %p1037_p9 = scmp.lt.s32.totalorder %s1035_s15, %s1028_s16 }
  0x69   : > { %p1031_p2 = pnand %p1029_p0, %p1343_p8 }
  0x6a   : > { %p1038_p5 = por %p1037_p9, %p1036_p7 }
  0x6b   : > { %p1032_p4 = pneg %p1031_p2 }
  0x6d   : > { %p1039_p10 = pnand %p1038_p5, %p1032_p4 }
  0x6f   : > { %1042 = shalt.err (!%p1039_p10)
}
  0x70   : > { %830 = dma.hbm_to_vmem [thread:$0]  (!%p1327_p6), %s1621_s2, 16, %s252_s30, [#allocation6]  }
  0x71   : > { %s1043_s21 = scalar_lea.hbm %s1623_s4, 16 }
  0x72   : > { %p1044_p1 = scmp.ne.s32.totalorder %s1623_s4, %s1043_s21  ;;  %p1050_p12 = scmp.lt.u32.totalorder %s1043_s21, %s1623_s4 }
  0x74   : > { %p1046_p3 = pnand %p1044_p1, %p1343_p8 }
  0x76   : > { %p1047_p11 = pneg %p1046_p3 }
  0x78   : > { %p1052_p13 = pnand %p1050_p12, %p1047_p11 }
  0x7a   : > { %1055 = shalt.err (!%p1052_p13)
}
  0x7b   : > { %s1056_s14 = scalar_lea.vmem %s276_s19, 16  ;;  %s1063_s30 = scalar_lea.vmem %s276_s19, 32 }
  0x7c   : > { %p1057_p0 = scmp.ne.s32.totalorder %s276_s19, %s1056_s14  ;;  %p1064_p7 = scmp.lt.s32.totalorder %s276_s19, %s276_s19 }
  0x7d   : > { %p1065_p9 = scmp.lt.s32.totalorder %s1063_s30, %s1056_s14 }
  0x7e   : > { %p1059_p2 = pnand %p1057_p0, %p1343_p8 }
  0x7f   : > { %p1066_p5 = por %p1065_p9, %p1064_p7 }
  0x80   : > { %p1060_p4 = pneg %p1059_p2 }
  0x82   : > { %p1067_p10 = pnand %p1066_p5, %p1060_p4 }
  0x84   : > { %1070 = shalt.err (!%p1067_p10)
}
  0x85   : > { %836 = dma.hbm_to_vmem [thread:$0]  (!%p1327_p6), %s1623_s4, 16, %s276_s19, [#allocation9]  }
  0x86   : > { %s1232_s17 = smov [#allocation13]   ;;  %s1071_s21 = scalar_lea.hbm %s1625_s6, 16 }
  0x87   : > { %s297_s7 = sshll.u32 %s1232_s17, 4  ;;  %p1072_p1 = scmp.ne.s32.totalorder %s1625_s6, %s1071_s21  ;;  %s298_s7 = int_to_ptr.vmem [resolvable:$true] %s297_s7 }
  0x88   : > { %p1078_p12 = scmp.lt.u32.totalorder %s1071_s21, %s1625_s6 }
  0x89   : > { %p1074_p3 = pnand %p1072_p1, %p1343_p8 }
  0x8b   : > { %p1075_p11 = pneg %p1074_p3 }
  0x8d   : > { %p1080_p13 = pnand %p1078_p12, %p1075_p11 }
  0x8f   : > { %1083 = shalt.err (!%p1080_p13)
}
  0x90   : > { %s1084_s19 = scalar_lea.vmem %s298_s7, 16  ;;  %s1091_s14 = scalar_lea.vmem %s298_s7, 32 }
  0x91   : > { %p1085_p0 = scmp.ne.s32.totalorder %s298_s7, %s1084_s19  ;;  %p1092_p7 = scmp.lt.s32.totalorder %s298_s7, %s298_s7 }
  0x92   : > { %p1093_p9 = scmp.lt.s32.totalorder %s1091_s14, %s1084_s19 }
  0x93   : > { %p1087_p2 = pnand %p1085_p0, %p1343_p8 }
  0x94   : > { %p1094_p5 = por %p1093_p9, %p1092_p7 }
  0x95   : > { %p1088_p4 = pneg %p1087_p2 }
  0x97   : > { %p1095_p10 = pnand %p1094_p5, %p1088_p4 }
  0x99   : > { %1098 = shalt.err (!%p1095_p10)
}
  0x9a   : > { %842 = dma.hbm_to_vmem [thread:$0]  (!%p1327_p6), %s1625_s6, 16, %s298_s7, [#allocation12]  }
  0x9b   : > { %s732_s22 = sadd.s32 4294967294, %s1223_s29   ;;  %s38_s15 = sadd.s32 1, %s1219_s28 }
  0x9c   : > { %p40_p8 = scmp.ge.s32.totalorder %s38_s15, 2  ;;  %s47_s12 = sadd.s32 1, %s1211_s26 }
  0x9d   : > { %p54_p1 = scmp.ne.s32.totalorder %s1211_s26, %s1207_s25  ;;  %p55_p3 = scmp.eq.s32.totalorder %s1223_s29, 0 }
  0x9e   : > { %s1659_s15 = smov (%p40_p8, %s38_s15), 0  ;;  %p60_p12 = scmp.ne.s32.totalorder %s1207_s25, %s1203_s24 }
  0x9f   : > { %p1468_p11 = por %p55_p3, %p54_p1  ;;  %s42_s7 = ssub.s32 %s1219_s28, %s1659_s15 }
  0xa0   : > { %s1641_s18 = sadd.s32 4294967295, %s1223_s29   ;;  %p45_p13 = scmp.eq.s32.totalorder %s42_s7, 0 }
  0xa1   : > { %p212_p6 = scmp.eq.s32.totalorder %s1641_s18, 1  ;;  %p1642_p0 = scmp.ne.s32.totalorder %s1635_s8, 0 }
  0xa2   : > { %p218_p7 = scmp.eq.s32.totalorder %s732_s22, 1  ;;  %p857_p5 = scmp.lt.s32.totalorder %s1223_s29, 2 }
  0xa3   : > { %p1480_p2 = por %p1642_p0, %p60_p12  ;;  %p1484_p4 = por %p212_p6, %p54_p1 }
  0xa4   : > { %s1489_s23 = scalar_select %p45_p13, %s1211_s26, %s47_s12  }
  0xa5   : > { %s1644_s21 = scalar_select %p1484_p4, 1, 0 }
  0xa6   : > { %p1491_p9 = por %p218_p7, %p60_p12  ;;  %s308_s13 = sand.u32 1, %s1211_s26  }
  0xa7   : > { %s742_s11 = sshll.u32 %s1219_s28, 6  ;;  %s741_s19 = sshll.u32 %s308_s13, 2 }
  0xa8   : > { %s1645_s10 = scalar_select %p1491_p9, 1, 0 }
  0xa9   : > { %s1501_s16 = scalar_lea.hbm %s1619_s0, %s742_s11  ;;  %s312_s22 = scalar_lea.vmem [#allocation2], %s741_s19 }
  0xaa   : > { %s320_s12 = sshll.u32 %s312_s22, 4  ;;  %p1505_p10 = pnand %p857_p5, %p1468_p11  ;;  %s1509_s12 = int_to_ptr.vmem [resolvable:$true] %s320_s12 }
  0xab   : > { %s309_s18 = scalar_lea.sflag [#allocation3], %s308_s13  ;;  %s1099_s1 = scalar_lea.hbm %s1501_s16, 64 }
  0xac   : > { %p1100_p8 = scmp.ne.s32.totalorder %s1501_s16, %s1099_s1  ;;  %p1101_p1 = pneg %p1505_p10 }
  0xad   : > { %s1104_s17 = scalar_lea.hbm %s1619_s0, 128  ;;  %p1105_p11 = scmp.lt.u32.totalorder %s1501_s16, %s1619_s0 }
  0xae   : > { %p1102_p3 = pnand %p1101_p1, %p1100_p8  ;;  %p1106_p6 = scmp.lt.u32.totalorder %s1104_s17, %s1099_s1 }
  0xaf   : > { %p1108_p0 = scmp.lt.u32.totalorder %s1099_s1, %s1501_s16 }
  0xb0   : > { %p1103_p12 = pneg %p1102_p3  ;;  %p1107_p13 = por %p1106_p6, %p1105_p11 }
  0xb2   : > { %p1109_p7 = por %p1108_p0, %p1107_p13 }
  0xb4   : > { %p1110_p5 = pnand %p1109_p7, %p1103_p12 }
  0xb6   : > { %1113 = shalt.err (!%p1110_p5)
}
  0xb7   : > { %s1114_s13 = scalar_lea.vmem %s1509_s12, 64  ;;  %s1233_s22 = smov [#allocation2]  }
  0xb8   : > { %p1115_p8 = scmp.ne.s32.totalorder %s1509_s12, %s1114_s13  ;;  %s1119_s11 = sshll.u32 %s1233_s22, 4  ;;  %s1120_s11 = int_to_ptr.vmem [resolvable:$false] %s1119_s11 }
  0xb9   : > { %s1121_s19 = scalar_lea.vmem %s1120_s11, 128  ;;  %p1122_p4 = scmp.lt.s32.totalorder %s1509_s12, %s1120_s11 }
  0xba   : > { %p1117_p3 = pnand %p1115_p8, %p1101_p1  ;;  %p1123_p11 = scmp.lt.s32.totalorder %s1121_s19, %s1114_s13 }
  0xbc   : > { %p1118_p9 = pneg %p1117_p3  ;;  %p1124_p6 = por %p1123_p11, %p1122_p4 }
  0xbe   : > { %p1125_p13 = pnand %p1124_p6, %p1118_p9 }
  0xc0   : > { %1128 = shalt.err (!%p1125_p13)
}
  0xc1   : > { %846 = dma.hbm_to_vmem [thread:$0]  (!%p1505_p10), %s1501_s16, 64, %s1509_s12, %s309_s18  }
  0xc2   : > { %p1647_p12 = scmp.ne.s32.totalorder %s1636_s9, 0 }
  0xc3   : > { %s1539_s1 = sand.u32 (!%p1647_p12), 1, %s1207_s25  }
  0xc4   : > { %329 = sbr.rel (%p1647_p12) target bundleno = 984 (0x3d8), region = 48  ;;  %s744_s17 = sshll.u32 (!%p1647_p12), %s1539_s1, 2 }
  0xc5   : > { %s332_s14 = scalar_lea.sflag (!%p1647_p12), [#allocation3], %s1539_s1  ;;  %s335_s30 = scalar_lea.vmem (!%p1647_p12), [#allocation2], %s744_s17 }
  0xcb   : > { %1182 = dma.done.wait (%p1480_p2), %s332_s14, 64  }
  0xcc   : > { %1184 = vsyncadd (%p1480_p2), %s332_s14, 4294967232  ;;  %p1648_p4 = scmp.ne.s32.totalorder %s1635_s8, 0 }
  0xce   : > { %1186 = dma.done.wait (%p1648_p4), [#allocation6], 272  }
  0xcf   : > { %1188 = vsyncadd (%p1648_p4), [#allocation6], 4294967024 }
  0xd0   : > { %1190 = dma.done.wait (%p1648_p4), [#allocation9], 528  }
  0xd1   : > { %1192 = vsyncadd (%p1648_p4), [#allocation9], 4294966768 }
  0xd2   : > { %1194 = dma.done.wait (%p1648_p4), [#allocation12], 32  }
  0xd3   : > { %1196 = vsyncadd (%p1648_p4), [#allocation12], 4294967264  ;;  %v1234_v0 = vmov 0.0   ;;  %vm1235_vm0 = vmmov 0   ;;  %v923_v1 = vld [vmem:[#allocation5] sm:$0xff]   ;;  %v924_v2 = vld [vmem:[#allocation5 + $0x8] sm:$0xff]  }
  0xd4   : > { %776 = vmatprep.subr.bf16.mxu0 %v1234_v0  ;;  %780 = vmatprep.mubr.msk.bf16.mxu0 %vm1235_vm0, %v1234_v0  ;;  %v925_v3 = vld [vmem:[#allocation8] sm:$0xff]   ;;  %v926_v4 = vld [vmem:[#allocation8 + $0x8] sm:$0xff]   ;;  %vm415_vm1 = vcmask 261120   ;;  %v927_v6 = vld [vmem:[#allocation8 + $0x10] sm:$0xff]   ;;  %vm500_vm2 = vcmask 523264   ;;  %s765_s8 = sshll.u32 %s1215_s27, 6 }
  0xd5   : > { %784 = vmatprep.subr.bf16.mxu1 %v1234_v0  ;;  %792 = vmatprep.mubr.msk.bf16.mxu1 %vm1235_vm0, %v1234_v0  ;;  %v391_v5 = vld [vmem:[%s335_s30] sm:$0xf]  ;;  %v928_v7 = vld [vmem:[#allocation8 + $0x18] sm:$0xff]   ;;  %v756_v16 = vld [vmem:[#allocation10] ss:$0 sm:$0xff]  ;;  %s389_s9 = scalar_lea.vmem [#allocation14], %s744_s17 }
  0xd6   : > { %777 = vmatpush3.bf16.msra.mxu0 %v923_v1  ;;  %785 = vmatpush3.bf16.msra.mxu1 %v925_v3  ;;  %v752_v8 = vld [vmem:[#allocation7] ss:$0 sm:$0xff]  ;;  %v544_v17 = vunpack.c.l.bf16 %v391_v5  ;;  %v762_v34 = vld [vmem:[#allocation11] ss:$0 sm:$0xff]  ;;  %v763_v36 = vld [vmem:[#allocation13] ss:$0 sm:$0xff] }
  0xd7   : > { %778 = vmatprep.subr.bf16.mxu0 %v1234_v0  ;;  %786 = vmatprep.subr.bf16.mxu1 %v1234_v0  ;;  %s594_s20 = sshll.u32 %s389_s9, 4  ;;  %vm577_vm3 = vcmask 257024   ;;  %s1649_s7 = sld [smem:[#allocation21_spill]]  ;;  %s1572_s20 = int_to_ptr.vmem [resolvable:$true] %s594_s20 }
  0xd8   : > { %s580_s13 = scalar_lea.sflag [#allocation4], %s1539_s1  ;;  %s1129_s22 = scalar_lea.vmem %s1572_s20, 64 }
  0xd9   : > { %p1130_p2 = scmp.ne.s32.totalorder %s1572_s20, %s1129_s22  ;;  %p1650_p9 = scmp.ne.s32.totalorder %s1644_s21, 0 }
  0xda   : > { %779 = vmatpush3.bf16.msra.mxu0 %v924_v2  ;;  %787 = vmatpush3.bf16.msra.mxu1 %v926_v4  ;;  %s1236_s27 = smov [#allocation14]  }
  0xdb   : > { %788 = vmatprep.subr.bf16.mxu1 %v1234_v0  ;;  %p1131_p10 = pnand %p1130_p2, %p1650_p9  ;;  %s1133_s11 = sshll.u32 %s1236_s27, 4  ;;  %s1134_s11 = int_to_ptr.vmem [resolvable:$false] %s1133_s11 }
  0xdc   : > { %s1135_s19 = scalar_lea.vmem %s1134_s11, 128  ;;  %p1136_p0 = scmp.lt.s32.totalorder %s1572_s20, %s1134_s11 }
  0xdd   : > { %781 = vmatmul.mubr.msk.bf16.vlgmr.msra.gmra.mrb[0].mxu0 %vm415_vm1, %v391_v5  ;;  %s1570_s18 = scalar_lea.hbm %s1649_s7, %s765_s8  ;;  %p1132_p1 = pneg %p1131_p10 }
  0xde   : > { %789 = vmatpush3.bf16.msra.mxu1 %v927_v6  ;;  %p1137_p7 = scmp.lt.s32.totalorder %s1135_s19, %s1129_s22 }
  0xdf   : > { %790 = vmatprep.subr.bf16.mxu1 %v1234_v0 }
  0xe0   : > { %p1138_p5 = por %p1137_p7, %p1136_p0 }
  0xe2   : > { %791 = vmatpush3.bf16.msra.mxu1 %v928_v7  ;;  %p1139_p8 = pnand %p1138_p5, %p1132_p1 }
 0x1b0   : > { %v453_v9 = vpop.f32.mrb[0].mxu0 }
 0x1b1   : > { %v454_v10 = vadd.f32 %v752_v8, %v453_v9  ;;  %v782_v11 = vpop.f32.mrb[1].mxu0 }
 0x1b2   : > { %v456_v12 = vpop.f32.mrb[2].mxu0 }
 0x1b3   : > { %v459_v13 = vmax.f32 %v454_v10, 0.0  ;;  %v783_v14 = vpop.f32.mrb[3].mxu0 }
 0x1b5   : > { %v460_v15 = vpack.c.bf16 %v459_v13, %v459_v13 }
 0x1b7   : > { %793 = vmatmul.mubr.msk.bf16.vlgmr.msra.gmra.mrb[0].mxu1 %vm500_vm2, %v460_v15 }
 0x28a   : > { %v538_v18 = vpop.f32.mrb[0].mxu1 }
 0x28b   : > { %v539_v19 = vadd.f32 %v756_v16, %v538_v18  ;;  %v794_v20 = vpop.f32.mrb[1].mxu1 }
 0x28c   : > { %v541_v21 = vpop.f32.mrb[2].mxu1 }
 0x28d   : > { %v795_v22 = vpop.f32.mrb[3].mxu1  ;;  %v545_v23 = vadd.f32 %v544_v17, %v539_v19 }
 0x28f   : > { %v546_v24 = vsel %vm415_vm1, %v545_v23, 0.0 }
 0x290   : > { %547 = vadd.xlane.f32.xlu0 %v546_v24 }
 0x31d   : > { %v548_v25 = vpop.xlane.xlu0 %547 }
 0x31e   : > { %v550_v26 = vmul.f32 0.03125, %v548_v25 }
 0x320   : > { %v551_v27 = vsub.f32 %v545_v23, %v550_v26 }
 0x322   : > { %v552_v28 = vmul.f32 %v551_v27, %v551_v27 }
 0x324   : > { %v553_v29 = vsel %vm415_vm1, %v552_v28, 0.0 }
 0x325   : > { %554 = vadd.xlane.f32.xlu0 %v553_v29 }
 0x3b2   : > { %v555_v30 = vpop.xlane.xlu0 %554 }
 0x3b3   : > { %v556_v31 = vmul.f32 0.03125, %v555_v30 }
 0x3b5   : > { %v557_v32 = vadd.f32 1e-05, %v556_v31 }
 0x3b7   : > { %929 = vrsqrt.f32 %v557_v32 }
 0x3c1   : > { %v930_v33 = vpop.eup %929 }
 0x3c2   : > { %v559_v35 = vmul.f32 %v930_v33, %v551_v27 }
 0x3c4   : > { %v567_v37 = vmul.f32 %v762_v34, %v559_v35 }
 0x3c6   : > { %v575_v38 = vadd.f32 %v763_v36, %v567_v37 }
 0x3c8   : > { %v576_v39 = vpack.c.bf16 %v575_v38, %v575_v38 }
 0x3ca   : > { %578 = vst.msk [vmem:[%s389_s9] sm:$0xf] %vm577_vm3, %v576_v39 }
 0x3cb   : > { %1142 = shalt.err (!%p1139_p8)
}
 0x3cc   : > { %s1143_s1 = scalar_lea.hbm %s1570_s18, 64  ;;  %s1147_s30 = scalar_lea.hbm %s1649_s7, 128 }
 0x3cd   : > { %p1144_p3 = scmp.ne.s32.totalorder %s1570_s18, %s1143_s1  ;;  %p1148_p13 = scmp.lt.u32.totalorder %s1570_s18, %s1649_s7 }
 0x3ce   : > { %p1149_p12 = scmp.lt.u32.totalorder %s1147_s30, %s1143_s1  ;;  %p1151_p2 = scmp.lt.u32.totalorder %s1143_s1, %s1570_s18 }
 0x3cf   : > { %p1145_p11 = pnand %p1144_p3, %p1650_p9 }
 0x3d0   : > { %p1150_p4 = por %p1149_p12, %p1148_p13 }
 0x3d1   : > { %p1146_p6 = pneg %p1145_p11 }
 0x3d2   : > { %p1152_p10 = por %p1151_p2, %p1150_p4 }
 0x3d4   : > { %p1153_p1 = pnand %p1152_p10, %p1146_p6 }
 0x3d6   : > { %1156 = shalt.err (!%p1153_p1)
}
 0x3d7   : > { %822 = dma.vmem_to_hbm [thread:$0]  (%p1650_p9), %s1572_s20, 64, %s1570_s18, %s580_s13  }
 0x3d8 PF: > { %s606_s16 = sand.u32 1, %s1203_s24   ;;  %p1651_p0 = scmp.ne.s32.totalorder %s1645_s10, 0 }
 0x3d9   : > { %p1652_p7 = scmp.ge.s32.totalorder %s1223_s29, 2  ;;  %s607_s12 = scalar_lea.sflag [#allocation4], %s606_s16 }
 0x3db   : > { %p848_p5 = pnand %p1652_p7, %p1651_p0 }
 0x3dd   : > { %1198 = dma.done.wait (!%p848_p5), %s607_s12, 64  }
 0x3de   : > { %1200 = vsyncadd (!%p848_p5), %s607_s12, 4294967232  ;;  %s26_s29 = sadd.s32 1, %s1223_s29   ;;  %s1653_s24 = smov %s1207_s25 }
 0x3df   : > { %p23_p8 = scmp.ge.s32.totalorder %s26_s29, 4   ;;  %s1654_s25 = smov %s1211_s26 }
 0x3e0   : > { %s1655_s26 = smov %s1489_s23  ;;  %s1656_s27 = smov %s1219_s28 }
 0x3e1   : > { %s1657_s28 = smov %s1659_s15  ;;  %25 = sbr.rel (!%p23_p8) target bundleno = 12 (0xc), region = 117 }
 0x3e8   :  { %612 = vsyncpa [#allocation3], 1 }
 0x3e9   :  { %614 = vsyncpa [#allocation3 + $0x1], 1 }
 0x3ea   :  { %615 = vsyncpa [#allocation6], 1 }
 0x3eb   :  { %616 = vsyncpa [#allocation9], 1 }
 0x3ec   :  { %617 = vsyncpa [#allocation12], 1 }
 0x3ed   :  { %618 = vsyncpa [#allocation4], 1 }
 0x3ee   :  { %620 = vsyncpa [#allocation4 + $0x1], 1 }

// kernel: _lambda_.6
= control target key start
LH: loop header
LB: loop body
LE: loop exit
PB: predicated region body
PF: predicated region fallthrough
CT: control target
= control target key end

     0   :  { %s2741_s0 = inlined_call_operand.hbm [shape: bf16[2,8,32], index: 0, kind: input, shape index: {}, may-alias: {0,1}]   ;;  %s2742_s1 = inlined_call_operand.hbm [shape: bf16[2,8,32], index: 1, kind: input, shape index: {}, may-alias: {0,1}]   ;;  %s2743_s2 = inlined_call_operand.hbm [shape: f32[2,1,8], index: 2, kind: input, shape index: {}]   ;;  %s2744_s3 = inlined_call_operand.hbm [shape: bf16[32,96], index: 3, kind: input, shape index: {}]   ;;  %s2745_s4 = inlined_call_operand.hbm [shape: f32[1,96], index: 4, kind: input, shape index: {}]   ;;  %s2746_s5 = inlined_call_operand.hbm [shape: bf16[32,32], index: 5, kind: input, shape index: {}]   ;;  %s2747_s6 = inlined_call_operand.hbm [shape: f32[1,32], index: 6, kind: input, shape index: {}]   ;;  %s2748_s7 = inlined_call_operand.hbm [shape: f32[1,32], index: 7, kind: input, shape index: {}]   ;;  %s2749_s8 = inlined_call_operand.hbm [shape: f32[1,32], index: 8, kind: input, shape index: {}]   ;;  %s2750_s9 = inlined_call_operand.hbm [shape: bf16[2,8,32], index: 9, kind: output, shape index: {}]  }
   0x1   :  { %2771 = sst [smem:[#allocation30_spill]] %s2742_s1 }
   0x2   :  { %2772 = sst [smem:[#allocation31_spill]] %s2744_s3 }
   0x3   :  { %2773 = sst [smem:[#allocation32_spill]] %s2746_s5 }
   0x4   :  { %2774 = sst [smem:[#allocation33_spill]] %s2748_s7 }
   0x5   :  { %2775 = sst [smem:[#allocation34_spill]] %s2750_s9 }
   0x6   :  { %14 = vsyncpa [#allocation3], 0 }
   0x7   :  { %16 = vsyncpa [#allocation3 + $0x1], 0 }
   0x8   :  { %17 = vsyncpa [#allocation6], 0 }
   0x9   :  { %19 = vsyncpa [#allocation6 + $0x1], 0 }
   0xa   :  { %20 = vsyncpa [#allocation9], 0 }
   0xb   :  { %21 = vsyncpa [#allocation12], 0 }
   0xc   :  { %22 = vsyncpa [#allocation15], 0 }
   0xd   :  { %23 = vsyncpa [#allocation4], 0 }
   0xe   :  { %25 = vsyncpa [#allocation4 + $0x1], 0  ;;  %s2218_s30 = smov 0   ;;  %s2220_s10 = smov 0  }
   0xf   :  { %s2222_s11 = smov 0   ;;  %s2224_s12 = smov 0  }
  0x10   :  { %s2226_s13 = smov 0   ;;  %s2228_s14 = smov 0  }
  0x11 LB: > { %2776 = sst [smem:[#allocation24_spill]] %s2129_s11  ;;  %s2249_s15 = sadd.s32 4294967295, %s2141_s14   ;;  %s2141_s14 = sphi %s2228_s14, %s31_s14   ;;  %s2137_s13 = sphi %s2226_s13, %s2825_s13   ;;  %s2133_s12 = sphi %s2224_s12, %s2824_s12   ;;  %s2129_s11 = sphi %s2222_s11, %s2823_s11   ;;  %s2125_s10 = sphi %s2220_s10, %s2822_s10   ;;  %s2121_s30 = sphi %s2218_s30, %s2821_s30  }
  0x12   : > { %2777 = sst [smem:[#allocation25_spill]] %s2133_s12  ;;  %p1464_p0 = scmp.ge.s32.totalorder %s2141_s14, 1 }
  0x13   : > { %2778 = sst [smem:[#allocation26_spill]] %s2141_s14  ;;  %p2753_p1 = scmp.eq.s32.totalorder %s2249_s15, 0 }
  0x14   : > { %p282_p2 = scmp.lt.s32.totalorder %s2141_s14, 3  ;;  %s2143_s17 = smov [#allocation8]  }
  0x15   : > { %s294_s18 = sshll.u32 %s2143_s17, 4  ;;  %s2144_s20 = smov [#allocation11]   ;;  %s2258_s18 = int_to_ptr.vmem [resolvable:$true] %s294_s18 }
  0x16   : > { %p2254_p3 = pnand %p1464_p0, %p282_p2  ;;  %s318_s21 = sshll.u32 %s2144_s20, 4  ;;  %s2269_s21 = int_to_ptr.vmem [resolvable:$true] %s318_s21 }
  0x17   : > { %s2145_s22 = smov [#allocation14]   ;;  %s2782_s3 = sld [smem:[#allocation31_spill]] }
  0x18   : > { %s2779_s16 = scalar_select %p2254_p3, 1, 0 }
  0x19   : > { %p1649_p4 = pneg %p2254_p3  ;;  %s2271_s23 = sshll.u32 %s2145_s22, 4  ;;  %s344_s23 = int_to_ptr.vmem [resolvable:$true] %s2271_s23 }
  0x1a   : > { %2780 = sst [smem:[#allocation27_spill]] %s2779_s16 }
  0x1b   : > { %p2265_p6 = pnand %p1649_p4, %p2753_p1 }
  0x1d   : > { %s2781_s19 = scalar_select %p2265_p6, 1, 0 }
  0x1e   : > { %s1785_s26 = scalar_lea.hbm %s2782_s3, 256  ;;  %p2281_p8 = pneg %p2265_p6 }
  0x1f   : > { %p1786_p7 = scmp.ne.s32.totalorder %s2782_s3, %s1785_s26  ;;  %p1792_p11 = scmp.lt.u32.totalorder %s1785_s26, %s2782_s3 }
  0x20   : > { %s2783_s29 = scalar_select %p2281_p8, 1, 0 }
  0x21   : > { %p1788_p9 = pnand %p2281_p8, %p1786_p7 }
  0x23   : > { %p1789_p10 = pneg %p1788_p9 }
  0x25   : > { %p1794_p12 = pnand %p1792_p11, %p1789_p10 }
  0x27   : > { %1797 = shalt.err (!%p1794_p12)
}
  0x28   : > { %s1798_s22 = scalar_lea.vmem %s2258_s18, 256  ;;  %p1806_p4 = scmp.lt.s32.totalorder %s2258_s18, %s2258_s18 }
  0x29   : > { %p1799_p13 = scmp.ne.s32.totalorder %s2258_s18, %s1798_s22  ;;  %p1807_p5 = scmp.lt.s32.totalorder %s1798_s22, %s1798_s22 }
  0x2b   : > { %p1801_p0 = pnand %p1799_p13, %p2281_p8  ;;  %p1808_p7 = por %p1807_p5, %p1806_p4 }
  0x2d   : > { %p1802_p2 = pneg %p1801_p0 }
  0x2f   : > { %p1809_p9 = pnand %p1808_p7, %p1802_p2 }
  0x31   : > { %1812 = shalt.err (!%p1809_p9)
}
  0x32   : > { %s2146_s24 = smov 64   ;;  %s2147_s25 = smov 4  }
  0x33   : > { %1652 = dma.hbm_to_vmem [thread:$0]  (!%p2265_p6), %s2782_s3, 256, %s2258_s18, [#allocation9], %s2146_s24, %s2146_s24, %s2147_s25  }
  0x34   : > { %s2784_s5 = sld [smem:[#allocation32_spill]] }
  0x3a   : > { %s1813_s20 = scalar_lea.hbm %s2784_s5, 256 }
  0x3b   : > { %p1814_p5 = scmp.ne.s32.totalorder %s2784_s5, %s1813_s20  ;;  %p1820_p12 = scmp.lt.u32.totalorder %s1813_s20, %s2784_s5 }
  0x3d   : > { %p1816_p10 = pnand %p1814_p5, %p2281_p8 }
  0x3f   : > { %p1817_p11 = pneg %p1816_p10 }
  0x41   : > { %p1822_p13 = pnand %p1820_p12, %p1817_p11 }
  0x43   : > { %1825 = shalt.err (!%p1822_p13)
}
  0x44   : > { %s1826_s18 = scalar_lea.vmem %s2269_s21, 256  ;;  %p1834_p7 = scmp.lt.s32.totalorder %s2269_s21, %s2269_s21 }
  0x45   : > { %p1827_p0 = scmp.ne.s32.totalorder %s2269_s21, %s1826_s18  ;;  %p1835_p9 = scmp.lt.s32.totalorder %s1826_s18, %s1826_s18 }
  0x47   : > { %p1829_p2 = pnand %p1827_p0, %p2281_p8  ;;  %p1836_p5 = por %p1835_p9, %p1834_p7 }
  0x49   : > { %p1830_p4 = pneg %p1829_p2 }
  0x4b   : > { %p1837_p10 = pnand %p1836_p5, %p1830_p4 }
  0x4d   : > { %1840 = shalt.err (!%p1837_p10)
}
  0x4e   : > { %1658 = dma.hbm_to_vmem [thread:$0]  (!%p2265_p6), %s2784_s5, 256, %s2269_s21, [#allocation12], %s2146_s24, %s2146_s24, %s2147_s25  }
  0x4f   : > { %s2785_s7 = sld [smem:[#allocation33_spill]] }
  0x55   : > { %s1841_s27 = scalar_lea.hbm %s2785_s7, 16 }
  0x56   : > { %p1842_p11 = scmp.ne.s32.totalorder %s2785_s7, %s1841_s27  ;;  %p1848_p0 = scmp.lt.u32.totalorder %s1841_s27, %s2785_s7 }
  0x58   : > { %p1844_p12 = pnand %p1842_p11, %p2281_p8 }
  0x5a   : > { %p1845_p13 = pneg %p1844_p12 }
  0x5c   : > { %p1850_p2 = pnand %p1848_p0, %p1845_p13 }
  0x5e   : > { %1853 = shalt.err (!%p1850_p2)
}
  0x5f   : > { %s1854_s18 = scalar_lea.vmem %s344_s23, 16  ;;  %s1861_s21 = scalar_lea.vmem %s344_s23, 32 }
  0x60   : > { %p1855_p4 = scmp.ne.s32.totalorder %s344_s23, %s1854_s18  ;;  %p1862_p5 = scmp.lt.s32.totalorder %s344_s23, %s344_s23 }
  0x61   : > { %p1863_p10 = scmp.lt.s32.totalorder %s1861_s21, %s1854_s18 }
  0x62   : > { %p1857_p7 = pnand %p1855_p4, %p2281_p8 }
  0x63   : > { %p1864_p1 = por %p1863_p10, %p1862_p5 }
  0x64   : > { %p1858_p9 = pneg %p1857_p7 }
  0x66   : > { %p1865_p3 = pnand %p1864_p1, %p1858_p9 }
  0x68   : > { %1868 = shalt.err (!%p1865_p3)
}
  0x69   : > { %1664 = dma.hbm_to_vmem [thread:$0]  (!%p2265_p6), %s2785_s7, 16, %s344_s23, [#allocation15]  }
  0x6a   : > { %s1463_s9 = sadd.s32 4294967294, %s2141_s14   ;;  %s43_s12 = sadd.s32 1, %s2137_s13 }
  0x6b   : > { %s52_s16 = sadd.s32 1, %s2129_s11  ;;  %p45_p1 = scmp.ge.s32.totalorder %s43_s12, 2 }
  0x6c   : > { %p59_p3 = scmp.ne.s32.totalorder %s2129_s11, %s2125_s10  ;;  %p60_p11 = scmp.eq.s32.totalorder %s2141_s14, 0 }
  0x6d   : > { %p65_p12 = scmp.ne.s32.totalorder %s2125_s10, %s2121_s30  ;;  %s2827_s12 = smov (%p45_p1, %s43_s12), 0 }
  0x6e   : > { %2786 = sst [smem:[#allocation28_spill]] %s2827_s12  ;;  %p2354_p13 = por %p60_p11, %p59_p3 }
  0x6f   : > { %p2788_p0 = scmp.eq.s32.totalorder %s2249_s15, 0  ;;  %s47_s27 = ssub.s32 %s2137_s13, %s2827_s12 }
  0x70   : > { %p269_p4 = scmp.eq.s32.totalorder %s2249_s15, 1  ;;  %p50_p7 = scmp.eq.s32.totalorder %s47_s27, 0 }
  0x71   : > { %p2360_p2 = por %p2788_p0, %p65_p12  ;;  %p275_p9 = scmp.eq.s32.totalorder %s1463_s9, 1 }
  0x72   : > { %p2367_p5 = por %p269_p4, %p59_p3  ;;  %p1688_p10 = scmp.lt.s32.totalorder %s2141_s14, 2 }
  0x73   : > { %s2789_s23 = scalar_select %p2360_p2, 1, 0 }
  0x74   : > { %s2790_s28 = scalar_select %p2367_p5, 1, 0 }
  0x75   : > { %s2373_s17 = scalar_select %p50_p7, %s2129_s11, %s52_s16  }
  0x76   : > { %p2375_p1 = por %p275_p9, %p65_p12  ;;  %s2380_s22 = sand.u32 1, %s2129_s11  }
  0x77   : > { %2791 = sst [smem:[#allocation29_spill]] %s2373_s17  ;;  %s2756_s18 = sshll.u32 %s2380_s22, 2 }
  0x78   : > { %s2792_s20 = scalar_select %p2375_p1, 1, 0 }
  0x79   : > { %s2757_s21 = sshll.u32 %s2137_s13, 6  ;;  %p2386_p11 = pnand %p1688_p10, %p2354_p13 }
  0x7a   : > { %s384_s25 = sand.u32 1, %s2141_s14   ;;  %s2794_s1 = sld [smem:[#allocation30_spill]] }
  0x7b   : > { %s2793_s24 = scalar_select %p2386_p11, 1, 0 }
  0x7c   : > { %s388_s3 = scalar_lea.vmem [#allocation5], %s2756_s18  ;;  %s2148_s26 = smov [#allocation10]  }
  0x7d   : > { %s395_s5 = sshll.u32 %s388_s3, 4  ;;  %s2402_s7 = sshll.u32 %s2148_s26, 4  ;;  %s2400_s5 = int_to_ptr.vmem [resolvable:$true] %s395_s5  ;;  %s309_s7 = int_to_ptr.vmem [resolvable:$true] %s2402_s7 }
  0x7e   : > { %s2404_s12 = scalar_lea.sflag [#allocation6], %s384_s25  ;;  %p2410_p12 = pneg %p2386_p11 }
  0x80   : > { %s2396_s27 = scalar_lea.hbm %s2794_s1, %s2757_s21  ;;  %s1874_s18 = scalar_lea.hbm %s2794_s1, 128 }
  0x81   : > { %s1869_s17 = scalar_lea.hbm %s2396_s27, 64  ;;  %p1875_p4 = scmp.lt.u32.totalorder %s2396_s27, %s2794_s1 }
  0x82   : > { %p1870_p3 = scmp.ne.s32.totalorder %s2396_s27, %s1869_s17  ;;  %p1876_p7 = scmp.lt.u32.totalorder %s1874_s18, %s1869_s17 }
  0x83   : > { %s2795_s9 = scalar_select %p2410_p12, 1, 0 }
  0x84   : > { %p1872_p13 = pnand %p2410_p12, %p1870_p3  ;;  %p1877_p9 = por %p1876_p7, %p1875_p4 }
  0x85   : > { %p1878_p10 = scmp.lt.u32.totalorder %s1869_s17, %s2396_s27 }
  0x86   : > { %p1873_p0 = pneg %p1872_p13 }
  0x87   : > { %p1879_p1 = por %p1878_p10, %p1877_p9 }
  0x89   : > { %p1880_p5 = pnand %p1879_p1, %p1873_p0 }
  0x8b   : > { %1883 = shalt.err (!%p1880_p5)
}
  0x8c   : > { %s1884_s25 = scalar_lea.vmem %s2400_s5, 64  ;;  %s2149_s16 = smov [#allocation5]  }
  0x8d   : > { %p1885_p3 = scmp.ne.s32.totalorder %s2400_s5, %s1884_s25  ;;  %s1889_s3 = sshll.u32 %s2149_s16, 4  ;;  %s1890_s3 = int_to_ptr.vmem [resolvable:$false] %s1889_s3 }
  0x8e   : > { %s1891_s21 = scalar_lea.vmem %s1890_s3, 128  ;;  %p1892_p6 = scmp.lt.s32.totalorder %s2400_s5, %s1890_s3 }
  0x8f   : > { %p1887_p13 = pnand %p1885_p3, %p2410_p12  ;;  %p1893_p8 = scmp.lt.s32.totalorder %s1891_s21, %s1884_s25 }
  0x91   : > { %p1888_p2 = pneg %p1887_p13  ;;  %p1894_p4 = por %p1893_p8, %p1892_p6 }
  0x93   : > { %p1895_p7 = pnand %p1894_p4, %p1888_p2 }
  0x95   : > { %1898 = shalt.err (!%p1895_p7)
}
  0x96   : > { %1674 = dma.hbm_to_vmem [thread:$0]  (!%p2386_p11), %s2396_s27, 64, %s2400_s5, %s2404_s12  }
  0x97   : > { %s1899_s26 = scalar_lea.hbm %s2745_s4, 16  ;;  %p2796_p6 = scmp.ne.s32.totalorder %s2783_s29, 0 }
  0x98   : > { %p1900_p5 = scmp.ne.s32.totalorder %s2745_s4, %s1899_s26  ;;  %p1906_p1 = scmp.lt.u32.totalorder %s1899_s26, %s2745_s4 }
  0x9a   : > { %p1902_p8 = pnand %p1900_p5, %p2796_p6 }
  0x9c   : > { %p1903_p2 = pneg %p1902_p8 }
  0x9e   : > { %p1908_p0 = pnand %p1906_p1, %p1903_p2 }
  0xa0   : > { %1911 = shalt.err (!%p1908_p0)
}
  0xa1   : > { %s1912_s21 = scalar_lea.vmem %s309_s7, 16  ;;  %s1919_s5 = scalar_lea.vmem %s309_s7, 32 }
  0xa2   : > { %p1913_p9 = scmp.ne.s32.totalorder %s309_s7, %s1912_s21  ;;  %p1920_p13 = scmp.lt.s32.totalorder %s309_s7, %s309_s7 }
  0xa3   : > { %p1921_p4 = scmp.lt.s32.totalorder %s1919_s5, %s1912_s21 }
  0xa4   : > { %p1915_p10 = pnand %p1913_p9, %p2796_p6 }
  0xa5   : > { %p1922_p7 = por %p1921_p4, %p1920_p13 }
  0xa6   : > { %p1916_p3 = pneg %p1915_p10 }
  0xa8   : > { %p1923_p11 = pnand %p1922_p7, %p1916_p3 }
  0xaa   : > { %1926 = shalt.err (!%p1923_p11)
}
  0xab   : > { %p2797_p5 = scmp.ne.s32.totalorder %s2781_s19, 0  ;;  %s2150_s17 = smov [#allocation13]  }
  0xac   : > { %s332_s18 = sshll.u32 %s2150_s17, 4  ;;  %s2151_s26 = smov [#allocation16]   ;;  %s333_s18 = int_to_ptr.vmem [resolvable:$true] %s332_s18 }
  0xad   : > { %1655 = dma.hbm_to_vmem [thread:$0]  (!%p2797_p5), %s2745_s4, 16, %s309_s7, [#allocation9]  }
  0xae   : > { %s354_s16 = sshll.u32 %s2151_s26, 4  ;;  %s1927_s11 = scalar_lea.hbm %s2747_s6, 16  ;;  %s355_s16 = int_to_ptr.vmem [resolvable:$true] %s354_s16 }
  0xaf   : > { %p1928_p11 = scmp.ne.s32.totalorder %s2747_s6, %s1927_s11  ;;  %p1934_p1 = scmp.lt.u32.totalorder %s1927_s11, %s2747_s6 }
  0xb1   : > { %p1930_p8 = pnand %p1928_p11, %p2796_p6 }
  0xb3   : > { %p1931_p2 = pneg %p1930_p8 }
  0xb5   : > { %p1936_p0 = pnand %p1934_p1, %p1931_p2 }
  0xb7   : > { %1939 = shalt.err (!%p1936_p0)
}
  0xb8   : > { %s1940_s7 = scalar_lea.vmem %s333_s18, 16  ;;  %s1947_s27 = scalar_lea.vmem %s333_s18, 32 }
  0xb9   : > { %p1941_p9 = scmp.ne.s32.totalorder %s333_s18, %s1940_s7  ;;  %p1948_p13 = scmp.lt.s32.totalorder %s333_s18, %s333_s18 }
  0xba   : > { %p1949_p4 = scmp.lt.s32.totalorder %s1947_s27, %s1940_s7 }
  0xbb   : > { %p1943_p10 = pnand %p1941_p9, %p2796_p6 }
  0xbc   : > { %p1950_p7 = por %p1949_p4, %p1948_p13 }
  0xbd   : > { %p1944_p3 = pneg %p1943_p10 }
  0xbf   : > { %p1951_p12 = pnand %p1950_p7, %p1944_p3 }
  0xc1   : > { %1954 = shalt.err (!%p1951_p12)
}
  0xc2   : > { %1661 = dma.hbm_to_vmem [thread:$0]  (!%p2797_p5), %s2747_s6, 16, %s333_s18, [#allocation12]  }
  0xc3   : > { %s1955_s25 = scalar_lea.hbm %s2749_s8, 16 }
  0xc4   : > { %p1956_p11 = scmp.ne.s32.totalorder %s2749_s8, %s1955_s25  ;;  %p1962_p12 = scmp.lt.u32.totalorder %s1955_s25, %s2749_s8 }
  0xc6   : > { %p1958_p8 = pnand %p1956_p11, %p2796_p6 }
  0xc8   : > { %p1959_p2 = pneg %p1958_p8 }
  0xca   : > { %p1964_p1 = pnand %p1962_p12, %p1959_p2 }
  0xcc   : > { %1967 = shalt.err (!%p1964_p1)
}
  0xcd   : > { %s1968_s7 = scalar_lea.vmem %s355_s16, 16  ;;  %s1975_s18 = scalar_lea.vmem %s355_s16, 32 }
  0xce   : > { %p1969_p0 = scmp.ne.s32.totalorder %s355_s16, %s1968_s7  ;;  %p1976_p3 = scmp.lt.s32.totalorder %s355_s16, %s355_s16 }
  0xcf   : > { %p1977_p13 = scmp.lt.s32.totalorder %s1975_s18, %s1968_s7 }
  0xd0   : > { %p1971_p9 = pnand %p1969_p0, %p2796_p6 }
  0xd1   : > { %p1978_p4 = por %p1977_p13, %p1976_p3 }
  0xd2   : > { %p1972_p10 = pneg %p1971_p9 }
  0xd4   : > { %p1979_p7 = pnand %p1978_p4, %p1972_p10 }
  0xd6   : > { %1982 = shalt.err (!%p1979_p7)
}
  0xd7   : > { %1667 = dma.hbm_to_vmem [thread:$0]  (!%p2797_p5), %s2749_s8, 16, %s355_s16, [#allocation15]  }
  0xd8   : > { %s2798_s29 = sshll.u32 %s2137_s13, 6  ;;  %s2799_s25 = sshll.u32 %s2380_s22, 2 }
  0xd9   : > { %s2494_s14 = scalar_lea.hbm %s2741_s0, %s2798_s29  ;;  %s369_s19 = scalar_lea.vmem [#allocation2], %s2799_s25 }
  0xda   : > { %s377_s3 = sshll.u32 %s369_s19, 4  ;;  %s1476_s21 = sshll.u32 %s2137_s13, 4  ;;  %s2498_s3 = int_to_ptr.vmem [resolvable:$true] %s377_s3 }
  0xdb   : > { %s366_s5 = scalar_lea.sflag [#allocation3], %s2380_s22  ;;  %s1983_s1 = scalar_lea.hbm %s2494_s14, 64 }
  0xdc   : > { %p1984_p6 = scmp.ne.s32.totalorder %s2494_s14, %s1983_s1  ;;  %p2800_p5 = scmp.ne.s32.totalorder %s2795_s9, 0 }
  0xdd   : > { %s1988_s18 = scalar_lea.hbm %s2741_s0, 128  ;;  %p1989_p2 = scmp.lt.u32.totalorder %s2494_s14, %s2741_s0 }
  0xde   : > { %p1986_p11 = pnand %p1984_p6, %p2800_p5  ;;  %p1990_p12 = scmp.lt.u32.totalorder %s1988_s18, %s1983_s1 }
  0xdf   : > { %p1992_p0 = scmp.lt.u32.totalorder %s1983_s1, %s2494_s14 }
  0xe0   : > { %p1987_p8 = pneg %p1986_p11  ;;  %p1991_p1 = por %p1990_p12, %p1989_p2 }
  0xe2   : > { %p1993_p9 = por %p1992_p0, %p1991_p1 }
  0xe4   : > { %p1994_p10 = pnand %p1993_p9, %p1987_p8 }
  0xe6   : > { %1997 = shalt.err (!%p1994_p10)
}
  0xe7   : > { %s1998_s29 = scalar_lea.vmem %s2498_s3, 64  ;;  %s2152_s26 = smov [#allocation2]  }
  0xe8   : > { %p1999_p3 = scmp.ne.s32.totalorder %s2498_s3, %s1998_s29  ;;  %s2003_s11 = sshll.u32 %s2152_s26, 4  ;;  %s2004_s11 = int_to_ptr.vmem [resolvable:$false] %s2003_s11 }
  0xe9   : > { %s2005_s25 = scalar_lea.vmem %s2004_s11, 128  ;;  %p2006_p7 = scmp.lt.s32.totalorder %s2498_s3, %s2004_s11 }
  0xea   : > { %p2001_p13 = pnand %p1999_p3, %p2800_p5  ;;  %p2007_p6 = scmp.lt.s32.totalorder %s2005_s25, %s1998_s29 }
  0xec   : > { %p2002_p4 = pneg %p2001_p13  ;;  %p2008_p11 = por %p2007_p6, %p2006_p7 }
  0xee   : > { %p2009_p2 = pnand %p2008_p11, %p2002_p4 }
  0xf0   : > { %2012 = shalt.err (!%p2009_p2)
}
  0xf1   : > { %p2801_p8 = scmp.ne.s32.totalorder %s2793_s24, 0  ;;  %s2528_s16 = scalar_lea.hbm %s2743_s2, %s1476_s21 }
  0xf2   : > { %s405_s7 = scalar_lea.vmem [#allocation7], %s2380_s22  ;;  %s2013_s27 = scalar_lea.hbm %s2528_s16, 16 }
  0xf3   : > { %1671 = dma.hbm_to_vmem [thread:$0]  (!%p2801_p8), %s2494_s14, 64, %s2498_s3, %s366_s5  }
  0xf4   : > { %s412_s18 = sshll.u32 %s405_s7, 4  ;;  %p2014_p12 = scmp.ne.s32.totalorder %s2528_s16, %s2013_s27  ;;  %s413_s18 = int_to_ptr.vmem [resolvable:$true] %s412_s18 }
  0xf5   : > { %s2018_s3 = scalar_lea.hbm %s2743_s2, 32  ;;  %p2019_p9 = scmp.lt.u32.totalorder %s2528_s16, %s2743_s2 }
  0xf6   : > { %p2016_p1 = pnand %p2014_p12, %p2800_p5  ;;  %p2020_p10 = scmp.lt.u32.totalorder %s2018_s3, %s2013_s27 }
  0xf7   : > { %p2022_p13 = scmp.lt.u32.totalorder %s2013_s27, %s2528_s16 }
  0xf8   : > { %p2017_p0 = pneg %p2016_p1  ;;  %p2021_p3 = por %p2020_p10, %p2019_p9 }
  0xfa   : > { %p2023_p4 = por %p2022_p13, %p2021_p3 }
  0xfc   : > { %p2024_p7 = pnand %p2023_p4, %p2017_p0 }
  0xfe   : > { %2027 = shalt.err (!%p2024_p7)
}
  0xff   : > { %s2028_s22 = scalar_lea.vmem %s413_s18, 16  ;;  %s2153_s21 = smov [#allocation7]  }
 0x100   : > { %p2029_p6 = scmp.ne.s32.totalorder %s413_s18, %s2028_s22  ;;  %s2033_s26 = sshll.u32 %s2153_s21, 4  ;;  %s2034_s26 = int_to_ptr.vmem [resolvable:$false] %s2033_s26 }
 0x101   : > { %s2035_s11 = scalar_lea.vmem %s2034_s26, 32  ;;  %p2036_p12 = scmp.lt.s32.totalorder %s413_s18, %s2034_s26 }
 0x102   : > { %p2031_p11 = pnand %p2029_p6, %p2800_p5  ;;  %p2037_p1 = scmp.lt.s32.totalorder %s2035_s11, %s2028_s22 }
 0x104   : > { %p2032_p2 = pneg %p2031_p11  ;;  %p2038_p8 = por %p2037_p1, %p2036_p12 }
 0x106   : > { %p2039_p9 = pnand %p2038_p8, %p2032_p2 }
 0x108   : > { %2042 = shalt.err (!%p2039_p9)
}
 0x109   : > { %p2802_p10 = scmp.ne.s32.totalorder %s2793_s24, 0  ;;  %s2803_s25 = sld [smem:[#allocation27_spill]] }
 0x10b   : > { %1677 = dma.hbm_to_vmem [thread:$0]  (!%p2802_p10), %s2528_s16, 16, %s413_s18, %s2404_s12  }
 0x10f   : > { %p2804_p0 = scmp.ne.s32.totalorder %s2803_s25, 0 }
 0x110   : > { %s2552_s9 = sand.u32 (!%p2804_p0), 1, %s2125_s10   ;;  %p2805_p5 = scmp.ne.s32.totalorder (!%p2804_p0), %s2789_s23, 0 }
 0x111   : > { %421 = sbr.rel (%p2804_p0) target bundleno = 3232 (0xca0), region = 56  ;;  %s1478_s19 = sshll.u32 (!%p2804_p0), %s2552_s9, 2 }
 0x112   : > { %s424_s1 = scalar_lea.sflag (!%p2804_p0), [#allocation3], %s2552_s9  ;;  %s427_s7 = scalar_lea.vmem (!%p2804_p0), [#allocation2], %s1478_s19 }
 0x118   : > { %2096 = dma.done.wait (%p2805_p5), %s424_s1, 64  }
 0x119   : > { %2098 = vsyncadd (%p2805_p5), %s424_s1, 4294967232  ;;  %s432_s12 = sand.u32 1, %s2249_s15  }
 0x11a   : > { %s433_s24 = scalar_lea.sflag [#allocation6], %s432_s12 }
 0x11b   : > { %2100 = dma.done.wait (%p2805_p5), %s433_s24, 80  }
 0x11c   : > { %2102 = vsyncadd (%p2805_p5), %s433_s24, 4294967216  ;;  %s444_s16 = scalar_lea.vmem [#allocation7], %s2552_s9  ;;  %p2806_p8 = scmp.eq.s32.totalorder %s2249_s15, 0 }
 0x11e   : > { %2104 = dma.done.wait (%p2806_p8), [#allocation9], 272   ;;  %p2807_p3 = pmov %p2806_p8 }
 0x120   : > { %2106 = vsyncadd (%p2807_p3), [#allocation9], 4294967024  ;;  %p2808_p13 = pmov %p2807_p3 }
 0x121   : > { %p2809_p4 = pmov %p2807_p3 }
 0x122   : > { %2108 = dma.done.wait (%p2808_p13), [#allocation12], 272  }
 0x123   : > { %2110 = vsyncadd (%p2809_p4), [#allocation12], 4294967024  ;;  %p2810_p7 = pmov %p2807_p3 }
 0x124   : > { %p2811_p6 = pmov %p2807_p3 }
 0x125   : > { %2112 = dma.done.wait (%p2810_p7), [#allocation15], 32  }
 0x126   : > { %2114 = vsyncadd (%p2811_p6), [#allocation15], 4294967264  ;;  %v2154_v0 = vmov 0.0   ;;  %vm2155_vm0 = vmmov 0   ;;  %v1765_v1 = vld [vmem:[#allocation8] sm:$0xff]   ;;  %v1766_v2 = vld [vmem:[#allocation8 + $0x8] sm:$0xff]  }
 0x127   : > { %1537 = vmatprep.subr.bf16.mxu0 %v2154_v0  ;;  %1541 = vmatprep.mubr.msk.bf16.mxu0 %vm2155_vm0, %v2154_v0  ;;  %v2587_v3 = vld [vmem:[%s427_s7] sm:$0xf]  ;;  %vm537_vm1 = vcmask 261120   ;;  %s2156_s15 = smov 96   ;;  %s2157_s23 = smov 120   ;;  %vm598_vm2 = vcmask 64512  }
 0x128   : > { %1545 = vmatprep.subr.bf16.mxu1 %v2154_v0  ;;  %1547 = vmatprep.mubr.msk.bf16.mxu1 %vm2155_vm0, %v2154_v0  ;;  %v1486_v4 = vld [vmem:[#allocation10] ss:$0 sm:$0xff]  ;;  %s2158_s18 = smov 88   ;;  %v2614_v18 = vld [vmem:[%s444_s16] ss:$0 sm:$0xff]  ;;  %s2159_s27 = smov 64  }
 0x129   : > { %1538 = vmatpush3.bf16.msra.mxu0 %v1765_v1  ;;  %s2160_s17 = smov 56   ;;  %s2161_s14 = smov 112   ;;  %vm662_vm3 = vcmask 1043456   ;;  %v585_v53 = vld [vmem:[#allocation11] sm:$0xf]  ;;  %vm1268_vm4 = vcmask 257024  }
 0x12a   : > { %1539 = vmatprep.subr.bf16.mxu0 %v2154_v0  ;;  %s2162_s3 = smov 80   ;;  %v869_v54 = vsel %vm662_vm3, %v585_v53, 0  ;;  %v586_v55 = vld [vmem:[#allocation11 + $0x4] sm:$0xf]  ;;  %s2163_s5 = smov 72  }
 0x12b   : > { %v823_v56 = vsel %vm662_vm3, %v586_v55, 0  ;;  %s2164_s29 = smov 104   ;;  %s2165_s22 = smov 48  }
 0x12c   : > { %s2166_s21 = smov 40   ;;  %s2812_s26 = sld [smem:[#allocation25_spill]] }
 0x12d   : > { %1540 = vmatpush3.bf16.msra.mxu0 %v1766_v2  ;;  %s511_s25 = scalar_lea.vmem [#allocation17], %s1478_s19  ;;  %s2813_s24 = sld [smem:[#allocation34_spill]] }
 0x12e   : > { %1551 = vmatprep.subr.bf16.mxu0 %v2154_v0  ;;  %s1285_s1 = sshll.u32 %s511_s25, 4  ;;  %p2814_p2 = scmp.ne.s32.totalorder %s2790_s28, 0  ;;  %s2694_s1 = int_to_ptr.vmem [resolvable:$true] %s1285_s1 }
 0x12f   : > { %s2167_s19 = smov [#allocation17]  }
 0x130   : > { %1542 = vmatmul.mubr.msk.bf16.vlgmr.msra.gmra.mrb[0].mxu0 %vm537_vm1, %v2587_v3 }
 0x131   : > { %1553 = vmatprep.mubr.msk.bf16.mxu0 %vm2155_vm0, %v2154_v0 }
 0x132   : > { %s1507_s11 = sshll.u32 %s2812_s26, 6 }
 0x133   : > { %s2692_s16 = scalar_lea.hbm %s2813_s24, %s1507_s11 }
 0x203   : > { %v575_v5 = vpop.f32.mrb[0].mxu0 }
 0x204   : > { %v576_v6 = vadd.f32 %v1486_v4, %v575_v5  ;;  %v1543_v7 = vpop.f32.mrb[1].mxu0 }
 0x205   : > { %v578_v8 = vpop.f32.mrb[2].mxu0 }
 0x206   : > { %v582_v9 = vmul.f32 0.35355338, %v576_v6  ;;  %v2594_v10 = vpack.c.bf16 %v576_v6, %v576_v6  ;;  %v1544_v11 = vpop.f32.mrb[3].mxu0 }
 0x208   : > { %v2596_v12 = vpack.c.bf16 %v582_v9, %v582_v9  ;;  %596 = vrot.lane.b32.xlu0 %v2594_v10, %s2156_s15  ;;  %s1271_s15 = scalar_lea.sflag [#allocation4], %s2552_s9 }
 0x20a   : > { %708 = vrot.lane.b32.xlu1 %v2596_v12, %s2157_s23  ;;  %s2043_s23 = scalar_lea.vmem %s2694_s1, 64 }
 0x20b   : > { %p2044_p11 = scmp.ne.s32.totalorder %s2694_s1, %s2043_s23 }
 0x20c   : > { %710 = vrot.lane.b32.xlu0 %v2594_v10, %s2158_s18  ;;  %s2047_s18 = sshll.u32 %s2167_s19, 4  ;;  %s2048_s18 = int_to_ptr.vmem [resolvable:$false] %s2047_s18 }
 0x20d   : > { %p2045_p12 = pnand %p2044_p11, %p2814_p2  ;;  %p2050_p9 = scmp.lt.s32.totalorder %s2694_s1, %s2048_s18 }
 0x20f   : > { %p2046_p1 = pneg %p2045_p12 }
 0x27a   : > { %v597_v13 = vpop.permute.xlu0 %596 }
 0x27b   : > { %v603_v14 = vsel %vm598_vm2, %v597_v13, 0 }
 0x27c   : > { %1546 = vmatpush3.bf16.xpose.msra.mxu1 %v603_v14  ;;  %v709_v17 = vpop.permute.xlu1 %708 }
 0x27d   : > { %1557 = vmatprep.subr.bf16.mxu1 %v2154_v0 }
 0x27e   : > { %v711_v15 = vpop.permute.xlu0 %710 }
 0x27f   : > { %v716_v16 = vsel %vm598_vm2, %v711_v15, 0 }
 0x283   : > { %1548 = vmatmul.mubr.msk.bf16.vlgmr.msra.gmra.mrb[0].mxu1 %vm598_vm2, %v2596_v12 }
 0x284   : > { %1558 = vmatpush3.bf16.xpose.msra.mxu1 %v716_v16  ;;  %1559 = vmatprep.mubr.msk.bf16.mxu1 %vm2155_vm0, %v2154_v0 }
 0x285   : > { %1569 = vmatprep.subr.bf16.mxu1 %v2154_v0 }
 0x28b   : > { %1560 = vmatmul.mubr.msk.bf16.vlgmr.msra.gmra.mrb[4].mxu1 %vm598_vm2, %v709_v17 }
 0x28c   : > { %1571 = vmatprep.mubr.msk.bf16.mxu1 %vm2155_vm0, %v2154_v0  ;;  %1570 = vmatpush3.bf16.msra.mxu1 %v823_v56 }
 0x28d   : > { %1581 = vmatprep.subr.bf16.mxu1 %v2154_v0 }
 0x356   : > { %v639_v19 = vpop.f32.mrb[0].mxu1 }
 0x357   : > { %v640_v20 = vadd.f32 %v2614_v18, %v639_v19  ;;  %v1549_v21 = vpop.f32.mrb[1].mxu1 }
 0x358   : > { %v642_v22 = vpop.f32.mrb[2].mxu1 }
 0x359   : > { %v1550_v23 = vpop.f32.mrb[3].mxu1  ;;  %v645_v24 = vsel %vm598_vm2, %v640_v20, -inf }
 0x35a   : > { %646 = vmax.xlane.f32.xlu1 %v645_v24 }
 0x35e   : > { %v752_v25 = vpop.f32.mrb[4].mxu1 }
 0x35f   : > { %v753_v26 = vadd.f32 %v2614_v18, %v752_v25  ;;  %v1561_v27 = vpop.f32.mrb[5].mxu1 }
 0x360   : > { %v755_v28 = vpop.f32.mrb[6].mxu1 }
 0x361   : > { %v1562_v29 = vpop.f32.mrb[7].mxu1  ;;  %v758_v30 = vsel %vm598_vm2, %v753_v26, -inf }
 0x362   : > { %759 = vmax.xlane.f32.xlu0 %v758_v30 }
 0x3e7   : > { %v647_v31 = vpop.xlane.xlu1 %646 }
 0x3e8   : > { %v648_v32 = vsub.f32 %v640_v20, %v647_v31 }
 0x3ea   : > { %v649_v33 = vmul.f32 1.442695, %v648_v32 }
 0x3ec   : > { %1767 = vpow2.f32 %v649_v33 }
 0x3ef   : > { %v760_v34 = vpop.xlane.xlu0 %759 }
 0x3f0   : > { %v761_v35 = vsub.f32 %v753_v26, %v760_v34 }
 0x3f2   : > { %v762_v36 = vmul.f32 1.442695, %v761_v35 }
 0x3f4   : > { %1769 = vpow2.f32 %v762_v36 }
 0x3f6   : > { %v1768_v37 = vpop.eup %1767 }
 0x3f7   : > { %v651_v38 = vsel %vm598_vm2, %v1768_v37, 0.0 }
 0x3f8   : > { %652 = vadd.xlane.f32.xlu0 %v651_v38 }
 0x3fe   : > { %v1770_v39 = vpop.eup %1769 }
 0x3ff   : > { %v764_v40 = vsel %vm598_vm2, %v1770_v39, 0.0 }
 0x400   : > { %765 = vadd.xlane.f32.xlu1 %v764_v40 }
 0x40e   : > { %657 = vrot.lane.b32.xlu0 %v2594_v10, %s2159_s27  ;;  %s2049_s27 = scalar_lea.vmem %s2048_s18, 128 }
 0x40f   : > { %p2051_p10 = scmp.lt.s32.totalorder %s2049_s27, %s2043_s23 }
 0x411   : > { %770 = vrot.lane.b32.xlu1 %v2594_v10, %s2160_s17  ;;  %p2052_p0 = por %p2051_p10, %p2050_p9 }
 0x412   : > { %911 = vrot.lane.b32.xlu0 %v2596_v12, %s2161_s14 }
 0x413   : > { %p2053_p5 = pnand %p2052_p0, %p2046_p1 }
 0x415   : > { %913 = vrot.lane.b32.xlu1 %v2594_v10, %s2162_s3 }
 0x485   : > { %v653_v41 = vpop.xlane.xlu0 %652 }
 0x486   : > { %1771 = vrcp.f32 %v653_v41 }
 0x489   : > { %v658_v42 = vpop.permute.xlu0 %657 }
 0x48a   : > { %v664_v43 = vsel %vm662_vm3, %v658_v42, 0 }
 0x48b   : > { %1552 = vmatpush3.bf16.msra.mxu0 %v664_v43 }
 0x48c   : > { %1563 = vmatprep.subr.bf16.mxu0 %v2154_v0 }
 0x48d   : > { %v766_v44 = vpop.xlane.xlu1 %765  ;;  %v912_v7 = vpop.permute.xlu0 %911 }
 0x48e   : > { %1773 = vrcp.f32 %v766_v44 }
 0x490   : > { %v1772_v45 = vpop.eup %1771 }
 0x491   : > { %v655_v46 = vmul.f32 %v1772_v45, %v1768_v37  ;;  %v771_v47 = vpop.permute.xlu1 %770 }
 0x492   : > { %v776_v49 = vsel %vm662_vm3, %v771_v47, 0 }
 0x493   : > { %v656_v48 = vpack.c.bf16 %v655_v46, %v655_v46 }
 0x495   : > { %1554 = vmatmul.mubr.msk.bf16.vlgmr.msra.gmra.mrb[4].mxu0 %vm598_vm2, %v656_v48  ;;  %v914_v62 = vpop.permute.xlu1 %913 }
 0x496   : > { %1564 = vmatpush3.bf16.msra.mxu0 %v776_v49  ;;  %1565 = vmatprep.mubr.msk.bf16.mxu0 %vm2155_vm0, %v2154_v0  ;;  %v919_v5 = vsel %vm598_vm2, %v914_v62, 0 }
 0x497   : > { %1575 = vmatprep.subr.bf16.mxu0 %v2154_v0 }
 0x498   : > { %v1774_v50 = vpop.eup %1773 }
 0x499   : > { %v768_v51 = vmul.f32 %v1774_v50, %v1770_v39  ;;  %v587_v39 = vld [vmem:[#allocation11 + $0x8] sm:$0xf] }
 0x49a   : > { %v1026_v40 = vsel %vm662_vm3, %v587_v39, 0 }
 0x49b   : > { %v769_v52 = vpack.c.bf16 %v768_v51, %v768_v51 }
 0x49d   : > { %1566 = vmatmul.mubr.msk.bf16.vlgmr.msra.gmra.mrb[8].mxu0 %vm598_vm2, %v769_v52 }
 0x49e   : > { %1577 = vmatprep.mubr.msk.bf16.mxu0 %vm2155_vm0, %v2154_v0  ;;  %1576 = vmatpush3.bf16.msra.mxu0 %v869_v54 }
 0x49f   : > { %1587 = vmatprep.subr.bf16.mxu0 %v2154_v0 }
 0x568   : > { %v700_v57 = vpop.f32.mrb[4].mxu0 }
 0x569   : > { %v706_v58 = vpack.c.bf16 %v700_v57, %v700_v57  ;;  %v1555_v59 = vpop.f32.mrb[5].mxu0  ;;  %v588_v57 = vld [vmem:[#allocation11 + $0xc] sm:$0xf] }
 0x56a   : > { %v703_v60 = vpop.f32.mrb[6].mxu0 }
 0x56b   : > { %v1556_v61 = vpop.f32.mrb[7].mxu0  ;;  %1578 = vmatmul.mubr.msk.bf16.vlgmr.msra.gmra.mrb[12].mxu0 %vm598_vm2, %v706_v58  ;;  %v1184_v58 = vsel %vm662_vm3, %v588_v57, 0 }
 0x56c   : > { %1589 = vmatprep.mubr.msk.bf16.mxu0 %vm2155_vm0, %v2154_v0 }
 0x570   : > { %v812_v63 = vpop.f32.mrb[8].mxu0 }
 0x571   : > { %v818_v1 = vpack.c.bf16 %v812_v63, %v812_v63  ;;  %v1567_v2 = vpop.f32.mrb[9].mxu0 }
 0x572   : > { %v815_v4 = vpop.f32.mrb[10].mxu0 }
 0x573   : > { %v1568_v6 = vpop.f32.mrb[11].mxu0  ;;  %1572 = vmatmul.mubr.msk.bf16.vlgmr.msra.gmra.mrb[8].mxu1 %vm598_vm2, %v818_v1 }
 0x574   : > { %1582 = vmatpush3.bf16.xpose.msra.mxu1 %v919_v5  ;;  %1583 = vmatprep.mubr.msk.bf16.mxu1 %vm2155_vm0, %v2154_v0 }
 0x575   : > { %1593 = vmatprep.subr.bf16.mxu1 %v2154_v0 }
 0x57b   : > { %1584 = vmatmul.mubr.msk.bf16.vlgmr.msra.gmra.mrb[12].mxu1 %vm598_vm2, %v912_v7 }
 0x57c   : > { %1595 = vmatprep.mubr.msk.bf16.mxu1 %vm2155_vm0, %v2154_v0  ;;  %1594 = vmatpush3.bf16.msra.mxu1 %v1026_v40 }
 0x57d   : > { %1605 = vmatprep.subr.bf16.mxu1 %v2154_v0 }
 0x63e   : > { %v905_v8 = vpop.f32.mrb[12].mxu0 }
 0x63f   : > { %v1579_v9 = vpop.f32.mrb[13].mxu0 }
 0x640   : > { %v908_v11 = vpop.f32.mrb[14].mxu0 }
 0x641   : > { %v1580_v13 = vpop.f32.mrb[15].mxu0 }
 0x642   : > { %v1503_v13 = vld [vmem:[#allocation13] ss:$0 sm:$0xff] }
 0x646   : > { %v859_v14 = vpop.f32.mrb[8].mxu1 }
 0x647   : > { %v2651_v15 = vadd.f32 %v905_v8, %v859_v14  ;;  %v1573_v16 = vpop.f32.mrb[9].mxu1 }
 0x648   : > { %v862_v17 = vpop.f32.mrb[10].mxu1  ;;  %v1235_v16 = vunpack.c.l.bf16 %v2587_v3 }
 0x649   : > { %v1574_v19 = vpop.f32.mrb[11].mxu1 }
 0x64e   : > { %v955_v20 = vpop.f32.mrb[12].mxu1 }
 0x64f   : > { %v956_v21 = vadd.f32 %v2614_v18, %v955_v20  ;;  %v1585_v22 = vpop.f32.mrb[13].mxu1 }
 0x650   : > { %v958_v23 = vpop.f32.mrb[14].mxu1 }
 0x651   : > { %v1586_v24 = vpop.f32.mrb[15].mxu1  ;;  %v961_v25 = vsel %vm598_vm2, %v956_v21, -inf }
 0x652   : > { %962 = vmax.xlane.f32.xlu1 %v961_v25 }
 0x663   : > { %1071 = vrot.lane.b32.xlu1 %v2594_v10, %s2163_s5 }
 0x667   : > { %1069 = vrot.lane.b32.xlu1 %v2596_v12, %s2164_s29 }
 0x6df   : > { %v963_v26 = vpop.xlane.xlu1 %962 }
 0x6e0   : > { %v964_v27 = vsub.f32 %v956_v21, %v963_v26 }
 0x6e2   : > { %v965_v28 = vmul.f32 1.442695, %v964_v27 }
 0x6e3   : > { %v1072_v35 = vpop.permute.xlu1 %1071 }
 0x6e4   : > { %1775 = vpow2.f32 %v965_v28  ;;  %v1077_v37 = vsel %vm598_vm2, %v1072_v35, 0 }
 0x6e7   : > { %v1070_v38 = vpop.permute.xlu1 %1069 }
 0x6ee   : > { %v1776_v29 = vpop.eup %1775 }
 0x6ef   : > { %v967_v30 = vsel %vm598_vm2, %v1776_v29, 0.0 }
 0x6f0   : > { %968 = vadd.xlane.f32.xlu0 %v967_v30 }
 0x706   : > { %973 = vrot.lane.b32.xlu0 %v2594_v10, %s2165_s22 }
 0x77d   : > { %v969_v31 = vpop.xlane.xlu0 %968 }
 0x77e   : > { %1777 = vrcp.f32 %v969_v31  ;;  %v1504_v31 = vld [vmem:[#allocation14] ss:$0 sm:$0xff] }
 0x781   : > { %v974_v32 = vpop.permute.xlu0 %973 }
 0x782   : > { %v979_v33 = vsel %vm662_vm3, %v974_v32, 0 }
 0x783   : > { %1588 = vmatpush3.bf16.msra.mxu0 %v979_v33  ;;  %v1505_v33 = vld [vmem:[#allocation16] ss:$0 sm:$0xff] }
 0x784   : > { %1599 = vmatprep.subr.bf16.mxu0 %v2154_v0 }
 0x788   : > { %v1778_v12 = vpop.eup %1777 }
 0x789   : > { %v971_v34 = vmul.f32 %v1778_v12, %v1776_v29 }
 0x78b   : > { %v972_v36 = vpack.c.bf16 %v971_v34, %v971_v34 }
 0x78d   : > { %1590 = vmatmul.mubr.msk.bf16.vlgmr.msra.gmra.mrb[16].mxu0 %vm598_vm2, %v972_v36 }
 0x78e   : > { %1600 = vmatpush3.bf16.xpose.msra.mxu0 %v1077_v37  ;;  %1601 = vmatprep.mubr.msk.bf16.mxu0 %vm2155_vm0, %v2154_v0 }
 0x78f   : > { %1611 = vmatprep.subr.bf16.mxu0 %v2154_v0 }
 0x795   : > { %1602 = vmatmul.mubr.msk.bf16.vlgmr.msra.gmra.mrb[20].mxu0 %vm598_vm2, %v1070_v38 }
 0x796   : > { %1613 = vmatprep.mubr.msk.bf16.mxu0 %vm2155_vm0, %v2154_v0  ;;  %1612 = vmatpush3.bf16.msra.mxu0 %v1184_v58 }
 0x860   : > { %v1015_v41 = vpop.f32.mrb[16].mxu0 }
 0x861   : > { %v1021_v42 = vpack.c.bf16 %v1015_v41, %v1015_v41  ;;  %v1591_v43 = vpop.f32.mrb[17].mxu0 }
 0x862   : > { %v1018_v44 = vpop.f32.mrb[18].mxu0 }
 0x863   : > { %v1592_v45 = vpop.f32.mrb[19].mxu0  ;;  %1596 = vmatmul.mubr.msk.bf16.vlgmr.msra.gmra.mrb[16].mxu1 %vm598_vm2, %v1021_v42 }
 0x864   : > { %1607 = vmatprep.mubr.msk.bf16.mxu1 %vm2155_vm0, %v2154_v0 }
 0x868   : > { %v1113_v46 = vpop.f32.mrb[20].mxu0 }
 0x869   : > { %v1114_v47 = vadd.f32 %v2614_v18, %v1113_v46  ;;  %v1603_v48 = vpop.f32.mrb[21].mxu0 }
 0x86a   : > { %v1116_v49 = vpop.f32.mrb[22].mxu0 }
 0x86b   : > { %v1604_v50 = vpop.f32.mrb[23].mxu0  ;;  %v1119_v51 = vsel %vm598_vm2, %v1114_v47, -inf }
 0x86c   : > { %1120 = vmax.xlane.f32.xlu0 %v1119_v51 }
 0x882   : > { %1131 = vrot.lane.b32.xlu0 %v2594_v10, %s2166_s21 }
 0x8f9   : > { %v1121_v52 = vpop.xlane.xlu0 %1120 }
 0x8fa   : > { %v1122_v53 = vsub.f32 %v1114_v47, %v1121_v52 }
 0x8fc   : > { %v1123_v54 = vmul.f32 1.442695, %v1122_v53 }
 0x8fd   : > { %v1132_v55 = vpop.permute.xlu0 %1131 }
 0x8fe   : > { %1779 = vpow2.f32 %v1123_v54  ;;  %v1137_v56 = vsel %vm662_vm3, %v1132_v55, 0 }
 0x8ff   : > { %1606 = vmatpush3.bf16.msra.mxu1 %v1137_v56 }
 0x908   : > { %v1780_v0 = vpop.eup %1779 }
 0x909   : > { %v1125_v18 = vsel %vm598_vm2, %v1780_v0, 0.0 }
 0x90a   : > { %1126 = vadd.xlane.f32.xlu1 %v1125_v18 }
 0x936   : > { %v1062_v59 = vpop.f32.mrb[16].mxu1 }
 0x937   : > { %v1068_v60 = vadd.f32 %v1062_v59, %v2651_v15  ;;  %v1597_v10 = vpop.f32.mrb[17].mxu1 }
 0x938   : > { %v1065_v61 = vpop.f32.mrb[18].mxu1 }
 0x939   : > { %v1598_v62 = vpop.f32.mrb[19].mxu1 }
 0x997   : > { %v1127_v63 = vpop.xlane.xlu1 %1126 }
 0x998   : > { %1781 = vrcp.f32 %v1127_v63 }
 0x9a2   : > { %v1782_v1 = vpop.eup %1781 }
 0x9a3   : > { %v1129_v2 = vmul.f32 %v1782_v1, %v1780_v0 }
 0x9a5   : > { %v1130_v4 = vpack.c.bf16 %v1129_v2, %v1129_v2 }
 0x9a7   : > { %1608 = vmatmul.mubr.msk.bf16.vlgmr.msra.gmra.mrb[20].mxu1 %vm598_vm2, %v1130_v4 }
 0xa7a   : > { %v1173_v5 = vpop.f32.mrb[20].mxu1 }
 0xa7b   : > { %v1179_v6 = vpack.c.bf16 %v1173_v5, %v1173_v5  ;;  %v1609_v7 = vpop.f32.mrb[21].mxu1 }
 0xa7c   : > { %v1176_v8 = vpop.f32.mrb[22].mxu1 }
 0xa7d   : > { %v1610_v9 = vpop.f32.mrb[23].mxu1  ;;  %1614 = vmatmul.mubr.msk.bf16.vlgmr.msra.gmra.mrb[24].mxu0 %vm598_vm2, %v1179_v6 }
 0xb50   : > { %v1220_v11 = vpop.f32.mrb[24].mxu0 }
 0xb51   : > { %v1226_v14 = vadd.f32 %v1220_v11, %v1068_v60  ;;  %v1615_v15 = vpop.f32.mrb[25].mxu0 }
 0xb52   : > { %v1223_v17 = vpop.f32.mrb[26].mxu0 }
 0xb53   : > { %v1234_v19 = vadd.f32 %v1503_v13, %v1226_v14  ;;  %v1616_v20 = vpop.f32.mrb[27].mxu0 }
 0xb55   : > { %v1236_v21 = vadd.f32 %v1235_v16, %v1234_v19 }
 0xb57   : > { %v1237_v22 = vsel %vm537_vm1, %v1236_v21, 0.0 }
 0xb58   : > { %1238 = vadd.xlane.f32.xlu1 %v1237_v22 }
 0xbe5   : > { %v1239_v23 = vpop.xlane.xlu1 %1238 }
 0xbe6   : > { %v1241_v24 = vmul.f32 0.03125, %v1239_v23 }
 0xbe8   : > { %v1242_v25 = vsub.f32 %v1236_v21, %v1241_v24 }
 0xbea   : > { %v1243_v26 = vmul.f32 %v1242_v25, %v1242_v25 }
 0xbec   : > { %v1244_v27 = vsel %vm537_vm1, %v1243_v26, 0.0 }
 0xbed   : > { %1245 = vadd.xlane.f32.xlu1 %v1244_v27 }
 0xc7a   : > { %v1246_v28 = vpop.xlane.xlu1 %1245 }
 0xc7b   : > { %v1247_v29 = vmul.f32 0.03125, %v1246_v28 }
 0xc7d   : > { %v1248_v30 = vadd.f32 1e-05, %v1247_v29 }
 0xc7f   : > { %1783 = vrsqrt.f32 %v1248_v30 }
 0xc89   : > { %v1784_v3 = vpop.eup %1783 }
 0xc8a   : > { %v1250_v32 = vmul.f32 %v1784_v3, %v1242_v25 }
 0xc8c   : > { %v1258_v12 = vmul.f32 %v1504_v31, %v1250_v32 }
 0xc8e   : > { %v1266_v34 = vadd.f32 %v1505_v33, %v1258_v12 }
 0xc90   : > { %v1267_v35 = vpack.c.bf16 %v1266_v34, %v1266_v34 }
 0xc92   : > { %1269 = vst.msk [vmem:[%s511_s25] sm:$0xf] %vm1268_vm4, %v1267_v35 }
 0xc93   : > { %2056 = shalt.err (!%p2053_p5)
}
 0xc94   : > { %s2057_s9 = scalar_lea.hbm %s2692_s16, 64  ;;  %s2061_s3 = scalar_lea.hbm %s2813_s24, 128 }
 0xc95   : > { %p2058_p8 = scmp.ne.s32.totalorder %s2692_s16, %s2057_s9  ;;  %p2062_p4 = scmp.lt.u32.totalorder %s2692_s16, %s2813_s24 }
 0xc96   : > { %p2063_p7 = scmp.lt.u32.totalorder %s2061_s3, %s2057_s9  ;;  %p2065_p11 = scmp.lt.u32.totalorder %s2057_s9, %s2692_s16 }
 0xc97   : > { %p2059_p3 = pnand %p2058_p8, %p2814_p2 }
 0xc98   : > { %p2064_p6 = por %p2063_p7, %p2062_p4 }
 0xc99   : > { %p2060_p13 = pneg %p2059_p3 }
 0xc9a   : > { %p2066_p12 = por %p2065_p11, %p2064_p6 }
 0xc9c   : > { %p2067_p1 = pnand %p2066_p12, %p2060_p13 }
 0xc9e   : > { %2070 = shalt.err (!%p2067_p1)
}
 0xc9f   : > { %1647 = dma.vmem_to_hbm [thread:$0]  (%p2814_p2), %s2694_s1, 64, %s2692_s16, %s1271_s15  }
 0xca0 PF: > { %s2815_s22 = sld [smem:[#allocation26_spill]]  ;;  %s1297_s21 = sand.u32 1, %s2121_s30  }
 0xca1   : > { %p2816_p9 = scmp.ne.s32.totalorder %s2792_s20, 0  ;;  %s1298_s26 = scalar_lea.sflag [#allocation4], %s1297_s21 }
 0xca6   : > { %p2817_p10 = scmp.ge.s32.totalorder %s2815_s22, 2 }
 0xca8   : > { %p1679_p0 = pnand %p2817_p10, %p2816_p9 }
 0xcaa   : > { %2116 = dma.done.wait (!%p1679_p0), %s1298_s26, 64  }
 0xcab   : > { %2118 = vsyncadd (!%p1679_p0), %s1298_s26, 4294967232  ;;  %s31_s14 = sadd.s32 1, %s2815_s22   ;;  %s2818_s11 = sld [smem:[#allocation24_spill]] }
 0xcac   : > { %p28_p5 = scmp.ge.s32.totalorder %s31_s14, 4   ;;  %s2819_s28 = sld [smem:[#allocation29_spill]] }
 0xcad   : > { %s2820_s25 = sld [smem:[#allocation28_spill]]  ;;  %s2821_s30 = smov %s2125_s10 }
 0xcae   : > { %s2824_s12 = smov %s2137_s13  ;;  %30 = sbr.rel (!%p28_p5) target bundleno = 17 (0x11), region = 149 }
 0xcb1   : > { %s2822_s10 = smov %s2818_s11 }
 0xcb2   : > { %s2823_s11 = smov %s2819_s28 }
 0xcb3   : > { %s2825_s13 = smov %s2820_s25 }
 0xcb5   :  { %1303 = vsyncpa [#allocation3], 1 }
 0xcb6   :  { %1305 = vsyncpa [#allocation3 + $0x1], 1 }
 0xcb7   :  { %1306 = vsyncpa [#allocation6], 1 }
 0xcb8   :  { %1308 = vsyncpa [#allocation6 + $0x1], 1 }
 0xcb9   :  { %1309 = vsyncpa [#allocation9], 1 }
 0xcba   :  { %1310 = vsyncpa [#allocation12], 1 }
 0xcbb   :  { %1311 = vsyncpa [#allocation15], 1 }
 0xcbc   :  { %1312 = vsyncpa [#allocation4], 1 }
 0xcbd   :  { %1314 = vsyncpa [#allocation4 + $0x1], 1 }

// kernel: _lambda_.9
= control target key start
LH: loop header
LB: loop body
LE: loop exit
PB: predicated region body
PF: predicated region fallthrough
CT: control target
= control target key end

     0   :  { %s2811_s0 = inlined_call_operand.hbm [shape: bf16[2,8,32], index: 0, kind: input, shape index: {}]   ;;  %s2812_s1 = inlined_call_operand.hbm [shape: bf16[2,8,32], index: 1, kind: input, shape index: {}]   ;;  %s2813_s2 = inlined_call_operand.hbm [shape: f32[2,1,8], index: 2, kind: input, shape index: {}]   ;;  %s2814_s3 = inlined_call_operand.hbm [shape: bf16[32,96], index: 3, kind: input, shape index: {}]   ;;  %s2815_s4 = inlined_call_operand.hbm [shape: f32[1,96], index: 4, kind: input, shape index: {}]   ;;  %s2816_s5 = inlined_call_operand.hbm [shape: bf16[32,32], index: 5, kind: input, shape index: {}]   ;;  %s2817_s6 = inlined_call_operand.hbm [shape: f32[1,32], index: 6, kind: input, shape index: {}]   ;;  %s2818_s7 = inlined_call_operand.hbm [shape: f32[1,32], index: 7, kind: input, shape index: {}]   ;;  %s2819_s8 = inlined_call_operand.hbm [shape: f32[1,32], index: 8, kind: input, shape index: {}]   ;;  %s2820_s9 = inlined_call_operand.hbm [shape: bf16[2,8,32], index: 9, kind: output, shape index: {}]  }
   0x1   :  { %2841 = sst [smem:[#allocation30_spill]] %s2812_s1 }
   0x2   :  { %2842 = sst [smem:[#allocation31_spill]] %s2814_s3 }
   0x3   :  { %2843 = sst [smem:[#allocation32_spill]] %s2816_s5 }
   0x4   :  { %2844 = sst [smem:[#allocation33_spill]] %s2818_s7 }
   0x5   :  { %2845 = sst [smem:[#allocation34_spill]] %s2820_s9 }
   0x6   :  { %14 = vsyncpa [#allocation3], 0 }
   0x7   :  { %16 = vsyncpa [#allocation3 + $0x1], 0 }
   0x8   :  { %17 = vsyncpa [#allocation6], 0 }
   0x9   :  { %19 = vsyncpa [#allocation6 + $0x1], 0 }
   0xa   :  { %20 = vsyncpa [#allocation9], 0 }
   0xb   :  { %21 = vsyncpa [#allocation12], 0 }
   0xc   :  { %22 = vsyncpa [#allocation15], 0 }
   0xd   :  { %23 = vsyncpa [#allocation4], 0 }
   0xe   :  { %25 = vsyncpa [#allocation4 + $0x1], 0  ;;  %s2274_s30 = smov 0   ;;  %s2276_s10 = smov 0  }
   0xf   :  { %s2278_s11 = smov 0   ;;  %s2280_s12 = smov 0  }
  0x10   :  { %s2282_s13 = smov 0   ;;  %s2284_s14 = smov 0  }
  0x11 LB: > { %2846 = sst [smem:[#allocation24_spill]] %s2189_s11  ;;  %s2305_s15 = sadd.s32 4294967295, %s2201_s14   ;;  %s2201_s14 = sphi %s2284_s14, %s31_s14   ;;  %s2197_s13 = sphi %s2282_s13, %s2894_s13   ;;  %s2193_s12 = sphi %s2280_s12, %s2893_s12   ;;  %s2189_s11 = sphi %s2278_s11, %s2889_s11   ;;  %s2185_s10 = sphi %s2276_s10, %s2892_s10   ;;  %s2181_s30 = sphi %s2274_s30, %s2891_s30  }
  0x12   : > { %2847 = sst [smem:[#allocation25_spill]] %s2193_s12  ;;  %p1515_p0 = scmp.ge.s32.totalorder %s2201_s14, 1 }
  0x13   : > { %2848 = sst [smem:[#allocation26_spill]] %s2201_s14  ;;  %p2823_p1 = scmp.eq.s32.totalorder %s2305_s15, 0 }
  0x14   : > { %p282_p2 = scmp.lt.s32.totalorder %s2201_s14, 3  ;;  %s2203_s17 = smov [#allocation8]  }
  0x15   : > { %s294_s18 = sshll.u32 %s2203_s17, 4  ;;  %s2204_s20 = smov [#allocation11]   ;;  %s2314_s18 = int_to_ptr.vmem [resolvable:$true] %s294_s18 }
  0x16   : > { %p2310_p3 = pnand %p1515_p0, %p282_p2  ;;  %s318_s21 = sshll.u32 %s2204_s20, 4  ;;  %s2325_s21 = int_to_ptr.vmem [resolvable:$true] %s318_s21 }
  0x17   : > { %s2205_s22 = smov [#allocation14]   ;;  %s2852_s3 = sld [smem:[#allocation31_spill]] }
  0x18   : > { %s2849_s16 = scalar_select %p2310_p3, 1, 0 }
  0x19   : > { %p1713_p4 = pneg %p2310_p3  ;;  %s2327_s23 = sshll.u32 %s2205_s22, 4  ;;  %s344_s23 = int_to_ptr.vmem [resolvable:$true] %s2327_s23 }
  0x1a   : > { %2850 = sst [smem:[#allocation27_spill]] %s2849_s16 }
  0x1b   : > { %p2321_p6 = pnand %p1713_p4, %p2823_p1 }
  0x1d   : > { %s2851_s19 = scalar_select %p2321_p6, 1, 0 }
  0x1e   : > { %s1845_s26 = scalar_lea.hbm %s2852_s3, 256  ;;  %p2337_p8 = pneg %p2321_p6 }
  0x1f   : > { %p1846_p7 = scmp.ne.s32.totalorder %s2852_s3, %s1845_s26  ;;  %p1852_p11 = scmp.lt.u32.totalorder %s1845_s26, %s2852_s3 }
  0x20   : > { %s2853_s29 = scalar_select %p2337_p8, 1, 0 }
  0x21   : > { %p1848_p9 = pnand %p2337_p8, %p1846_p7 }
  0x23   : > { %p1849_p10 = pneg %p1848_p9 }
  0x25   : > { %p1854_p12 = pnand %p1852_p11, %p1849_p10 }
  0x27   : > { %1857 = shalt.err (!%p1854_p12)
}
  0x28   : > { %s1858_s22 = scalar_lea.vmem %s2314_s18, 256  ;;  %p1866_p4 = scmp.lt.s32.totalorder %s2314_s18, %s2314_s18 }
  0x29   : > { %p1859_p13 = scmp.ne.s32.totalorder %s2314_s18, %s1858_s22  ;;  %p1867_p5 = scmp.lt.s32.totalorder %s1858_s22, %s1858_s22 }
  0x2b   : > { %p1861_p0 = pnand %p1859_p13, %p2337_p8  ;;  %p1868_p7 = por %p1867_p5, %p1866_p4 }
  0x2d   : > { %p1862_p2 = pneg %p1861_p0 }
  0x2f   : > { %p1869_p9 = pnand %p1868_p7, %p1862_p2 }
  0x31   : > { %1872 = shalt.err (!%p1869_p9)
}
  0x32   : > { %s2206_s24 = smov 64   ;;  %s2207_s25 = smov 4  }
  0x33   : > { %1716 = dma.hbm_to_vmem [thread:$0]  (!%p2321_p6), %s2852_s3, 256, %s2314_s18, [#allocation9], %s2206_s24, %s2206_s24, %s2207_s25  }
  0x34   : > { %s2854_s5 = sld [smem:[#allocation32_spill]] }
  0x3a   : > { %s1873_s20 = scalar_lea.hbm %s2854_s5, 256 }
  0x3b   : > { %p1874_p5 = scmp.ne.s32.totalorder %s2854_s5, %s1873_s20  ;;  %p1880_p12 = scmp.lt.u32.totalorder %s1873_s20, %s2854_s5 }
  0x3d   : > { %p1876_p10 = pnand %p1874_p5, %p2337_p8 }
  0x3f   : > { %p1877_p11 = pneg %p1876_p10 }
  0x41   : > { %p1882_p13 = pnand %p1880_p12, %p1877_p11 }
  0x43   : > { %1885 = shalt.err (!%p1882_p13)
}
  0x44   : > { %s1886_s18 = scalar_lea.vmem %s2325_s21, 256  ;;  %p1894_p7 = scmp.lt.s32.totalorder %s2325_s21, %s2325_s21 }
  0x45   : > { %p1887_p0 = scmp.ne.s32.totalorder %s2325_s21, %s1886_s18  ;;  %p1895_p9 = scmp.lt.s32.totalorder %s1886_s18, %s1886_s18 }
  0x47   : > { %p1889_p2 = pnand %p1887_p0, %p2337_p8  ;;  %p1896_p5 = por %p1895_p9, %p1894_p7 }
  0x49   : > { %p1890_p4 = pneg %p1889_p2 }
  0x4b   : > { %p1897_p10 = pnand %p1896_p5, %p1890_p4 }
  0x4d   : > { %1900 = shalt.err (!%p1897_p10)
}
  0x4e   : > { %1722 = dma.hbm_to_vmem [thread:$0]  (!%p2321_p6), %s2854_s5, 256, %s2325_s21, [#allocation12], %s2206_s24, %s2206_s24, %s2207_s25  }
  0x4f   : > { %s2855_s7 = sld [smem:[#allocation33_spill]] }
  0x55   : > { %s1901_s27 = scalar_lea.hbm %s2855_s7, 16 }
  0x56   : > { %p1902_p11 = scmp.ne.s32.totalorder %s2855_s7, %s1901_s27  ;;  %p1908_p0 = scmp.lt.u32.totalorder %s1901_s27, %s2855_s7 }
  0x58   : > { %p1904_p12 = pnand %p1902_p11, %p2337_p8 }
  0x5a   : > { %p1905_p13 = pneg %p1904_p12 }
  0x5c   : > { %p1910_p2 = pnand %p1908_p0, %p1905_p13 }
  0x5e   : > { %1913 = shalt.err (!%p1910_p2)
}
  0x5f   : > { %s1914_s18 = scalar_lea.vmem %s344_s23, 16  ;;  %s1921_s21 = scalar_lea.vmem %s344_s23, 32 }
  0x60   : > { %p1915_p4 = scmp.ne.s32.totalorder %s344_s23, %s1914_s18  ;;  %p1922_p5 = scmp.lt.s32.totalorder %s344_s23, %s344_s23 }
  0x61   : > { %p1923_p10 = scmp.lt.s32.totalorder %s1921_s21, %s1914_s18 }
  0x62   : > { %p1917_p7 = pnand %p1915_p4, %p2337_p8 }
  0x63   : > { %p1924_p1 = por %p1923_p10, %p1922_p5 }
  0x64   : > { %p1918_p9 = pneg %p1917_p7 }
  0x66   : > { %p1925_p3 = pnand %p1924_p1, %p1918_p9 }
  0x68   : > { %1928 = shalt.err (!%p1925_p3)
}
  0x69   : > { %1728 = dma.hbm_to_vmem [thread:$0]  (!%p2321_p6), %s2855_s7, 16, %s344_s23, [#allocation15]  }
  0x6a   : > { %s1514_s9 = sadd.s32 4294967294, %s2201_s14   ;;  %s43_s12 = sadd.s32 1, %s2197_s13 }
  0x6b   : > { %s52_s16 = sadd.s32 1, %s2189_s11  ;;  %p45_p1 = scmp.ge.s32.totalorder %s43_s12, 2 }
  0x6c   : > { %p59_p3 = scmp.ne.s32.totalorder %s2189_s11, %s2185_s10  ;;  %p60_p11 = scmp.eq.s32.totalorder %s2201_s14, 0 }
  0x6d   : > { %p65_p12 = scmp.ne.s32.totalorder %s2185_s10, %s2181_s30  ;;  %s2896_s12 = smov (%p45_p1, %s43_s12), 0 }
  0x6e   : > { %2856 = sst [smem:[#allocation28_spill]] %s2896_s12  ;;  %p2410_p13 = por %p60_p11, %p59_p3 }
  0x6f   : > { %p2858_p0 = scmp.eq.s32.totalorder %s2305_s15, 0  ;;  %s47_s27 = ssub.s32 %s2197_s13, %s2896_s12 }
  0x70   : > { %p269_p4 = scmp.eq.s32.totalorder %s2305_s15, 1  ;;  %p50_p7 = scmp.eq.s32.totalorder %s47_s27, 0 }
  0x71   : > { %p2416_p2 = por %p2858_p0, %p65_p12  ;;  %p275_p9 = scmp.eq.s32.totalorder %s1514_s9, 1 }
  0x72   : > { %p2423_p5 = por %p269_p4, %p59_p3  ;;  %p1752_p10 = scmp.lt.s32.totalorder %s2201_s14, 2 }
  0x73   : > { %s2859_s23 = scalar_select %p2416_p2, 1, 0 }
  0x74   : > { %s2860_s28 = scalar_select %p2423_p5, 1, 0 }
  0x75   : > { %s2429_s17 = scalar_select %p50_p7, %s2189_s11, %s52_s16  }
  0x76   : > { %p2431_p1 = por %p275_p9, %p65_p12  ;;  %s2436_s22 = sand.u32 1, %s2189_s11  }
  0x77   : > { %2861 = sst [smem:[#allocation29_spill]] %s2429_s17  ;;  %s2826_s18 = sshll.u32 %s2436_s22, 2 }
  0x78   : > { %s2862_s20 = scalar_select %p2431_p1, 1, 0 }
  0x79   : > { %s2827_s21 = sshll.u32 %s2197_s13, 6  ;;  %p2442_p11 = pnand %p1752_p10, %p2410_p13 }
  0x7a   : > { %s384_s25 = sand.u32 1, %s2201_s14   ;;  %s2864_s1 = sld [smem:[#allocation30_spill]] }
  0x7b   : > { %s2863_s24 = scalar_select %p2442_p11, 1, 0 }
  0x7c   : > { %s388_s3 = scalar_lea.vmem [#allocation5], %s2826_s18  ;;  %s2208_s26 = smov [#allocation10]  }
  0x7d   : > { %s395_s5 = sshll.u32 %s388_s3, 4  ;;  %s2458_s7 = sshll.u32 %s2208_s26, 4  ;;  %s2456_s5 = int_to_ptr.vmem [resolvable:$true] %s395_s5  ;;  %s309_s7 = int_to_ptr.vmem [resolvable:$true] %s2458_s7 }
  0x7e   : > { %s2460_s12 = scalar_lea.sflag [#allocation6], %s384_s25  ;;  %p2466_p12 = pneg %p2442_p11 }
  0x80   : > { %s2452_s27 = scalar_lea.hbm %s2864_s1, %s2827_s21  ;;  %s1934_s18 = scalar_lea.hbm %s2864_s1, 128 }
  0x81   : > { %s1929_s17 = scalar_lea.hbm %s2452_s27, 64  ;;  %p1935_p4 = scmp.lt.u32.totalorder %s2452_s27, %s2864_s1 }
  0x82   : > { %p1930_p3 = scmp.ne.s32.totalorder %s2452_s27, %s1929_s17  ;;  %p1936_p7 = scmp.lt.u32.totalorder %s1934_s18, %s1929_s17 }
  0x83   : > { %s2865_s9 = scalar_select %p2466_p12, 1, 0 }
  0x84   : > { %p1932_p13 = pnand %p2466_p12, %p1930_p3  ;;  %p1937_p9 = por %p1936_p7, %p1935_p4 }
  0x85   : > { %p1938_p10 = scmp.lt.u32.totalorder %s1929_s17, %s2452_s27 }
  0x86   : > { %p1933_p0 = pneg %p1932_p13 }
  0x87   : > { %p1939_p1 = por %p1938_p10, %p1937_p9 }
  0x89   : > { %p1940_p5 = pnand %p1939_p1, %p1933_p0 }
  0x8b   : > { %1943 = shalt.err (!%p1940_p5)
}
  0x8c   : > { %s1944_s25 = scalar_lea.vmem %s2456_s5, 64  ;;  %s2209_s16 = smov [#allocation5]  }
  0x8d   : > { %p1945_p3 = scmp.ne.s32.totalorder %s2456_s5, %s1944_s25  ;;  %s1949_s3 = sshll.u32 %s2209_s16, 4  ;;  %s1950_s3 = int_to_ptr.vmem [resolvable:$false] %s1949_s3 }
  0x8e   : > { %s1951_s21 = scalar_lea.vmem %s1950_s3, 128  ;;  %p1952_p6 = scmp.lt.s32.totalorder %s2456_s5, %s1950_s3 }
  0x8f   : > { %p1947_p13 = pnand %p1945_p3, %p2466_p12  ;;  %p1953_p8 = scmp.lt.s32.totalorder %s1951_s21, %s1944_s25 }
  0x91   : > { %p1948_p2 = pneg %p1947_p13  ;;  %p1954_p4 = por %p1953_p8, %p1952_p6 }
  0x93   : > { %p1955_p7 = pnand %p1954_p4, %p1948_p2 }
  0x95   : > { %1958 = shalt.err (!%p1955_p7)
}
  0x96   : > { %1738 = dma.hbm_to_vmem [thread:$0]  (!%p2442_p11), %s2452_s27, 64, %s2456_s5, %s2460_s12  }
  0x97   : > { %s1959_s26 = scalar_lea.hbm %s2815_s4, 16  ;;  %p2866_p6 = scmp.ne.s32.totalorder %s2853_s29, 0 }
  0x98   : > { %p1960_p5 = scmp.ne.s32.totalorder %s2815_s4, %s1959_s26  ;;  %p1966_p1 = scmp.lt.u32.totalorder %s1959_s26, %s2815_s4 }
  0x9a   : > { %p1962_p8 = pnand %p1960_p5, %p2866_p6 }
  0x9c   : > { %p1963_p2 = pneg %p1962_p8 }
  0x9e   : > { %p1968_p0 = pnand %p1966_p1, %p1963_p2 }
  0xa0   : > { %1971 = shalt.err (!%p1968_p0)
}
  0xa1   : > { %s1972_s21 = scalar_lea.vmem %s309_s7, 16  ;;  %s1979_s5 = scalar_lea.vmem %s309_s7, 32 }
  0xa2   : > { %p1973_p9 = scmp.ne.s32.totalorder %s309_s7, %s1972_s21  ;;  %p1980_p13 = scmp.lt.s32.totalorder %s309_s7, %s309_s7 }
  0xa3   : > { %p1981_p4 = scmp.lt.s32.totalorder %s1979_s5, %s1972_s21 }
  0xa4   : > { %p1975_p10 = pnand %p1973_p9, %p2866_p6 }
  0xa5   : > { %p1982_p7 = por %p1981_p4, %p1980_p13 }
  0xa6   : > { %p1976_p3 = pneg %p1975_p10 }
  0xa8   : > { %p1983_p11 = pnand %p1982_p7, %p1976_p3 }
  0xaa   : > { %1986 = shalt.err (!%p1983_p11)
}
  0xab   : > { %p2867_p5 = scmp.ne.s32.totalorder %s2851_s19, 0  ;;  %s2210_s17 = smov [#allocation13]  }
  0xac   : > { %s332_s18 = sshll.u32 %s2210_s17, 4  ;;  %s2211_s26 = smov [#allocation16]   ;;  %s333_s18 = int_to_ptr.vmem [resolvable:$true] %s332_s18 }
  0xad   : > { %1719 = dma.hbm_to_vmem [thread:$0]  (!%p2867_p5), %s2815_s4, 16, %s309_s7, [#allocation9]  }
  0xae   : > { %s354_s16 = sshll.u32 %s2211_s26, 4  ;;  %s1987_s11 = scalar_lea.hbm %s2817_s6, 16  ;;  %s355_s16 = int_to_ptr.vmem [resolvable:$true] %s354_s16 }
  0xaf   : > { %p1988_p11 = scmp.ne.s32.totalorder %s2817_s6, %s1987_s11  ;;  %p1994_p1 = scmp.lt.u32.totalorder %s1987_s11, %s2817_s6 }
  0xb1   : > { %p1990_p8 = pnand %p1988_p11, %p2866_p6 }
  0xb3   : > { %p1991_p2 = pneg %p1990_p8 }
  0xb5   : > { %p1996_p0 = pnand %p1994_p1, %p1991_p2 }
  0xb7   : > { %1999 = shalt.err (!%p1996_p0)
}
  0xb8   : > { %s2000_s7 = scalar_lea.vmem %s333_s18, 16  ;;  %s2007_s27 = scalar_lea.vmem %s333_s18, 32 }
  0xb9   : > { %p2001_p9 = scmp.ne.s32.totalorder %s333_s18, %s2000_s7  ;;  %p2008_p13 = scmp.lt.s32.totalorder %s333_s18, %s333_s18 }
  0xba   : > { %p2009_p4 = scmp.lt.s32.totalorder %s2007_s27, %s2000_s7 }
  0xbb   : > { %p2003_p10 = pnand %p2001_p9, %p2866_p6 }
  0xbc   : > { %p2010_p7 = por %p2009_p4, %p2008_p13 }
  0xbd   : > { %p2004_p3 = pneg %p2003_p10 }
  0xbf   : > { %p2011_p12 = pnand %p2010_p7, %p2004_p3 }
  0xc1   : > { %2014 = shalt.err (!%p2011_p12)
}
  0xc2   : > { %1725 = dma.hbm_to_vmem [thread:$0]  (!%p2867_p5), %s2817_s6, 16, %s333_s18, [#allocation12]  }
  0xc3   : > { %s2015_s25 = scalar_lea.hbm %s2819_s8, 16 }
  0xc4   : > { %p2016_p11 = scmp.ne.s32.totalorder %s2819_s8, %s2015_s25  ;;  %p2022_p12 = scmp.lt.u32.totalorder %s2015_s25, %s2819_s8 }
  0xc6   : > { %p2018_p8 = pnand %p2016_p11, %p2866_p6 }
  0xc8   : > { %p2019_p2 = pneg %p2018_p8 }
  0xca   : > { %p2024_p1 = pnand %p2022_p12, %p2019_p2 }
  0xcc   : > { %2027 = shalt.err (!%p2024_p1)
}
  0xcd   : > { %s2028_s7 = scalar_lea.vmem %s355_s16, 16  ;;  %s2035_s18 = scalar_lea.vmem %s355_s16, 32 }
  0xce   : > { %p2029_p0 = scmp.ne.s32.totalorder %s355_s16, %s2028_s7  ;;  %p2036_p3 = scmp.lt.s32.totalorder %s355_s16, %s355_s16 }
  0xcf   : > { %p2037_p13 = scmp.lt.s32.totalorder %s2035_s18, %s2028_s7 }
  0xd0   : > { %p2031_p9 = pnand %p2029_p0, %p2866_p6 }
  0xd1   : > { %p2038_p4 = por %p2037_p13, %p2036_p3 }
  0xd2   : > { %p2032_p10 = pneg %p2031_p9 }
  0xd4   : > { %p2039_p7 = pnand %p2038_p4, %p2032_p10 }
  0xd6   : > { %2042 = shalt.err (!%p2039_p7)
}
  0xd7   : > { %1731 = dma.hbm_to_vmem [thread:$0]  (!%p2867_p5), %s2819_s8, 16, %s355_s16, [#allocation15]  }
  0xd8   : > { %s2868_s29 = sshll.u32 %s2197_s13, 6  ;;  %s2869_s25 = sshll.u32 %s2436_s22, 2 }
  0xd9   : > { %s2550_s14 = scalar_lea.hbm %s2811_s0, %s2868_s29  ;;  %s369_s19 = scalar_lea.vmem [#allocation2], %s2869_s25 }
  0xda   : > { %s377_s3 = sshll.u32 %s369_s19, 4  ;;  %s1527_s21 = sshll.u32 %s2197_s13, 4  ;;  %s2554_s3 = int_to_ptr.vmem [resolvable:$true] %s377_s3 }
  0xdb   : > { %s366_s5 = scalar_lea.sflag [#allocation3], %s2436_s22  ;;  %s2043_s1 = scalar_lea.hbm %s2550_s14, 64 }
  0xdc   : > { %p2044_p6 = scmp.ne.s32.totalorder %s2550_s14, %s2043_s1  ;;  %p2870_p5 = scmp.ne.s32.totalorder %s2865_s9, 0 }
  0xdd   : > { %s2048_s18 = scalar_lea.hbm %s2811_s0, 128  ;;  %p2049_p2 = scmp.lt.u32.totalorder %s2550_s14, %s2811_s0 }
  0xde   : > { %p2046_p11 = pnand %p2044_p6, %p2870_p5  ;;  %p2050_p12 = scmp.lt.u32.totalorder %s2048_s18, %s2043_s1 }
  0xdf   : > { %p2052_p0 = scmp.lt.u32.totalorder %s2043_s1, %s2550_s14 }
  0xe0   : > { %p2047_p8 = pneg %p2046_p11  ;;  %p2051_p1 = por %p2050_p12, %p2049_p2 }
  0xe2   : > { %p2053_p9 = por %p2052_p0, %p2051_p1 }
  0xe4   : > { %p2054_p10 = pnand %p2053_p9, %p2047_p8 }
  0xe6   : > { %2057 = shalt.err (!%p2054_p10)
}
  0xe7   : > { %s2058_s29 = scalar_lea.vmem %s2554_s3, 64  ;;  %s2212_s26 = smov [#allocation2]  }
  0xe8   : > { %p2059_p3 = scmp.ne.s32.totalorder %s2554_s3, %s2058_s29  ;;  %s2063_s11 = sshll.u32 %s2212_s26, 4  ;;  %s2064_s11 = int_to_ptr.vmem [resolvable:$false] %s2063_s11 }
  0xe9   : > { %s2065_s25 = scalar_lea.vmem %s2064_s11, 128  ;;  %p2066_p7 = scmp.lt.s32.totalorder %s2554_s3, %s2064_s11 }
  0xea   : > { %p2061_p13 = pnand %p2059_p3, %p2870_p5  ;;  %p2067_p6 = scmp.lt.s32.totalorder %s2065_s25, %s2058_s29 }
  0xec   : > { %p2062_p4 = pneg %p2061_p13  ;;  %p2068_p11 = por %p2067_p6, %p2066_p7 }
  0xee   : > { %p2069_p2 = pnand %p2068_p11, %p2062_p4 }
  0xf0   : > { %2072 = shalt.err (!%p2069_p2)
}
  0xf1   : > { %p2871_p8 = scmp.ne.s32.totalorder %s2863_s24, 0  ;;  %s2584_s16 = scalar_lea.hbm %s2813_s2, %s1527_s21 }
  0xf2   : > { %s405_s7 = scalar_lea.vmem [#allocation7], %s2436_s22  ;;  %s2073_s27 = scalar_lea.hbm %s2584_s16, 16 }
  0xf3   : > { %1735 = dma.hbm_to_vmem [thread:$0]  (!%p2871_p8), %s2550_s14, 64, %s2554_s3, %s366_s5  }
  0xf4   : > { %s412_s18 = sshll.u32 %s405_s7, 4  ;;  %p2074_p12 = scmp.ne.s32.totalorder %s2584_s16, %s2073_s27  ;;  %s413_s18 = int_to_ptr.vmem [resolvable:$true] %s412_s18 }
  0xf5   : > { %s2078_s3 = scalar_lea.hbm %s2813_s2, 32  ;;  %p2079_p9 = scmp.lt.u32.totalorder %s2584_s16, %s2813_s2 }
  0xf6   : > { %p2076_p1 = pnand %p2074_p12, %p2870_p5  ;;  %p2080_p10 = scmp.lt.u32.totalorder %s2078_s3, %s2073_s27 }
  0xf7   : > { %p2082_p13 = scmp.lt.u32.totalorder %s2073_s27, %s2584_s16 }
  0xf8   : > { %p2077_p0 = pneg %p2076_p1  ;;  %p2081_p3 = por %p2080_p10, %p2079_p9 }
  0xfa   : > { %p2083_p4 = por %p2082_p13, %p2081_p3 }
  0xfc   : > { %p2084_p7 = pnand %p2083_p4, %p2077_p0 }
  0xfe   : > { %2087 = shalt.err (!%p2084_p7)
}
  0xff   : > { %s2088_s22 = scalar_lea.vmem %s413_s18, 16  ;;  %s2213_s21 = smov [#allocation7]  }
 0x100   : > { %p2089_p6 = scmp.ne.s32.totalorder %s413_s18, %s2088_s22  ;;  %s2093_s26 = sshll.u32 %s2213_s21, 4  ;;  %s2094_s26 = int_to_ptr.vmem [resolvable:$false] %s2093_s26 }
 0x101   : > { %s2095_s11 = scalar_lea.vmem %s2094_s26, 32  ;;  %p2096_p12 = scmp.lt.s32.totalorder %s413_s18, %s2094_s26 }
 0x102   : > { %p2091_p11 = pnand %p2089_p6, %p2870_p5  ;;  %p2097_p1 = scmp.lt.s32.totalorder %s2095_s11, %s2088_s22 }
 0x104   : > { %p2092_p2 = pneg %p2091_p11  ;;  %p2098_p8 = por %p2097_p1, %p2096_p12 }
 0x106   : > { %p2099_p9 = pnand %p2098_p8, %p2092_p2 }
 0x108   : > { %2102 = shalt.err (!%p2099_p9)
}
 0x109   : > { %p2872_p10 = scmp.ne.s32.totalorder %s2863_s24, 0  ;;  %s2873_s25 = sld [smem:[#allocation27_spill]] }
 0x10b   : > { %1741 = dma.hbm_to_vmem [thread:$0]  (!%p2872_p10), %s2584_s16, 16, %s413_s18, %s2460_s12  }
 0x10f   : > { %p2874_p0 = scmp.ne.s32.totalorder %s2873_s25, 0 }
 0x110   : > { %s2608_s9 = sand.u32 (!%p2874_p0), 1, %s2185_s10   ;;  %p2875_p5 = scmp.ne.s32.totalorder (!%p2874_p0), %s2859_s23, 0 }
 0x111   : > { %421 = sbr.rel (%p2874_p0) target bundleno = 3339 (0xd0b), region = 56  ;;  %s2611_s19 = sshll.u32 (!%p2874_p0), %s2608_s9, 2 }
 0x112   : > { %s424_s1 = scalar_lea.sflag (!%p2874_p0), [#allocation3], %s2608_s9  ;;  %s427_s7 = scalar_lea.vmem (!%p2874_p0), [#allocation2], %s2611_s19 }
 0x118   : > { %2156 = dma.done.wait (%p2875_p5), %s424_s1, 64  }
 0x119   : > { %2158 = vsyncadd (%p2875_p5), %s424_s1, 4294967232  ;;  %s432_s12 = sand.u32 1, %s2305_s15   ;;  %s436_s16 = scalar_lea.vmem [#allocation5], %s2611_s19 }
 0x11a   : > { %s433_s24 = scalar_lea.sflag [#allocation6], %s432_s12 }
 0x11b   : > { %2160 = dma.done.wait (%p2875_p5), %s433_s24, 80  }
 0x11c   : > { %2162 = vsyncadd (%p2875_p5), %s433_s24, 4294967216  ;;  %s444_s18 = scalar_lea.vmem [#allocation7], %s2608_s9  ;;  %p2876_p8 = scmp.eq.s32.totalorder %s2305_s15, 0 }
 0x11e   : > { %2164 = dma.done.wait (%p2876_p8), [#allocation9], 272   ;;  %p2877_p3 = pmov %p2876_p8 }
 0x120   : > { %2166 = vsyncadd (%p2877_p3), [#allocation9], 4294967024  ;;  %p2878_p13 = pmov %p2877_p3 }
 0x121   : > { %p2879_p4 = pmov %p2877_p3 }
 0x122   : > { %2168 = dma.done.wait (%p2878_p13), [#allocation12], 272  }
 0x123   : > { %2170 = vsyncadd (%p2879_p4), [#allocation12], 4294967024  ;;  %p2880_p7 = pmov %p2877_p3 }
 0x124   : > { %p2881_p6 = pmov %p2877_p3 }
 0x125   : > { %2172 = dma.done.wait (%p2880_p7), [#allocation15], 32  }
 0x126   : > { %2174 = vsyncadd (%p2881_p6), [#allocation15], 4294967264  ;;  %v2214_v0 = vmov 0.0   ;;  %vm2215_vm0 = vmmov 0   ;;  %v1825_v1 = vld [vmem:[#allocation8] sm:$0xff]   ;;  %s2216_s23 = smov 96  }
 0x127   : > { %1601 = vmatprep.subr.bf16.mxu1 %v2214_v0  ;;  %1593 = vmatprep.subr.bf16.mxu0 %v2214_v0  ;;  %v1826_v2 = vld [vmem:[#allocation8 + $0x8] sm:$0xff]   ;;  %v1538_v3 = vld [vmem:[#allocation10] ss:$0 sm:$0xff]  ;;  %vm538_vm1 = vcmask 261120   ;;  %v519_v7 = vld [vmem:[%s436_s16] sm:$0xf] }
 0x128   : > { %1605 = vmatprep.mubr.msk.bf16.mxu1 %vm2215_vm0, %v2214_v0  ;;  %1597 = vmatprep.mubr.msk.bf16.mxu0 %vm2215_vm0, %v2214_v0  ;;  %v2650_v4 = vld [vmem:[%s427_s7] sm:$0xf]  ;;  %s2217_s15 = smov 120   ;;  %vm648_vm2 = vcmask 64512   ;;  %s2218_s27 = smov 112   ;;  %vm713_vm3 = vcmask 1043456  }
 0x129   : > { %582 = vrot.lane.b32.xlu0 %v1825_v1, %s2216_s23  ;;  %1594 = vmatpush3.bf16.msra.mxu0 %v1825_v1  ;;  %v2684_v26 = vld [vmem:[%s444_s18] ss:$0 sm:$0xff]  ;;  %s2219_s17 = smov 88   ;;  %v639_v55 = vld [vmem:[#allocation11 + $0x4] sm:$0xf]  ;;  %s2220_s14 = smov 104  }
 0x12a   : > { %1595 = vmatprep.subr.bf16.mxu0 %v2214_v0  ;;  %588 = vrot.lane.b32.xlu1 %v1538_v3, %s2216_s23  ;;  %v874_v56 = vsel %vm713_vm3, %v639_v55, 0  ;;  %v638_v61 = vld [vmem:[#allocation11] sm:$0xf]  ;;  %s2221_s3 = smov 80   ;;  %s2222_s5 = smov 72   ;;  %vm1319_vm4 = vcmask 257024  }
 0x12b   : > { %v920_v1 = vsel %vm713_vm3, %v638_v61, 0  ;;  %s2882_s29 = sld [smem:[#allocation25_spill]]  ;;  %s511_s21 = scalar_lea.vmem [#allocation17], %s2611_s19 }
 0x12c   : > { %s1336_s26 = sshll.u32 %s511_s21, 4  ;;  %s2883_s1 = sld [smem:[#allocation34_spill]]  ;;  %s2764_s26 = int_to_ptr.vmem [resolvable:$true] %s1336_s26 }
 0x12d   : > { %584 = vrot.lane.b32.xlu0 %v1826_v2, %s2216_s23  ;;  %1596 = vmatpush3.bf16.msra.mxu0 %v1826_v2  ;;  %s1322_s12 = scalar_lea.sflag [#allocation4], %s2608_s9  ;;  %s2103_s24 = scalar_lea.vmem %s2764_s26, 64 }
 0x12e   : > { %1609 = vmatprep.subr.bf16.mxu0 %v2214_v0  ;;  %p2104_p11 = scmp.ne.s32.totalorder %s2764_s26, %s2103_s24  ;;  %p2884_p2 = scmp.ne.s32.totalorder %s2860_s28, 0 }
 0x12f   : > { %s2223_s19 = smov [#allocation17]  }
 0x130   : > { %1598 = vmatmul.mubr.msk.bf16.vlgmr.msra.gmra.mrb[0].mxu0 %vm538_vm1, %v2650_v4  ;;  %p2105_p12 = pnand %p2104_p11, %p2884_p2  ;;  %s2107_s16 = sshll.u32 %s2223_s19, 4  ;;  %s2108_s16 = int_to_ptr.vmem [resolvable:$false] %s2107_s16 }
 0x131   : > { %1611 = vmatprep.mubr.msk.bf16.mxu0 %vm2215_vm0, %v2214_v0  ;;  %s1560_s22 = sshll.u32 %s2882_s29, 6  ;;  %s2109_s18 = scalar_lea.vmem %s2108_s16, 128 }
 0x132   : > { %s2762_s7 = scalar_lea.hbm %s2883_s1, %s1560_s22  ;;  %p2106_p1 = pneg %p2105_p12 }
 0x133   : > { %p2110_p9 = scmp.lt.s32.totalorder %s2764_s26, %s2108_s16  ;;  %p2111_p10 = scmp.lt.s32.totalorder %s2109_s18, %s2103_s24 }
 0x135   : > { %p2112_p0 = por %p2111_p10, %p2110_p9 }
 0x137   : > { %p2113_p5 = pnand %p2112_p0, %p2106_p1 }
 0x19b   : > { %v583_v5 = vpop.permute.xlu0 %582 }
 0x19c   : > { %1602 = vmatpush3.bf16.msra.mxu1 %v583_v5  ;;  %v589_v15 = vpop.permute.xlu1 %588 }
 0x19d   : > { %1603 = vmatprep.subr.bf16.mxu1 %v2214_v0 }
 0x19f   : > { %v585_v6 = vpop.permute.xlu0 %584 }
 0x1a0   : > { %1604 = vmatpush3.bf16.msra.mxu1 %v585_v6 }
 0x1a1   : > { %1615 = vmatprep.subr.bf16.mxu1 %v2214_v0 }
 0x1a3   : > { %1606 = vmatmul.mubr.msk.bf16.vlgmr.msra.gmra.mrb[0].mxu1 %vm538_vm1, %v519_v7 }
 0x1a4   : > { %1617 = vmatprep.mubr.msk.bf16.mxu1 %vm2215_vm0, %v2214_v0 }
 0x203   : > { %v576_v8 = vpop.f32.mrb[0].mxu0 }
 0x204   : > { %v577_v9 = vadd.f32 %v1538_v3, %v576_v8  ;;  %v1599_v10 = vpop.f32.mrb[1].mxu0 }
 0x205   : > { %v579_v11 = vpop.f32.mrb[2].mxu0 }
 0x206   : > { %v635_v12 = vmul.f32 0.35355338, %v577_v9  ;;  %v1600_v13 = vpop.f32.mrb[3].mxu0 }
 0x208   : > { %v2664_v14 = vpack.c.bf16 %v635_v12, %v635_v12 }
 0x20a   : > { %759 = vrot.lane.b32.xlu0 %v2664_v14, %s2217_s15 }
 0x276   : > { %v628_v16 = vpop.f32.mrb[0].mxu1 }
 0x277   : > { %v629_v17 = vadd.f32 %v628_v16, %v589_v15  ;;  %v1607_v18 = vpop.f32.mrb[1].mxu1 }
 0x278   : > { %v631_v19 = vpop.f32.mrb[2].mxu1 }
 0x279   : > { %v2667_v20 = vpack.c.bf16 %v629_v17, %v629_v17  ;;  %v1608_v21 = vpop.f32.mrb[3].mxu1 }
 0x27b   : > { %761 = vrot.lane.b32.xlu1 %v2667_v20, %s2217_s15  ;;  %v653_v22 = vsel %vm648_vm2, %v2667_v20, 0 }
 0x27c   : > { %1610 = vmatpush3.bf16.xpose.msra.mxu0 %v653_v22  ;;  %v760_v25 = vpop.permute.xlu0 %759 }
 0x27d   : > { %1621 = vmatprep.subr.bf16.mxu0 %v2214_v0 }
 0x283   : > { %1612 = vmatmul.mubr.msk.bf16.vlgmr.msra.gmra.mrb[4].mxu0 %vm648_vm2, %v2664_v14 }
 0x284   : > { %1623 = vmatprep.mubr.msk.bf16.mxu0 %vm2215_vm0, %v2214_v0 }
 0x2ed   : > { %v762_v23 = vpop.permute.xlu1 %761 }
 0x2ee   : > { %v767_v24 = vsel %vm648_vm2, %v762_v23, 0 }
 0x2ef   : > { %1622 = vmatpush3.bf16.xpose.msra.mxu0 %v767_v24 }
 0x2f0   : > { %1633 = vmatprep.subr.bf16.mxu0 %v2214_v0 }
 0x2f6   : > { %1624 = vmatmul.mubr.msk.bf16.vlgmr.msra.gmra.mrb[8].mxu0 %vm648_vm2, %v760_v25 }
 0x2f7   : > { %1635 = vmatprep.mubr.msk.bf16.mxu0 %vm2215_vm0, %v2214_v0  ;;  %1634 = vmatpush3.bf16.msra.mxu0 %v874_v56 }
 0x2f8   : > { %1645 = vmatprep.subr.bf16.mxu0 %v2214_v0 }
 0x356   : > { %v689_v27 = vpop.f32.mrb[4].mxu0 }
 0x357   : > { %v690_v28 = vadd.f32 %v2684_v26, %v689_v27  ;;  %v1613_v29 = vpop.f32.mrb[5].mxu0 }
 0x358   : > { %v692_v30 = vpop.f32.mrb[6].mxu0 }
 0x359   : > { %v1614_v31 = vpop.f32.mrb[7].mxu0  ;;  %v695_v32 = vsel %vm648_vm2, %v690_v28, -inf }
 0x35a   : > { %696 = vmax.xlane.f32.xlu1 %v695_v32 }
 0x3c9   : > { %v803_v33 = vpop.f32.mrb[8].mxu0 }
 0x3ca   : > { %v804_v34 = vadd.f32 %v2684_v26, %v803_v33  ;;  %v1625_v35 = vpop.f32.mrb[9].mxu0 }
 0x3cb   : > { %v806_v36 = vpop.f32.mrb[10].mxu0 }
 0x3cc   : > { %v1626_v37 = vpop.f32.mrb[11].mxu0  ;;  %v809_v38 = vsel %vm648_vm2, %v804_v34, -inf }
 0x3cd   : > { %810 = vmax.xlane.f32.xlu0 %v809_v38 }
 0x3e7   : > { %v697_v39 = vpop.xlane.xlu1 %696 }
 0x3e8   : > { %v698_v40 = vsub.f32 %v690_v28, %v697_v39 }
 0x3ea   : > { %v699_v41 = vmul.f32 1.442695, %v698_v40 }
 0x3ec   : > { %1827 = vpow2.f32 %v699_v41 }
 0x3f6   : > { %v1828_v42 = vpop.eup %1827 }
 0x3f7   : > { %v701_v43 = vsel %vm648_vm2, %v1828_v42, 0.0 }
 0x3f8   : > { %702 = vadd.xlane.f32.xlu0 %v701_v43 }
 0x40e   : > { %708 = vrot.lane.b32.xlu0 %v2667_v20, %s2216_s23 }
 0x412   : > { %962 = vrot.lane.b32.xlu0 %v2664_v14, %s2218_s27 }
 0x45a   : > { %v811_v44 = vpop.xlane.xlu0 %810 }
 0x45b   : > { %v812_v45 = vsub.f32 %v804_v34, %v811_v44 }
 0x45d   : > { %v813_v46 = vmul.f32 1.442695, %v812_v45 }
 0x45f   : > { %1829 = vpow2.f32 %v813_v46 }
 0x469   : > { %v1830_v47 = vpop.eup %1829 }
 0x46a   : > { %v815_v48 = vsel %vm648_vm2, %v1830_v47, 0.0 }
 0x46b   : > { %816 = vadd.xlane.f32.xlu1 %v815_v48 }
 0x47c   : > { %821 = vrot.lane.b32.xlu1 %v2667_v20, %s2219_s17 }
 0x480   : > { %964 = vrot.lane.b32.xlu1 %v2667_v20, %s2218_s27 }
 0x485   : > { %v703_v49 = vpop.xlane.xlu0 %702 }
 0x486   : > { %1831 = vrcp.f32 %v703_v49 }
 0x489   : > { %v709_v50 = vpop.permute.xlu0 %708 }
 0x48a   : > { %v715_v51 = vsel %vm713_vm3, %v709_v50, 0 }
 0x48b   : > { %1616 = vmatpush3.bf16.msra.mxu1 %v715_v51 }
 0x48c   : > { %1627 = vmatprep.subr.bf16.mxu1 %v2214_v0 }
 0x48d   : > { %v963_v16 = vpop.permute.xlu0 %962 }
 0x490   : > { %v1832_v52 = vpop.eup %1831 }
 0x491   : > { %v705_v53 = vmul.f32 %v1832_v52, %v1828_v42 }
 0x493   : > { %v706_v54 = vpack.c.bf16 %v705_v53, %v705_v53 }
 0x495   : > { %1618 = vmatmul.mubr.msk.bf16.vlgmr.msra.gmra.mrb[4].mxu1 %vm648_vm2, %v706_v54 }
 0x496   : > { %1629 = vmatprep.mubr.msk.bf16.mxu1 %vm2215_vm0, %v2214_v0 }
 0x4f8   : > { %v817_v57 = vpop.xlane.xlu1 %816 }
 0x4f9   : > { %1833 = vrcp.f32 %v817_v57 }
 0x4fc   : > { %v822_v58 = vpop.permute.xlu1 %821 }
 0x4fd   : > { %v827_v59 = vsel %vm713_vm3, %v822_v58, 0 }
 0x4fe   : > { %1628 = vmatpush3.bf16.msra.mxu1 %v827_v59 }
 0x4ff   : > { %1639 = vmatprep.subr.bf16.mxu1 %v2214_v0 }
 0x500   : > { %v965_v8 = vpop.permute.xlu1 %964 }
 0x501   : > { %v970_v13 = vsel %vm648_vm2, %v965_v8, 0 }
 0x503   : > { %v1834_v60 = vpop.eup %1833 }
 0x504   : > { %v819_v62 = vmul.f32 %v1834_v60, %v1830_v47  ;;  %v640_v47 = vld [vmem:[#allocation11 + $0x8] sm:$0xf] }
 0x505   : > { %v1077_v48 = vsel %vm713_vm3, %v640_v47, 0 }
 0x506   : > { %v820_v63 = vpack.c.bf16 %v819_v62, %v819_v62 }
 0x508   : > { %1630 = vmatmul.mubr.msk.bf16.vlgmr.msra.gmra.mrb[8].mxu1 %vm648_vm2, %v820_v63 }
 0x509   : > { %1640 = vmatpush3.bf16.msra.mxu1 %v920_v1  ;;  %1641 = vmatprep.mubr.msk.bf16.mxu1 %vm2215_vm0, %v2214_v0 }
 0x50a   : > { %1651 = vmatprep.subr.bf16.mxu1 %v2214_v0 }
 0x568   : > { %v751_v2 = vpop.f32.mrb[4].mxu1 }
 0x569   : > { %v757_v3 = vpack.c.bf16 %v751_v2, %v751_v2  ;;  %v1619_v5 = vpop.f32.mrb[5].mxu1  ;;  %v641_v2 = vld [vmem:[#allocation11 + $0xc] sm:$0xf] }
 0x56a   : > { %v754_v6 = vpop.f32.mrb[6].mxu1 }
 0x56b   : > { %v1620_v7 = vpop.f32.mrb[7].mxu1  ;;  %1642 = vmatmul.mubr.msk.bf16.vlgmr.msra.gmra.mrb[12].mxu1 %vm648_vm2, %v757_v3  ;;  %v1235_v3 = vsel %vm713_vm3, %v641_v2, 0 }
 0x56c   : > { %1653 = vmatprep.mubr.msk.bf16.mxu1 %vm2215_vm0, %v2214_v0 }
 0x5db   : > { %v863_v9 = vpop.f32.mrb[8].mxu1 }
 0x5dc   : > { %v869_v10 = vpack.c.bf16 %v863_v9, %v863_v9  ;;  %v1631_v11 = vpop.f32.mrb[9].mxu1 }
 0x5dd   : > { %v866_v12 = vpop.f32.mrb[10].mxu1 }
 0x5de   : > { %v1632_v15 = vpop.f32.mrb[11].mxu1  ;;  %1636 = vmatmul.mubr.msk.bf16.vlgmr.msra.gmra.mrb[12].mxu0 %vm648_vm2, %v869_v10 }
 0x5df   : > { %1646 = vmatpush3.bf16.xpose.msra.mxu0 %v970_v13  ;;  %1647 = vmatprep.mubr.msk.bf16.mxu0 %vm2215_vm0, %v2214_v0 }
 0x5e0   : > { %1657 = vmatprep.subr.bf16.mxu0 %v2214_v0 }
 0x5e6   : > { %1648 = vmatmul.mubr.msk.bf16.vlgmr.msra.gmra.mrb[16].mxu0 %vm648_vm2, %v963_v16 }
 0x5e7   : > { %1659 = vmatprep.mubr.msk.bf16.mxu0 %vm2215_vm0, %v2214_v0  ;;  %1658 = vmatpush3.bf16.msra.mxu0 %v1077_v48 }
 0x5e8   : > { %1669 = vmatprep.subr.bf16.mxu0 %v2214_v0 }
 0x63e   : > { %v956_v17 = vpop.f32.mrb[12].mxu1 }
 0x63f   : > { %v1643_v18 = vpop.f32.mrb[13].mxu1 }
 0x640   : > { %v959_v19 = vpop.f32.mrb[14].mxu1 }
 0x641   : > { %v1644_v21 = vpop.f32.mrb[15].mxu1 }
 0x642   : > { %v1556_v21 = vld [vmem:[#allocation13] ss:$0 sm:$0xff] }
 0x6b1   : > { %v910_v22 = vpop.f32.mrb[12].mxu0 }
 0x6b2   : > { %v2722_v23 = vadd.f32 %v956_v17, %v910_v22  ;;  %v1637_v24 = vpop.f32.mrb[13].mxu0 }
 0x6b3   : > { %v913_v25 = vpop.f32.mrb[14].mxu0  ;;  %v1286_v24 = vunpack.c.l.bf16 %v2650_v4 }
 0x6b4   : > { %v1638_v27 = vpop.f32.mrb[15].mxu0 }
 0x6b9   : > { %v1006_v28 = vpop.f32.mrb[16].mxu0 }
 0x6ba   : > { %v1007_v29 = vadd.f32 %v2684_v26, %v1006_v28  ;;  %v1649_v30 = vpop.f32.mrb[17].mxu0 }
 0x6bb   : > { %v1009_v31 = vpop.f32.mrb[18].mxu0 }
 0x6bc   : > { %v1650_v32 = vpop.f32.mrb[19].mxu0  ;;  %v1012_v33 = vsel %vm648_vm2, %v1007_v29, -inf }
 0x6bd   : > { %1013 = vmax.xlane.f32.xlu1 %v1012_v33 }
 0x6ce   : > { %1122 = vrot.lane.b32.xlu1 %v2667_v20, %s2220_s14 }
 0x6d2   : > { %1120 = vrot.lane.b32.xlu1 %v2664_v14, %s2220_s14 }
 0x74a   : > { %v1014_v34 = vpop.xlane.xlu1 %1013 }
 0x74b   : > { %v1015_v35 = vsub.f32 %v1007_v29, %v1014_v34 }
 0x74d   : > { %v1016_v36 = vmul.f32 1.442695, %v1015_v35 }
 0x74e   : > { %v1123_v43 = vpop.permute.xlu1 %1122 }
 0x74f   : > { %1835 = vpow2.f32 %v1016_v36  ;;  %v1128_v45 = vsel %vm648_vm2, %v1123_v43, 0 }
 0x752   : > { %v1121_v46 = vpop.permute.xlu1 %1120 }
 0x759   : > { %v1836_v37 = vpop.eup %1835 }
 0x75a   : > { %v1018_v38 = vsel %vm648_vm2, %v1836_v37, 0.0 }
 0x75b   : > { %1019 = vadd.xlane.f32.xlu0 %v1018_v38 }
 0x771   : > { %1024 = vrot.lane.b32.xlu0 %v2667_v20, %s2221_s3 }
 0x7e8   : > { %v1020_v39 = vpop.xlane.xlu0 %1019 }
 0x7e9   : > { %1837 = vrcp.f32 %v1020_v39  ;;  %v1557_v39 = vld [vmem:[#allocation14] ss:$0 sm:$0xff] }
 0x7ec   : > { %v1025_v40 = vpop.permute.xlu0 %1024 }
 0x7ed   : > { %v1030_v41 = vsel %vm713_vm3, %v1025_v40, 0 }
 0x7ee   : > { %1652 = vmatpush3.bf16.msra.mxu1 %v1030_v41  ;;  %v1558_v41 = vld [vmem:[#allocation16] ss:$0 sm:$0xff] }
 0x7ef   : > { %1663 = vmatprep.subr.bf16.mxu1 %v2214_v0 }
 0x7f3   : > { %v1838_v14 = vpop.eup %1837 }
 0x7f4   : > { %v1022_v42 = vmul.f32 %v1838_v14, %v1836_v37 }
 0x7f6   : > { %v1023_v44 = vpack.c.bf16 %v1022_v42, %v1022_v42 }
 0x7f8   : > { %1654 = vmatmul.mubr.msk.bf16.vlgmr.msra.gmra.mrb[16].mxu1 %vm648_vm2, %v1023_v44 }
 0x7f9   : > { %1664 = vmatpush3.bf16.xpose.msra.mxu1 %v1128_v45  ;;  %1665 = vmatprep.mubr.msk.bf16.mxu1 %vm2215_vm0, %v2214_v0 }
 0x7fa   : > { %1675 = vmatprep.subr.bf16.mxu1 %v2214_v0 }
 0x800   : > { %1666 = vmatmul.mubr.msk.bf16.vlgmr.msra.gmra.mrb[20].mxu1 %vm648_vm2, %v1121_v46 }
 0x801   : > { %1677 = vmatprep.mubr.msk.bf16.mxu1 %vm2215_vm0, %v2214_v0  ;;  %1676 = vmatpush3.bf16.msra.mxu1 %v1235_v3 }
 0x8cb   : > { %v1066_v49 = vpop.f32.mrb[16].mxu1 }
 0x8cc   : > { %v1072_v50 = vpack.c.bf16 %v1066_v49, %v1066_v49  ;;  %v1655_v51 = vpop.f32.mrb[17].mxu1 }
 0x8cd   : > { %v1069_v52 = vpop.f32.mrb[18].mxu1 }
 0x8ce   : > { %v1656_v53 = vpop.f32.mrb[19].mxu1  ;;  %1660 = vmatmul.mubr.msk.bf16.vlgmr.msra.gmra.mrb[20].mxu0 %vm648_vm2, %v1072_v50 }
 0x8cf   : > { %1671 = vmatprep.mubr.msk.bf16.mxu0 %vm2215_vm0, %v2214_v0 }
 0x8d3   : > { %v1164_v54 = vpop.f32.mrb[20].mxu1 }
 0x8d4   : > { %v1165_v55 = vadd.f32 %v2684_v26, %v1164_v54  ;;  %v1667_v56 = vpop.f32.mrb[21].mxu1 }
 0x8d5   : > { %v1167_v57 = vpop.f32.mrb[22].mxu1 }
 0x8d6   : > { %v1668_v58 = vpop.f32.mrb[23].mxu1  ;;  %v1170_v59 = vsel %vm648_vm2, %v1165_v55, -inf }
 0x8d7   : > { %1171 = vmax.xlane.f32.xlu0 %v1170_v59 }
 0x8ed   : > { %1182 = vrot.lane.b32.xlu0 %v2667_v20, %s2222_s5 }
 0x964   : > { %v1172_v60 = vpop.xlane.xlu0 %1171 }
 0x965   : > { %v1173_v61 = vsub.f32 %v1165_v55, %v1172_v60 }
 0x967   : > { %v1174_v62 = vmul.f32 1.442695, %v1173_v61 }
 0x968   : > { %v1183_v63 = vpop.permute.xlu0 %1182 }
 0x969   : > { %1839 = vpow2.f32 %v1174_v62  ;;  %v1188_v1 = vsel %vm713_vm3, %v1183_v63, 0 }
 0x96a   : > { %1670 = vmatpush3.bf16.msra.mxu0 %v1188_v1 }
 0x973   : > { %v1840_v0 = vpop.eup %1839 }
 0x974   : > { %v1176_v26 = vsel %vm648_vm2, %v1840_v0, 0.0 }
 0x975   : > { %1177 = vadd.xlane.f32.xlu1 %v1176_v26 }
 0x9a1   : > { %v1113_v5 = vpop.f32.mrb[20].mxu0 }
 0x9a2   : > { %v1119_v6 = vadd.f32 %v1113_v5, %v2722_v23  ;;  %v1661_v20 = vpop.f32.mrb[21].mxu0 }
 0x9a3   : > { %v1116_v7 = vpop.f32.mrb[22].mxu0 }
 0x9a4   : > { %v1662_v8 = vpop.f32.mrb[23].mxu0 }
 0xa02   : > { %v1178_v9 = vpop.xlane.xlu1 %1177 }
 0xa03   : > { %1841 = vrcp.f32 %v1178_v9 }
 0xa0d   : > { %v1842_v10 = vpop.eup %1841 }
 0xa0e   : > { %v1180_v11 = vmul.f32 %v1842_v10, %v1840_v0 }
 0xa10   : > { %v1181_v12 = vpack.c.bf16 %v1180_v11, %v1180_v11 }
 0xa12   : > { %1672 = vmatmul.mubr.msk.bf16.vlgmr.msra.gmra.mrb[24].mxu0 %vm648_vm2, %v1181_v12 }
 0xae5   : > { %v1224_v13 = vpop.f32.mrb[24].mxu0 }
 0xae6   : > { %v1230_v15 = vpack.c.bf16 %v1224_v13, %v1224_v13  ;;  %v1673_v16 = vpop.f32.mrb[25].mxu0 }
 0xae7   : > { %v1227_v17 = vpop.f32.mrb[26].mxu0 }
 0xae8   : > { %v1674_v18 = vpop.f32.mrb[27].mxu0  ;;  %1678 = vmatmul.mubr.msk.bf16.vlgmr.msra.gmra.mrb[24].mxu1 %vm648_vm2, %v1230_v15 }
 0xbbb   : > { %v1271_v19 = vpop.f32.mrb[24].mxu1 }
 0xbbc   : > { %v1277_v22 = vadd.f32 %v1271_v19, %v1119_v6  ;;  %v1679_v23 = vpop.f32.mrb[25].mxu1 }
 0xbbd   : > { %v1274_v25 = vpop.f32.mrb[26].mxu1 }
 0xbbe   : > { %v1285_v27 = vadd.f32 %v1556_v21, %v1277_v22  ;;  %v1680_v28 = vpop.f32.mrb[27].mxu1 }
 0xbc0   : > { %v1287_v29 = vadd.f32 %v1286_v24, %v1285_v27 }
 0xbc2   : > { %v1288_v30 = vsel %vm538_vm1, %v1287_v29, 0.0 }
 0xbc3   : > { %1289 = vadd.xlane.f32.xlu1 %v1288_v30 }
 0xc50   : > { %v1290_v31 = vpop.xlane.xlu1 %1289 }
 0xc51   : > { %v1292_v32 = vmul.f32 0.03125, %v1290_v31 }
 0xc53   : > { %v1293_v33 = vsub.f32 %v1287_v29, %v1292_v32 }
 0xc55   : > { %v1294_v34 = vmul.f32 %v1293_v33, %v1293_v33 }
 0xc57   : > { %v1295_v35 = vsel %vm538_vm1, %v1294_v34, 0.0 }
 0xc58   : > { %1296 = vadd.xlane.f32.xlu1 %v1295_v35 }
 0xce5   : > { %v1297_v36 = vpop.xlane.xlu1 %1296 }
 0xce6   : > { %v1298_v37 = vmul.f32 0.03125, %v1297_v36 }
 0xce8   : > { %v1299_v38 = vadd.f32 1e-05, %v1298_v37 }
 0xcea   : > { %1843 = vrsqrt.f32 %v1299_v38 }
 0xcf4   : > { %v1844_v4 = vpop.eup %1843 }
 0xcf5   : > { %v1301_v40 = vmul.f32 %v1844_v4, %v1293_v33 }
 0xcf7   : > { %v1309_v14 = vmul.f32 %v1557_v39, %v1301_v40 }
 0xcf9   : > { %v1317_v42 = vadd.f32 %v1558_v41, %v1309_v14 }
 0xcfb   : > { %v1318_v43 = vpack.c.bf16 %v1317_v42, %v1317_v42 }
 0xcfd   : > { %1320 = vst.msk [vmem:[%s511_s21] sm:$0xf] %vm1319_vm4, %v1318_v43 }
 0xcfe   : > { %2116 = shalt.err (!%p2113_p5)
}
 0xcff   : > { %s2117_s9 = scalar_lea.hbm %s2762_s7, 64  ;;  %s2121_s27 = scalar_lea.hbm %s2883_s1, 128 }
 0xd00   : > { %p2118_p8 = scmp.ne.s32.totalorder %s2762_s7, %s2117_s9  ;;  %p2122_p4 = scmp.lt.u32.totalorder %s2762_s7, %s2883_s1 }
 0xd01   : > { %p2123_p7 = scmp.lt.u32.totalorder %s2121_s27, %s2117_s9  ;;  %p2125_p11 = scmp.lt.u32.totalorder %s2117_s9, %s2762_s7 }
 0xd02   : > { %p2119_p3 = pnand %p2118_p8, %p2884_p2 }
 0xd03   : > { %p2124_p6 = por %p2123_p7, %p2122_p4 }
 0xd04   : > { %p2120_p13 = pneg %p2119_p3 }
 0xd05   : > { %p2126_p12 = por %p2125_p11, %p2124_p6 }
 0xd07   : > { %p2127_p1 = pnand %p2126_p12, %p2120_p13 }
 0xd09   : > { %2130 = shalt.err (!%p2127_p1)
}
 0xd0a   : > { %1711 = dma.vmem_to_hbm [thread:$0]  (%p2884_p2), %s2764_s26, 64, %s2762_s7, %s1322_s12  }
 0xd0b PF: > { %s2885_s3 = sld [smem:[#allocation26_spill]]  ;;  %s1348_s5 = sand.u32 1, %s2181_s30  }
 0xd0c   : > { %p2886_p9 = scmp.ne.s32.totalorder %s2862_s20, 0  ;;  %s1349_s29 = scalar_lea.sflag [#allocation4], %s1348_s5 }
 0xd11   : > { %p2887_p10 = scmp.ge.s32.totalorder %s2885_s3, 2 }
 0xd13   : > { %p1743_p0 = pnand %p2887_p10, %p2886_p9 }
 0xd15   : > { %2176 = dma.done.wait (!%p1743_p0), %s1349_s29, 64  }
 0xd16   : > { %2178 = vsyncadd (!%p1743_p0), %s1349_s29, 4294967232  ;;  %s31_s14 = sadd.s32 1, %s2885_s3   ;;  %s2888_s22 = sld [smem:[#allocation24_spill]] }
 0xd17   : > { %p28_p5 = scmp.ge.s32.totalorder %s31_s14, 4   ;;  %s2889_s11 = sld [smem:[#allocation29_spill]] }
 0xd18   : > { %s2890_s28 = sld [smem:[#allocation28_spill]]  ;;  %s2891_s30 = smov %s2185_s10 }
 0xd19   : > { %s2893_s12 = smov %s2197_s13  ;;  %30 = sbr.rel (!%p28_p5) target bundleno = 17 (0x11), region = 149 }
 0xd1c   : > { %s2892_s10 = smov %s2888_s22 }
 0xd1e   : > { %s2894_s13 = smov %s2890_s28 }
 0xd20   :  { %1354 = vsyncpa [#allocation3], 1 }
 0xd21   :  { %1356 = vsyncpa [#allocation3 + $0x1], 1 }
 0xd22   :  { %1357 = vsyncpa [#allocation6], 1 }
 0xd23   :  { %1359 = vsyncpa [#allocation6 + $0x1], 1 }
 0xd24   :  { %1360 = vsyncpa [#allocation9], 1 }
 0xd25   :  { %1361 = vsyncpa [#allocation12], 1 }
 0xd26   :  { %1362 = vsyncpa [#allocation15], 1 }
 0xd27   :  { %1363 = vsyncpa [#allocation4], 1 }
 0xd28   :  { %1365 = vsyncpa [#allocation4 + $0x1], 1 }

// kernel: _lambda_.8
= control target key start
LH: loop header
LB: loop body
LE: loop exit
PB: predicated region body
PF: predicated region fallthrough
CT: control target
= control target key end

     0   :  { %s2752_s0 = inlined_call_operand.hbm [shape: bf16[2,8,32], index: 0, kind: input, shape index: {}, may-alias: {0,1}]   ;;  %s2753_s1 = inlined_call_operand.hbm [shape: bf16[2,8,32], index: 1, kind: input, shape index: {}, may-alias: {0,1}]   ;;  %s2754_s2 = inlined_call_operand.hbm [shape: f32[2,1,8], index: 2, kind: input, shape index: {}]   ;;  %s2755_s3 = inlined_call_operand.hbm [shape: bf16[32,96], index: 3, kind: input, shape index: {}]   ;;  %s2756_s4 = inlined_call_operand.hbm [shape: f32[1,96], index: 4, kind: input, shape index: {}]   ;;  %s2757_s5 = inlined_call_operand.hbm [shape: bf16[32,32], index: 5, kind: input, shape index: {}]   ;;  %s2758_s6 = inlined_call_operand.hbm [shape: f32[1,32], index: 6, kind: input, shape index: {}]   ;;  %s2759_s7 = inlined_call_operand.hbm [shape: f32[1,32], index: 7, kind: input, shape index: {}]   ;;  %s2760_s8 = inlined_call_operand.hbm [shape: f32[1,32], index: 8, kind: input, shape index: {}]   ;;  %s2761_s9 = inlined_call_operand.hbm [shape: bf16[2,8,32], index: 9, kind: output, shape index: {}]  }
   0x1   :  { %2782 = sst [smem:[#allocation30_spill]] %s2753_s1 }
   0x2   :  { %2783 = sst [smem:[#allocation31_spill]] %s2755_s3 }
   0x3   :  { %2784 = sst [smem:[#allocation32_spill]] %s2757_s5 }
   0x4   :  { %2785 = sst [smem:[#allocation33_spill]] %s2759_s7 }
   0x5   :  { %2786 = sst [smem:[#allocation34_spill]] %s2761_s9 }
   0x6   :  { %14 = vsyncpa [#allocation3], 0 }
   0x7   :  { %16 = vsyncpa [#allocation3 + $0x1], 0 }
   0x8   :  { %17 = vsyncpa [#allocation6], 0 }
   0x9   :  { %19 = vsyncpa [#allocation6 + $0x1], 0 }
   0xa   :  { %20 = vsyncpa [#allocation9], 0 }
   0xb   :  { %21 = vsyncpa [#allocation12], 0 }
   0xc   :  { %22 = vsyncpa [#allocation15], 0 }
   0xd   :  { %23 = vsyncpa [#allocation4], 0 }
   0xe   :  { %25 = vsyncpa [#allocation4 + $0x1], 0  ;;  %s2228_s30 = smov 0   ;;  %s2230_s10 = smov 0  }
   0xf   :  { %s2232_s11 = smov 0   ;;  %s2234_s12 = smov 0  }
  0x10   :  { %s2236_s13 = smov 0   ;;  %s2238_s14 = smov 0  }
  0x11 LB: > { %2787 = sst [smem:[#allocation24_spill]] %s2139_s11  ;;  %s2259_s15 = sadd.s32 4294967295, %s2151_s14   ;;  %s2151_s14 = sphi %s2238_s14, %s31_s14   ;;  %s2147_s13 = sphi %s2236_s13, %s2836_s13   ;;  %s2143_s12 = sphi %s2234_s12, %s2835_s12   ;;  %s2139_s11 = sphi %s2232_s11, %s2834_s11   ;;  %s2135_s10 = sphi %s2230_s10, %s2833_s10   ;;  %s2131_s30 = sphi %s2228_s30, %s2832_s30  }
  0x12   : > { %2788 = sst [smem:[#allocation25_spill]] %s2143_s12  ;;  %p1474_p0 = scmp.ge.s32.totalorder %s2151_s14, 1 }
  0x13   : > { %2789 = sst [smem:[#allocation26_spill]] %s2151_s14  ;;  %p2764_p1 = scmp.eq.s32.totalorder %s2259_s15, 0 }
  0x14   : > { %p282_p2 = scmp.lt.s32.totalorder %s2151_s14, 3  ;;  %s2153_s17 = smov [#allocation8]  }
  0x15   : > { %s294_s18 = sshll.u32 %s2153_s17, 4  ;;  %s2154_s20 = smov [#allocation11]   ;;  %s2268_s18 = int_to_ptr.vmem [resolvable:$true] %s294_s18 }
  0x16   : > { %p2264_p3 = pnand %p1474_p0, %p282_p2  ;;  %s318_s21 = sshll.u32 %s2154_s20, 4  ;;  %s2279_s21 = int_to_ptr.vmem [resolvable:$true] %s318_s21 }
  0x17   : > { %s2155_s22 = smov [#allocation14]   ;;  %s2793_s3 = sld [smem:[#allocation31_spill]] }
  0x18   : > { %s2790_s16 = scalar_select %p2264_p3, 1, 0 }
  0x19   : > { %p1659_p4 = pneg %p2264_p3  ;;  %s2281_s23 = sshll.u32 %s2155_s22, 4  ;;  %s344_s23 = int_to_ptr.vmem [resolvable:$true] %s2281_s23 }
  0x1a   : > { %2791 = sst [smem:[#allocation27_spill]] %s2790_s16 }
  0x1b   : > { %p2275_p6 = pnand %p1659_p4, %p2764_p1 }
  0x1d   : > { %s2792_s19 = scalar_select %p2275_p6, 1, 0 }
  0x1e   : > { %s1795_s26 = scalar_lea.hbm %s2793_s3, 256  ;;  %p2291_p8 = pneg %p2275_p6 }
  0x1f   : > { %p1796_p7 = scmp.ne.s32.totalorder %s2793_s3, %s1795_s26  ;;  %p1802_p11 = scmp.lt.u32.totalorder %s1795_s26, %s2793_s3 }
  0x20   : > { %s2794_s29 = scalar_select %p2291_p8, 1, 0 }
  0x21   : > { %p1798_p9 = pnand %p2291_p8, %p1796_p7 }
  0x23   : > { %p1799_p10 = pneg %p1798_p9 }
  0x25   : > { %p1804_p12 = pnand %p1802_p11, %p1799_p10 }
  0x27   : > { %1807 = shalt.err (!%p1804_p12)
}
  0x28   : > { %s1808_s22 = scalar_lea.vmem %s2268_s18, 256  ;;  %p1816_p4 = scmp.lt.s32.totalorder %s2268_s18, %s2268_s18 }
  0x29   : > { %p1809_p13 = scmp.ne.s32.totalorder %s2268_s18, %s1808_s22  ;;  %p1817_p5 = scmp.lt.s32.totalorder %s1808_s22, %s1808_s22 }
  0x2b   : > { %p1811_p0 = pnand %p1809_p13, %p2291_p8  ;;  %p1818_p7 = por %p1817_p5, %p1816_p4 }
  0x2d   : > { %p1812_p2 = pneg %p1811_p0 }
  0x2f   : > { %p1819_p9 = pnand %p1818_p7, %p1812_p2 }
  0x31   : > { %1822 = shalt.err (!%p1819_p9)
}
  0x32   : > { %s2156_s24 = smov 64   ;;  %s2157_s25 = smov 4  }
  0x33   : > { %1662 = dma.hbm_to_vmem [thread:$0]  (!%p2275_p6), %s2793_s3, 256, %s2268_s18, [#allocation9], %s2156_s24, %s2156_s24, %s2157_s25  }
  0x34   : > { %s2795_s5 = sld [smem:[#allocation32_spill]] }
  0x3a   : > { %s1823_s20 = scalar_lea.hbm %s2795_s5, 256 }
  0x3b   : > { %p1824_p5 = scmp.ne.s32.totalorder %s2795_s5, %s1823_s20  ;;  %p1830_p12 = scmp.lt.u32.totalorder %s1823_s20, %s2795_s5 }
  0x3d   : > { %p1826_p10 = pnand %p1824_p5, %p2291_p8 }
  0x3f   : > { %p1827_p11 = pneg %p1826_p10 }
  0x41   : > { %p1832_p13 = pnand %p1830_p12, %p1827_p11 }
  0x43   : > { %1835 = shalt.err (!%p1832_p13)
}
  0x44   : > { %s1836_s18 = scalar_lea.vmem %s2279_s21, 256  ;;  %p1844_p7 = scmp.lt.s32.totalorder %s2279_s21, %s2279_s21 }
  0x45   : > { %p1837_p0 = scmp.ne.s32.totalorder %s2279_s21, %s1836_s18  ;;  %p1845_p9 = scmp.lt.s32.totalorder %s1836_s18, %s1836_s18 }
  0x47   : > { %p1839_p2 = pnand %p1837_p0, %p2291_p8  ;;  %p1846_p5 = por %p1845_p9, %p1844_p7 }
  0x49   : > { %p1840_p4 = pneg %p1839_p2 }
  0x4b   : > { %p1847_p10 = pnand %p1846_p5, %p1840_p4 }
  0x4d   : > { %1850 = shalt.err (!%p1847_p10)
}
  0x4e   : > { %1668 = dma.hbm_to_vmem [thread:$0]  (!%p2275_p6), %s2795_s5, 256, %s2279_s21, [#allocation12], %s2156_s24, %s2156_s24, %s2157_s25  }
  0x4f   : > { %s2796_s7 = sld [smem:[#allocation33_spill]] }
  0x55   : > { %s1851_s27 = scalar_lea.hbm %s2796_s7, 16 }
  0x56   : > { %p1852_p11 = scmp.ne.s32.totalorder %s2796_s7, %s1851_s27  ;;  %p1858_p0 = scmp.lt.u32.totalorder %s1851_s27, %s2796_s7 }
  0x58   : > { %p1854_p12 = pnand %p1852_p11, %p2291_p8 }
  0x5a   : > { %p1855_p13 = pneg %p1854_p12 }
  0x5c   : > { %p1860_p2 = pnand %p1858_p0, %p1855_p13 }
  0x5e   : > { %1863 = shalt.err (!%p1860_p2)
}
  0x5f   : > { %s1864_s18 = scalar_lea.vmem %s344_s23, 16  ;;  %s1871_s21 = scalar_lea.vmem %s344_s23, 32 }
  0x60   : > { %p1865_p4 = scmp.ne.s32.totalorder %s344_s23, %s1864_s18  ;;  %p1872_p5 = scmp.lt.s32.totalorder %s344_s23, %s344_s23 }
  0x61   : > { %p1873_p10 = scmp.lt.s32.totalorder %s1871_s21, %s1864_s18 }
  0x62   : > { %p1867_p7 = pnand %p1865_p4, %p2291_p8 }
  0x63   : > { %p1874_p1 = por %p1873_p10, %p1872_p5 }
  0x64   : > { %p1868_p9 = pneg %p1867_p7 }
  0x66   : > { %p1875_p3 = pnand %p1874_p1, %p1868_p9 }
  0x68   : > { %1878 = shalt.err (!%p1875_p3)
}
  0x69   : > { %1674 = dma.hbm_to_vmem [thread:$0]  (!%p2275_p6), %s2796_s7, 16, %s344_s23, [#allocation15]  }
  0x6a   : > { %s1473_s9 = sadd.s32 4294967294, %s2151_s14   ;;  %s43_s12 = sadd.s32 1, %s2147_s13 }
  0x6b   : > { %s52_s16 = sadd.s32 1, %s2139_s11  ;;  %p45_p1 = scmp.ge.s32.totalorder %s43_s12, 2 }
  0x6c   : > { %p59_p3 = scmp.ne.s32.totalorder %s2139_s11, %s2135_s10  ;;  %p60_p11 = scmp.eq.s32.totalorder %s2151_s14, 0 }
  0x6d   : > { %p65_p12 = scmp.ne.s32.totalorder %s2135_s10, %s2131_s30  ;;  %s2838_s12 = smov (%p45_p1, %s43_s12), 0 }
  0x6e   : > { %2797 = sst [smem:[#allocation28_spill]] %s2838_s12  ;;  %p2364_p13 = por %p60_p11, %p59_p3 }
  0x6f   : > { %p2799_p0 = scmp.eq.s32.totalorder %s2259_s15, 0  ;;  %s47_s27 = ssub.s32 %s2147_s13, %s2838_s12 }
  0x70   : > { %p269_p4 = scmp.eq.s32.totalorder %s2259_s15, 1  ;;  %p50_p7 = scmp.eq.s32.totalorder %s47_s27, 0 }
  0x71   : > { %p2370_p2 = por %p2799_p0, %p65_p12  ;;  %p275_p9 = scmp.eq.s32.totalorder %s1473_s9, 1 }
  0x72   : > { %p2377_p5 = por %p269_p4, %p59_p3  ;;  %p1698_p10 = scmp.lt.s32.totalorder %s2151_s14, 2 }
  0x73   : > { %s2800_s23 = scalar_select %p2370_p2, 1, 0 }
  0x74   : > { %s2801_s28 = scalar_select %p2377_p5, 1, 0 }
  0x75   : > { %s2383_s17 = scalar_select %p50_p7, %s2139_s11, %s52_s16  }
  0x76   : > { %p2385_p1 = por %p275_p9, %p65_p12  ;;  %s2390_s22 = sand.u32 1, %s2139_s11  }
  0x77   : > { %2802 = sst [smem:[#allocation29_spill]] %s2383_s17  ;;  %s2767_s18 = sshll.u32 %s2390_s22, 2 }
  0x78   : > { %s2803_s20 = scalar_select %p2385_p1, 1, 0 }
  0x79   : > { %s2768_s21 = sshll.u32 %s2147_s13, 6  ;;  %p2396_p11 = pnand %p1698_p10, %p2364_p13 }
  0x7a   : > { %s384_s25 = sand.u32 1, %s2151_s14   ;;  %s2805_s1 = sld [smem:[#allocation30_spill]] }
  0x7b   : > { %s2804_s24 = scalar_select %p2396_p11, 1, 0 }
  0x7c   : > { %s388_s3 = scalar_lea.vmem [#allocation5], %s2767_s18  ;;  %s2158_s26 = smov [#allocation10]  }
  0x7d   : > { %s395_s5 = sshll.u32 %s388_s3, 4  ;;  %s2412_s7 = sshll.u32 %s2158_s26, 4  ;;  %s2410_s5 = int_to_ptr.vmem [resolvable:$true] %s395_s5  ;;  %s309_s7 = int_to_ptr.vmem [resolvable:$true] %s2412_s7 }
  0x7e   : > { %s2414_s12 = scalar_lea.sflag [#allocation6], %s384_s25  ;;  %p2420_p12 = pneg %p2396_p11 }
  0x80   : > { %s2406_s27 = scalar_lea.hbm %s2805_s1, %s2768_s21  ;;  %s1884_s18 = scalar_lea.hbm %s2805_s1, 128 }
  0x81   : > { %s1879_s17 = scalar_lea.hbm %s2406_s27, 64  ;;  %p1885_p4 = scmp.lt.u32.totalorder %s2406_s27, %s2805_s1 }
  0x82   : > { %p1880_p3 = scmp.ne.s32.totalorder %s2406_s27, %s1879_s17  ;;  %p1886_p7 = scmp.lt.u32.totalorder %s1884_s18, %s1879_s17 }
  0x83   : > { %s2806_s9 = scalar_select %p2420_p12, 1, 0 }
  0x84   : > { %p1882_p13 = pnand %p2420_p12, %p1880_p3  ;;  %p1887_p9 = por %p1886_p7, %p1885_p4 }
  0x85   : > { %p1888_p10 = scmp.lt.u32.totalorder %s1879_s17, %s2406_s27 }
  0x86   : > { %p1883_p0 = pneg %p1882_p13 }
  0x87   : > { %p1889_p1 = por %p1888_p10, %p1887_p9 }
  0x89   : > { %p1890_p5 = pnand %p1889_p1, %p1883_p0 }
  0x8b   : > { %1893 = shalt.err (!%p1890_p5)
}
  0x8c   : > { %s1894_s25 = scalar_lea.vmem %s2410_s5, 64  ;;  %s2159_s16 = smov [#allocation5]  }
  0x8d   : > { %p1895_p3 = scmp.ne.s32.totalorder %s2410_s5, %s1894_s25  ;;  %s1899_s3 = sshll.u32 %s2159_s16, 4  ;;  %s1900_s3 = int_to_ptr.vmem [resolvable:$false] %s1899_s3 }
  0x8e   : > { %s1901_s21 = scalar_lea.vmem %s1900_s3, 128  ;;  %p1902_p6 = scmp.lt.s32.totalorder %s2410_s5, %s1900_s3 }
  0x8f   : > { %p1897_p13 = pnand %p1895_p3, %p2420_p12  ;;  %p1903_p8 = scmp.lt.s32.totalorder %s1901_s21, %s1894_s25 }
  0x91   : > { %p1898_p2 = pneg %p1897_p13  ;;  %p1904_p4 = por %p1903_p8, %p1902_p6 }
  0x93   : > { %p1905_p7 = pnand %p1904_p4, %p1898_p2 }
  0x95   : > { %1908 = shalt.err (!%p1905_p7)
}
  0x96   : > { %1684 = dma.hbm_to_vmem [thread:$0]  (!%p2396_p11), %s2406_s27, 64, %s2410_s5, %s2414_s12  }
  0x97   : > { %s1909_s26 = scalar_lea.hbm %s2756_s4, 16  ;;  %p2807_p6 = scmp.ne.s32.totalorder %s2794_s29, 0 }
  0x98   : > { %p1910_p5 = scmp.ne.s32.totalorder %s2756_s4, %s1909_s26  ;;  %p1916_p1 = scmp.lt.u32.totalorder %s1909_s26, %s2756_s4 }
  0x9a   : > { %p1912_p8 = pnand %p1910_p5, %p2807_p6 }
  0x9c   : > { %p1913_p2 = pneg %p1912_p8 }
  0x9e   : > { %p1918_p0 = pnand %p1916_p1, %p1913_p2 }
  0xa0   : > { %1921 = shalt.err (!%p1918_p0)
}
  0xa1   : > { %s1922_s21 = scalar_lea.vmem %s309_s7, 16  ;;  %s1929_s5 = scalar_lea.vmem %s309_s7, 32 }
  0xa2   : > { %p1923_p9 = scmp.ne.s32.totalorder %s309_s7, %s1922_s21  ;;  %p1930_p13 = scmp.lt.s32.totalorder %s309_s7, %s309_s7 }
  0xa3   : > { %p1931_p4 = scmp.lt.s32.totalorder %s1929_s5, %s1922_s21 }
  0xa4   : > { %p1925_p10 = pnand %p1923_p9, %p2807_p6 }
  0xa5   : > { %p1932_p7 = por %p1931_p4, %p1930_p13 }
  0xa6   : > { %p1926_p3 = pneg %p1925_p10 }
  0xa8   : > { %p1933_p11 = pnand %p1932_p7, %p1926_p3 }
  0xaa   : > { %1936 = shalt.err (!%p1933_p11)
}
  0xab   : > { %p2808_p5 = scmp.ne.s32.totalorder %s2792_s19, 0  ;;  %s2160_s17 = smov [#allocation13]  }
  0xac   : > { %s332_s18 = sshll.u32 %s2160_s17, 4  ;;  %s2161_s26 = smov [#allocation16]   ;;  %s333_s18 = int_to_ptr.vmem [resolvable:$true] %s332_s18 }
  0xad   : > { %1665 = dma.hbm_to_vmem [thread:$0]  (!%p2808_p5), %s2756_s4, 16, %s309_s7, [#allocation9]  }
  0xae   : > { %s354_s16 = sshll.u32 %s2161_s26, 4  ;;  %s1937_s11 = scalar_lea.hbm %s2758_s6, 16  ;;  %s355_s16 = int_to_ptr.vmem [resolvable:$true] %s354_s16 }
  0xaf   : > { %p1938_p11 = scmp.ne.s32.totalorder %s2758_s6, %s1937_s11  ;;  %p1944_p1 = scmp.lt.u32.totalorder %s1937_s11, %s2758_s6 }
  0xb1   : > { %p1940_p8 = pnand %p1938_p11, %p2807_p6 }
  0xb3   : > { %p1941_p2 = pneg %p1940_p8 }
  0xb5   : > { %p1946_p0 = pnand %p1944_p1, %p1941_p2 }
  0xb7   : > { %1949 = shalt.err (!%p1946_p0)
}
  0xb8   : > { %s1950_s7 = scalar_lea.vmem %s333_s18, 16  ;;  %s1957_s27 = scalar_lea.vmem %s333_s18, 32 }
  0xb9   : > { %p1951_p9 = scmp.ne.s32.totalorder %s333_s18, %s1950_s7  ;;  %p1958_p13 = scmp.lt.s32.totalorder %s333_s18, %s333_s18 }
  0xba   : > { %p1959_p4 = scmp.lt.s32.totalorder %s1957_s27, %s1950_s7 }
  0xbb   : > { %p1953_p10 = pnand %p1951_p9, %p2807_p6 }
  0xbc   : > { %p1960_p7 = por %p1959_p4, %p1958_p13 }
  0xbd   : > { %p1954_p3 = pneg %p1953_p10 }
  0xbf   : > { %p1961_p12 = pnand %p1960_p7, %p1954_p3 }
  0xc1   : > { %1964 = shalt.err (!%p1961_p12)
}
  0xc2   : > { %1671 = dma.hbm_to_vmem [thread:$0]  (!%p2808_p5), %s2758_s6, 16, %s333_s18, [#allocation12]  }
  0xc3   : > { %s1965_s25 = scalar_lea.hbm %s2760_s8, 16 }
  0xc4   : > { %p1966_p11 = scmp.ne.s32.totalorder %s2760_s8, %s1965_s25  ;;  %p1972_p12 = scmp.lt.u32.totalorder %s1965_s25, %s2760_s8 }
  0xc6   : > { %p1968_p8 = pnand %p1966_p11, %p2807_p6 }
  0xc8   : > { %p1969_p2 = pneg %p1968_p8 }
  0xca   : > { %p1974_p1 = pnand %p1972_p12, %p1969_p2 }
  0xcc   : > { %1977 = shalt.err (!%p1974_p1)
}
  0xcd   : > { %s1978_s7 = scalar_lea.vmem %s355_s16, 16  ;;  %s1985_s18 = scalar_lea.vmem %s355_s16, 32 }
  0xce   : > { %p1979_p0 = scmp.ne.s32.totalorder %s355_s16, %s1978_s7  ;;  %p1986_p3 = scmp.lt.s32.totalorder %s355_s16, %s355_s16 }
  0xcf   : > { %p1987_p13 = scmp.lt.s32.totalorder %s1985_s18, %s1978_s7 }
  0xd0   : > { %p1981_p9 = pnand %p1979_p0, %p2807_p6 }
  0xd1   : > { %p1988_p4 = por %p1987_p13, %p1986_p3 }
  0xd2   : > { %p1982_p10 = pneg %p1981_p9 }
  0xd4   : > { %p1989_p7 = pnand %p1988_p4, %p1982_p10 }
  0xd6   : > { %1992 = shalt.err (!%p1989_p7)
}
  0xd7   : > { %1677 = dma.hbm_to_vmem [thread:$0]  (!%p2808_p5), %s2760_s8, 16, %s355_s16, [#allocation15]  }
  0xd8   : > { %s2809_s29 = sshll.u32 %s2147_s13, 6  ;;  %s2810_s25 = sshll.u32 %s2390_s22, 2 }
  0xd9   : > { %s2504_s14 = scalar_lea.hbm %s2752_s0, %s2809_s29  ;;  %s369_s19 = scalar_lea.vmem [#allocation2], %s2810_s25 }
  0xda   : > { %s377_s3 = sshll.u32 %s369_s19, 4  ;;  %s1486_s21 = sshll.u32 %s2147_s13, 4  ;;  %s2508_s3 = int_to_ptr.vmem [resolvable:$true] %s377_s3 }
  0xdb   : > { %s366_s5 = scalar_lea.sflag [#allocation3], %s2390_s22  ;;  %s1993_s1 = scalar_lea.hbm %s2504_s14, 64 }
  0xdc   : > { %p1994_p6 = scmp.ne.s32.totalorder %s2504_s14, %s1993_s1  ;;  %p2811_p5 = scmp.ne.s32.totalorder %s2806_s9, 0 }
  0xdd   : > { %s1998_s18 = scalar_lea.hbm %s2752_s0, 128  ;;  %p1999_p2 = scmp.lt.u32.totalorder %s2504_s14, %s2752_s0 }
  0xde   : > { %p1996_p11 = pnand %p1994_p6, %p2811_p5  ;;  %p2000_p12 = scmp.lt.u32.totalorder %s1998_s18, %s1993_s1 }
  0xdf   : > { %p2002_p0 = scmp.lt.u32.totalorder %s1993_s1, %s2504_s14 }
  0xe0   : > { %p1997_p8 = pneg %p1996_p11  ;;  %p2001_p1 = por %p2000_p12, %p1999_p2 }
  0xe2   : > { %p2003_p9 = por %p2002_p0, %p2001_p1 }
  0xe4   : > { %p2004_p10 = pnand %p2003_p9, %p1997_p8 }
  0xe6   : > { %2007 = shalt.err (!%p2004_p10)
}
  0xe7   : > { %s2008_s29 = scalar_lea.vmem %s2508_s3, 64  ;;  %s2162_s26 = smov [#allocation2]  }
  0xe8   : > { %p2009_p3 = scmp.ne.s32.totalorder %s2508_s3, %s2008_s29  ;;  %s2013_s11 = sshll.u32 %s2162_s26, 4  ;;  %s2014_s11 = int_to_ptr.vmem [resolvable:$false] %s2013_s11 }
  0xe9   : > { %s2015_s25 = scalar_lea.vmem %s2014_s11, 128  ;;  %p2016_p7 = scmp.lt.s32.totalorder %s2508_s3, %s2014_s11 }
  0xea   : > { %p2011_p13 = pnand %p2009_p3, %p2811_p5  ;;  %p2017_p6 = scmp.lt.s32.totalorder %s2015_s25, %s2008_s29 }
  0xec   : > { %p2012_p4 = pneg %p2011_p13  ;;  %p2018_p11 = por %p2017_p6, %p2016_p7 }
  0xee   : > { %p2019_p2 = pnand %p2018_p11, %p2012_p4 }
  0xf0   : > { %2022 = shalt.err (!%p2019_p2)
}
  0xf1   : > { %p2812_p8 = scmp.ne.s32.totalorder %s2804_s24, 0  ;;  %s2538_s16 = scalar_lea.hbm %s2754_s2, %s1486_s21 }
  0xf2   : > { %s405_s7 = scalar_lea.vmem [#allocation7], %s2390_s22  ;;  %s2023_s27 = scalar_lea.hbm %s2538_s16, 16 }
  0xf3   : > { %1681 = dma.hbm_to_vmem [thread:$0]  (!%p2812_p8), %s2504_s14, 64, %s2508_s3, %s366_s5  }
  0xf4   : > { %s412_s18 = sshll.u32 %s405_s7, 4  ;;  %p2024_p12 = scmp.ne.s32.totalorder %s2538_s16, %s2023_s27  ;;  %s413_s18 = int_to_ptr.vmem [resolvable:$true] %s412_s18 }
  0xf5   : > { %s2028_s3 = scalar_lea.hbm %s2754_s2, 32  ;;  %p2029_p9 = scmp.lt.u32.totalorder %s2538_s16, %s2754_s2 }
  0xf6   : > { %p2026_p1 = pnand %p2024_p12, %p2811_p5  ;;  %p2030_p10 = scmp.lt.u32.totalorder %s2028_s3, %s2023_s27 }
  0xf7   : > { %p2032_p13 = scmp.lt.u32.totalorder %s2023_s27, %s2538_s16 }
  0xf8   : > { %p2027_p0 = pneg %p2026_p1  ;;  %p2031_p3 = por %p2030_p10, %p2029_p9 }
  0xfa   : > { %p2033_p4 = por %p2032_p13, %p2031_p3 }
  0xfc   : > { %p2034_p7 = pnand %p2033_p4, %p2027_p0 }
  0xfe   : > { %2037 = shalt.err (!%p2034_p7)
}
  0xff   : > { %s2038_s22 = scalar_lea.vmem %s413_s18, 16  ;;  %s2163_s21 = smov [#allocation7]  }
 0x100   : > { %p2039_p6 = scmp.ne.s32.totalorder %s413_s18, %s2038_s22  ;;  %s2043_s26 = sshll.u32 %s2163_s21, 4  ;;  %s2044_s26 = int_to_ptr.vmem [resolvable:$false] %s2043_s26 }
 0x101   : > { %s2045_s11 = scalar_lea.vmem %s2044_s26, 32  ;;  %p2046_p12 = scmp.lt.s32.totalorder %s413_s18, %s2044_s26 }
 0x102   : > { %p2041_p11 = pnand %p2039_p6, %p2811_p5  ;;  %p2047_p1 = scmp.lt.s32.totalorder %s2045_s11, %s2038_s22 }
 0x104   : > { %p2042_p2 = pneg %p2041_p11  ;;  %p2048_p8 = por %p2047_p1, %p2046_p12 }
 0x106   : > { %p2049_p9 = pnand %p2048_p8, %p2042_p2 }
 0x108   : > { %2052 = shalt.err (!%p2049_p9)
}
 0x109   : > { %p2813_p10 = scmp.ne.s32.totalorder %s2804_s24, 0  ;;  %s2814_s25 = sld [smem:[#allocation27_spill]] }
 0x10b   : > { %1687 = dma.hbm_to_vmem [thread:$0]  (!%p2813_p10), %s2538_s16, 16, %s413_s18, %s2414_s12  }
 0x10f   : > { %p2815_p0 = scmp.ne.s32.totalorder %s2814_s25, 0 }
 0x110   : > { %s2562_s9 = sand.u32 (!%p2815_p0), 1, %s2135_s10   ;;  %p2816_p5 = scmp.ne.s32.totalorder (!%p2815_p0), %s2800_s23, 0 }
 0x111   : > { %421 = sbr.rel (%p2815_p0) target bundleno = 3232 (0xca0), region = 56  ;;  %s1488_s19 = sshll.u32 (!%p2815_p0), %s2562_s9, 2 }
 0x112   : > { %s424_s1 = scalar_lea.sflag (!%p2815_p0), [#allocation3], %s2562_s9  ;;  %s427_s7 = scalar_lea.vmem (!%p2815_p0), [#allocation2], %s1488_s19 }
 0x118   : > { %2106 = dma.done.wait (%p2816_p5), %s424_s1, 64  }
 0x119   : > { %2108 = vsyncadd (%p2816_p5), %s424_s1, 4294967232  ;;  %s432_s12 = sand.u32 1, %s2259_s15  }
 0x11a   : > { %s433_s24 = scalar_lea.sflag [#allocation6], %s432_s12 }
 0x11b   : > { %2110 = dma.done.wait (%p2816_p5), %s433_s24, 80  }
 0x11c   : > { %2112 = vsyncadd (%p2816_p5), %s433_s24, 4294967216  ;;  %s444_s16 = scalar_lea.vmem [#allocation7], %s2562_s9  ;;  %p2817_p8 = scmp.eq.s32.totalorder %s2259_s15, 0 }
 0x11e   : > { %2114 = dma.done.wait (%p2817_p8), [#allocation9], 272   ;;  %p2818_p3 = pmov %p2817_p8 }
 0x120   : > { %2116 = vsyncadd (%p2818_p3), [#allocation9], 4294967024  ;;  %p2819_p13 = pmov %p2818_p3 }
 0x121   : > { %p2820_p4 = pmov %p2818_p3 }
 0x122   : > { %2118 = dma.done.wait (%p2819_p13), [#allocation12], 272  }
 0x123   : > { %2120 = vsyncadd (%p2820_p4), [#allocation12], 4294967024  ;;  %p2821_p7 = pmov %p2818_p3 }
 0x124   : > { %p2822_p6 = pmov %p2818_p3 }
 0x125   : > { %2122 = dma.done.wait (%p2821_p7), [#allocation15], 32  }
 0x126   : > { %2124 = vsyncadd (%p2822_p6), [#allocation15], 4294967264  ;;  %v2164_v0 = vmov 0.0   ;;  %vm2165_vm0 = vmmov 0   ;;  %v1775_v1 = vld [vmem:[#allocation8] sm:$0xff]   ;;  %v1776_v2 = vld [vmem:[#allocation8 + $0x8] sm:$0xff]   ;;  %v583_v18 = vlaneseq }
 0x127   : > { %1547 = vmatprep.subr.bf16.mxu0 %v2164_v0  ;;  %1551 = vmatprep.mubr.msk.bf16.mxu0 %vm2165_vm0, %v2164_v0  ;;  %v2597_v3 = vld [vmem:[%s427_s7] sm:$0xf]  ;;  %vm537_vm1 = vcmask 261120   ;;  %s2166_s15 = smov 96   ;;  %s2167_s23 = smov 120   ;;  %vm608_vm2 = vcmask 64512  }
 0x128   : > { %1555 = vmatprep.subr.bf16.mxu1 %v2164_v0  ;;  %1557 = vmatprep.mubr.msk.bf16.mxu1 %vm2165_vm0, %v2164_v0  ;;  %v1496_v4 = vld [vmem:[#allocation10] ss:$0 sm:$0xff]  ;;  %s2168_s18 = smov 88   ;;  %v584_v19 = vshrl.u32 %v583_v18, 7  ;;  %v588_v20 = vand.u32 127, %v583_v18  ;;  %s2169_s27 = smov 64  }
 0x129   : > { %1548 = vmatpush3.bf16.msra.mxu0 %v1775_v1  ;;  %v1500_v21 = vld [vmem:[%s444_s16] ss:$0 sm:$0xff]  ;;  %s2170_s17 = smov 56   ;;  %s2171_s14 = smov 112   ;;  %vm672_vm4 = vcmask 1043456   ;;  %vm1278_vm5 = vcmask 257024  }
 0x12a   : > { %1549 = vmatprep.subr.bf16.mxu0 %v2164_v0  ;;  %vm589_vm3 = vcmp.gt.s32.totalorder %v588_v20, %v584_v19  ;;  %s2172_s3 = smov 80   ;;  %v601_v58 = vld [vmem:[#allocation11] sm:$0xf]  ;;  %v602_v60 = vld [vmem:[#allocation11 + $0x4] sm:$0xf]  ;;  %s2173_s5 = smov 72  }
 0x12b   : > { %v590_v22 = vsel %vm589_vm3, -1e+09, %v2164_v0  ;;  %v879_v59 = vsel %vm672_vm4, %v601_v58, 0  ;;  %v833_v61 = vsel %vm672_vm4, %v602_v60, 0  ;;  %s2174_s29 = smov 104   ;;  %s2175_s22 = smov 48  }
 0x12c   : > { %v2625_v23 = vadd.f32 %v1500_v21, %v590_v22  ;;  %s2176_s21 = smov 40   ;;  %s2823_s26 = sld [smem:[#allocation25_spill]] }
 0x12d   : > { %1550 = vmatpush3.bf16.msra.mxu0 %v1776_v2  ;;  %s511_s25 = scalar_lea.vmem [#allocation17], %s1488_s19  ;;  %s2824_s24 = sld [smem:[#allocation34_spill]] }
 0x12e   : > { %1561 = vmatprep.subr.bf16.mxu0 %v2164_v0  ;;  %s1295_s1 = sshll.u32 %s511_s25, 4  ;;  %p2825_p2 = scmp.ne.s32.totalorder %s2801_s28, 0  ;;  %s2705_s1 = int_to_ptr.vmem [resolvable:$true] %s1295_s1 }
 0x12f   : > { %s2177_s19 = smov [#allocation17]  }
 0x130   : > { %1552 = vmatmul.mubr.msk.bf16.vlgmr.msra.gmra.mrb[0].mxu0 %vm537_vm1, %v2597_v3 }
 0x131   : > { %1563 = vmatprep.mubr.msk.bf16.mxu0 %vm2165_vm0, %v2164_v0 }
 0x132   : > { %s1517_s11 = sshll.u32 %s2823_s26, 6 }
 0x133   : > { %s2703_s16 = scalar_lea.hbm %s2824_s24, %s1517_s11 }
 0x203   : > { %v575_v5 = vpop.f32.mrb[0].mxu0 }
 0x204   : > { %v576_v6 = vadd.f32 %v1496_v4, %v575_v5  ;;  %v1553_v7 = vpop.f32.mrb[1].mxu0 }
 0x205   : > { %v578_v8 = vpop.f32.mrb[2].mxu0 }
 0x206   : > { %v598_v9 = vmul.f32 0.35355338, %v576_v6  ;;  %v2604_v10 = vpack.c.bf16 %v576_v6, %v576_v6  ;;  %v1554_v11 = vpop.f32.mrb[3].mxu0 }
 0x208   : > { %v2606_v12 = vpack.c.bf16 %v598_v9, %v598_v9  ;;  %606 = vrot.lane.b32.xlu0 %v2604_v10, %s2166_s15  ;;  %s1281_s15 = scalar_lea.sflag [#allocation4], %s2562_s9 }
 0x20a   : > { %718 = vrot.lane.b32.xlu1 %v2606_v12, %s2167_s23  ;;  %s2053_s23 = scalar_lea.vmem %s2705_s1, 64 }
 0x20b   : > { %p2054_p11 = scmp.ne.s32.totalorder %s2705_s1, %s2053_s23 }
 0x20c   : > { %720 = vrot.lane.b32.xlu0 %v2604_v10, %s2168_s18  ;;  %s2057_s18 = sshll.u32 %s2177_s19, 4  ;;  %s2058_s18 = int_to_ptr.vmem [resolvable:$false] %s2057_s18 }
 0x20d   : > { %p2055_p12 = pnand %p2054_p11, %p2825_p2  ;;  %p2060_p9 = scmp.lt.s32.totalorder %s2705_s1, %s2058_s18 }
 0x20f   : > { %p2056_p1 = pneg %p2055_p12 }
 0x27a   : > { %v607_v13 = vpop.permute.xlu0 %606 }
 0x27b   : > { %v613_v14 = vsel %vm608_vm2, %v607_v13, 0 }
 0x27c   : > { %1556 = vmatpush3.bf16.xpose.msra.mxu1 %v613_v14  ;;  %v719_v17 = vpop.permute.xlu1 %718 }
 0x27d   : > { %1567 = vmatprep.subr.bf16.mxu1 %v2164_v0 }
 0x27e   : > { %v721_v15 = vpop.permute.xlu0 %720 }
 0x27f   : > { %v726_v16 = vsel %vm608_vm2, %v721_v15, 0 }
 0x283   : > { %1558 = vmatmul.mubr.msk.bf16.vlgmr.msra.gmra.mrb[0].mxu1 %vm608_vm2, %v2606_v12 }
 0x284   : > { %1568 = vmatpush3.bf16.xpose.msra.mxu1 %v726_v16  ;;  %1569 = vmatprep.mubr.msk.bf16.mxu1 %vm2165_vm0, %v2164_v0 }
 0x285   : > { %1579 = vmatprep.subr.bf16.mxu1 %v2164_v0 }
 0x28b   : > { %1570 = vmatmul.mubr.msk.bf16.vlgmr.msra.gmra.mrb[4].mxu1 %vm608_vm2, %v719_v17 }
 0x28c   : > { %1581 = vmatprep.mubr.msk.bf16.mxu1 %vm2165_vm0, %v2164_v0  ;;  %1580 = vmatpush3.bf16.msra.mxu1 %v833_v61 }
 0x28d   : > { %1591 = vmatprep.subr.bf16.mxu1 %v2164_v0 }
 0x356   : > { %v649_v24 = vpop.f32.mrb[0].mxu1 }
 0x357   : > { %v650_v25 = vadd.f32 %v649_v24, %v2625_v23  ;;  %v1559_v26 = vpop.f32.mrb[1].mxu1 }
 0x358   : > { %v652_v27 = vpop.f32.mrb[2].mxu1 }
 0x359   : > { %v1560_v28 = vpop.f32.mrb[3].mxu1  ;;  %v655_v29 = vsel %vm608_vm2, %v650_v25, -inf }
 0x35a   : > { %656 = vmax.xlane.f32.xlu1 %v655_v29 }
 0x35e   : > { %v762_v30 = vpop.f32.mrb[4].mxu1 }
 0x35f   : > { %v763_v31 = vadd.f32 %v762_v30, %v2625_v23  ;;  %v1571_v32 = vpop.f32.mrb[5].mxu1 }
 0x360   : > { %v765_v33 = vpop.f32.mrb[6].mxu1 }
 0x361   : > { %v1572_v34 = vpop.f32.mrb[7].mxu1  ;;  %v768_v35 = vsel %vm608_vm2, %v763_v31, -inf }
 0x362   : > { %769 = vmax.xlane.f32.xlu0 %v768_v35 }
 0x3e7   : > { %v657_v36 = vpop.xlane.xlu1 %656 }
 0x3e8   : > { %v658_v37 = vsub.f32 %v650_v25, %v657_v36 }
 0x3ea   : > { %v659_v38 = vmul.f32 1.442695, %v658_v37 }
 0x3ec   : > { %1777 = vpow2.f32 %v659_v38 }
 0x3ef   : > { %v770_v39 = vpop.xlane.xlu0 %769 }
 0x3f0   : > { %v771_v40 = vsub.f32 %v763_v31, %v770_v39 }
 0x3f2   : > { %v772_v41 = vmul.f32 1.442695, %v771_v40 }
 0x3f4   : > { %1779 = vpow2.f32 %v772_v41 }
 0x3f6   : > { %v1778_v42 = vpop.eup %1777 }
 0x3f7   : > { %v661_v43 = vsel %vm608_vm2, %v1778_v42, 0.0 }
 0x3f8   : > { %662 = vadd.xlane.f32.xlu0 %v661_v43 }
 0x3fe   : > { %v1780_v44 = vpop.eup %1779 }
 0x3ff   : > { %v774_v45 = vsel %vm608_vm2, %v1780_v44, 0.0 }
 0x400   : > { %775 = vadd.xlane.f32.xlu1 %v774_v45 }
 0x40e   : > { %667 = vrot.lane.b32.xlu0 %v2604_v10, %s2169_s27  ;;  %s2059_s27 = scalar_lea.vmem %s2058_s18, 128 }
 0x40f   : > { %p2061_p10 = scmp.lt.s32.totalorder %s2059_s27, %s2053_s23 }
 0x411   : > { %780 = vrot.lane.b32.xlu1 %v2604_v10, %s2170_s17  ;;  %p2062_p0 = por %p2061_p10, %p2060_p9 }
 0x412   : > { %921 = vrot.lane.b32.xlu0 %v2606_v12, %s2171_s14 }
 0x413   : > { %p2063_p5 = pnand %p2062_p0, %p2056_p1 }
 0x415   : > { %923 = vrot.lane.b32.xlu1 %v2604_v10, %s2172_s3 }
 0x485   : > { %v663_v46 = vpop.xlane.xlu0 %662 }
 0x486   : > { %1781 = vrcp.f32 %v663_v46 }
 0x489   : > { %v668_v47 = vpop.permute.xlu0 %667 }
 0x48a   : > { %v674_v48 = vsel %vm672_vm4, %v668_v47, 0 }
 0x48b   : > { %1562 = vmatpush3.bf16.msra.mxu0 %v674_v48 }
 0x48c   : > { %1573 = vmatprep.subr.bf16.mxu0 %v2164_v0 }
 0x48d   : > { %v776_v49 = vpop.xlane.xlu1 %775  ;;  %v922_v14 = vpop.permute.xlu0 %921 }
 0x48e   : > { %1783 = vrcp.f32 %v776_v49 }
 0x490   : > { %v1782_v50 = vpop.eup %1781 }
 0x491   : > { %v665_v51 = vmul.f32 %v1782_v50, %v1778_v42  ;;  %v781_v52 = vpop.permute.xlu1 %780 }
 0x492   : > { %v786_v54 = vsel %vm672_vm4, %v781_v52, 0 }
 0x493   : > { %v666_v53 = vpack.c.bf16 %v665_v51, %v665_v51 }
 0x495   : > { %1564 = vmatmul.mubr.msk.bf16.vlgmr.msra.gmra.mrb[4].mxu0 %vm608_vm2, %v666_v53  ;;  %v924_v5 = vpop.permute.xlu1 %923 }
 0x496   : > { %1574 = vmatpush3.bf16.msra.mxu0 %v786_v54  ;;  %1575 = vmatprep.mubr.msk.bf16.mxu0 %vm2165_vm0, %v2164_v0  ;;  %v929_v11 = vsel %vm608_vm2, %v924_v5, 0 }
 0x497   : > { %1585 = vmatprep.subr.bf16.mxu0 %v2164_v0 }
 0x498   : > { %v1784_v55 = vpop.eup %1783 }
 0x499   : > { %v778_v56 = vmul.f32 %v1784_v55, %v1780_v44  ;;  %v603_v44 = vld [vmem:[#allocation11 + $0x8] sm:$0xf] }
 0x49a   : > { %v1036_v45 = vsel %vm672_vm4, %v603_v44, 0 }
 0x49b   : > { %v779_v57 = vpack.c.bf16 %v778_v56, %v778_v56 }
 0x49d   : > { %1576 = vmatmul.mubr.msk.bf16.vlgmr.msra.gmra.mrb[8].mxu0 %vm608_vm2, %v779_v57 }
 0x49e   : > { %1587 = vmatprep.mubr.msk.bf16.mxu0 %vm2165_vm0, %v2164_v0  ;;  %1586 = vmatpush3.bf16.msra.mxu0 %v879_v59 }
 0x49f   : > { %1597 = vmatprep.subr.bf16.mxu0 %v2164_v0 }
 0x568   : > { %v710_v62 = vpop.f32.mrb[4].mxu0 }
 0x569   : > { %v716_v63 = vpack.c.bf16 %v710_v62, %v710_v62  ;;  %v1565_v1 = vpop.f32.mrb[5].mxu0  ;;  %v604_v62 = vld [vmem:[#allocation11 + $0xc] sm:$0xf] }
 0x56a   : > { %v713_v2 = vpop.f32.mrb[6].mxu0 }
 0x56b   : > { %v1566_v4 = vpop.f32.mrb[7].mxu0  ;;  %1588 = vmatmul.mubr.msk.bf16.vlgmr.msra.gmra.mrb[12].mxu0 %vm608_vm2, %v716_v63  ;;  %v1194_v63 = vsel %vm672_vm4, %v604_v62, 0 }
 0x56c   : > { %1599 = vmatprep.mubr.msk.bf16.mxu0 %vm2165_vm0, %v2164_v0 }
 0x570   : > { %v822_v6 = vpop.f32.mrb[8].mxu0 }
 0x571   : > { %v828_v7 = vpack.c.bf16 %v822_v6, %v822_v6  ;;  %v1577_v8 = vpop.f32.mrb[9].mxu0 }
 0x572   : > { %v825_v9 = vpop.f32.mrb[10].mxu0 }
 0x573   : > { %v1578_v13 = vpop.f32.mrb[11].mxu0  ;;  %1582 = vmatmul.mubr.msk.bf16.vlgmr.msra.gmra.mrb[8].mxu1 %vm608_vm2, %v828_v7 }
 0x574   : > { %1592 = vmatpush3.bf16.xpose.msra.mxu1 %v929_v11  ;;  %1593 = vmatprep.mubr.msk.bf16.mxu1 %vm2165_vm0, %v2164_v0 }
 0x575   : > { %1603 = vmatprep.subr.bf16.mxu1 %v2164_v0 }
 0x57b   : > { %1594 = vmatmul.mubr.msk.bf16.vlgmr.msra.gmra.mrb[12].mxu1 %vm608_vm2, %v922_v14 }
 0x57c   : > { %1605 = vmatprep.mubr.msk.bf16.mxu1 %vm2165_vm0, %v2164_v0  ;;  %1604 = vmatpush3.bf16.msra.mxu1 %v1036_v45 }
 0x57d   : > { %1615 = vmatprep.subr.bf16.mxu1 %v2164_v0 }
 0x63e   : > { %v915_v15 = vpop.f32.mrb[12].mxu0 }
 0x63f   : > { %v1589_v16 = vpop.f32.mrb[13].mxu0 }
 0x640   : > { %v918_v17 = vpop.f32.mrb[14].mxu0 }
 0x641   : > { %v1590_v18 = vpop.f32.mrb[15].mxu0 }
 0x642   : > { %v1513_v18 = vld [vmem:[#allocation13] ss:$0 sm:$0xff] }
 0x646   : > { %v869_v19 = vpop.f32.mrb[8].mxu1 }
 0x647   : > { %v2662_v20 = vadd.f32 %v915_v15, %v869_v19  ;;  %v1583_v21 = vpop.f32.mrb[9].mxu1 }
 0x648   : > { %v872_v22 = vpop.f32.mrb[10].mxu1  ;;  %v1245_v21 = vunpack.c.l.bf16 %v2597_v3 }
 0x649   : > { %v1584_v24 = vpop.f32.mrb[11].mxu1 }
 0x64e   : > { %v965_v25 = vpop.f32.mrb[12].mxu1 }
 0x64f   : > { %v966_v26 = vadd.f32 %v965_v25, %v2625_v23  ;;  %v1595_v27 = vpop.f32.mrb[13].mxu1 }
 0x650   : > { %v968_v28 = vpop.f32.mrb[14].mxu1 }
 0x651   : > { %v1596_v29 = vpop.f32.mrb[15].mxu1  ;;  %v971_v30 = vsel %vm608_vm2, %v966_v26, -inf }
 0x652   : > { %972 = vmax.xlane.f32.xlu1 %v971_v30 }
 0x663   : > { %1081 = vrot.lane.b32.xlu1 %v2604_v10, %s2173_s5 }
 0x667   : > { %1079 = vrot.lane.b32.xlu1 %v2606_v12, %s2174_s29 }
 0x6df   : > { %v973_v31 = vpop.xlane.xlu1 %972 }
 0x6e0   : > { %v974_v32 = vsub.f32 %v966_v26, %v973_v31 }
 0x6e2   : > { %v975_v33 = vmul.f32 1.442695, %v974_v32 }
 0x6e3   : > { %v1082_v40 = vpop.permute.xlu1 %1081 }
 0x6e4   : > { %1785 = vpow2.f32 %v975_v33  ;;  %v1087_v42 = vsel %vm608_vm2, %v1082_v40, 0 }
 0x6e7   : > { %v1080_v43 = vpop.permute.xlu1 %1079 }
 0x6ee   : > { %v1786_v34 = vpop.eup %1785 }
 0x6ef   : > { %v977_v35 = vsel %vm608_vm2, %v1786_v34, 0.0 }
 0x6f0   : > { %978 = vadd.xlane.f32.xlu0 %v977_v35 }
 0x706   : > { %983 = vrot.lane.b32.xlu0 %v2604_v10, %s2175_s22 }
 0x77d   : > { %v979_v36 = vpop.xlane.xlu0 %978 }
 0x77e   : > { %1787 = vrcp.f32 %v979_v36  ;;  %v1514_v36 = vld [vmem:[#allocation14] ss:$0 sm:$0xff] }
 0x781   : > { %v984_v37 = vpop.permute.xlu0 %983 }
 0x782   : > { %v989_v38 = vsel %vm672_vm4, %v984_v37, 0 }
 0x783   : > { %1598 = vmatpush3.bf16.msra.mxu0 %v989_v38  ;;  %v1515_v38 = vld [vmem:[#allocation16] ss:$0 sm:$0xff] }
 0x784   : > { %1609 = vmatprep.subr.bf16.mxu0 %v2164_v0 }
 0x788   : > { %v1788_v12 = vpop.eup %1787 }
 0x789   : > { %v981_v39 = vmul.f32 %v1788_v12, %v1786_v34 }
 0x78b   : > { %v982_v41 = vpack.c.bf16 %v981_v39, %v981_v39 }
 0x78d   : > { %1600 = vmatmul.mubr.msk.bf16.vlgmr.msra.gmra.mrb[16].mxu0 %vm608_vm2, %v982_v41 }
 0x78e   : > { %1610 = vmatpush3.bf16.xpose.msra.mxu0 %v1087_v42  ;;  %1611 = vmatprep.mubr.msk.bf16.mxu0 %vm2165_vm0, %v2164_v0 }
 0x78f   : > { %1621 = vmatprep.subr.bf16.mxu0 %v2164_v0 }
 0x795   : > { %1612 = vmatmul.mubr.msk.bf16.vlgmr.msra.gmra.mrb[20].mxu0 %vm608_vm2, %v1080_v43 }
 0x796   : > { %1623 = vmatprep.mubr.msk.bf16.mxu0 %vm2165_vm0, %v2164_v0  ;;  %1622 = vmatpush3.bf16.msra.mxu0 %v1194_v63 }
 0x860   : > { %v1025_v46 = vpop.f32.mrb[16].mxu0 }
 0x861   : > { %v1031_v47 = vpack.c.bf16 %v1025_v46, %v1025_v46  ;;  %v1601_v48 = vpop.f32.mrb[17].mxu0 }
 0x862   : > { %v1028_v49 = vpop.f32.mrb[18].mxu0 }
 0x863   : > { %v1602_v50 = vpop.f32.mrb[19].mxu0  ;;  %1606 = vmatmul.mubr.msk.bf16.vlgmr.msra.gmra.mrb[16].mxu1 %vm608_vm2, %v1031_v47 }
 0x864   : > { %1617 = vmatprep.mubr.msk.bf16.mxu1 %vm2165_vm0, %v2164_v0 }
 0x868   : > { %v1123_v51 = vpop.f32.mrb[20].mxu0 }
 0x869   : > { %v1124_v52 = vadd.f32 %v1123_v51, %v2625_v23  ;;  %v1613_v53 = vpop.f32.mrb[21].mxu0 }
 0x86a   : > { %v1126_v54 = vpop.f32.mrb[22].mxu0 }
 0x86b   : > { %v1614_v55 = vpop.f32.mrb[23].mxu0  ;;  %v1129_v56 = vsel %vm608_vm2, %v1124_v52, -inf }
 0x86c   : > { %1130 = vmax.xlane.f32.xlu0 %v1129_v56 }
 0x882   : > { %1141 = vrot.lane.b32.xlu0 %v2604_v10, %s2176_s21 }
 0x8f9   : > { %v1131_v57 = vpop.xlane.xlu0 %1130 }
 0x8fa   : > { %v1132_v58 = vsub.f32 %v1124_v52, %v1131_v57 }
 0x8fc   : > { %v1133_v59 = vmul.f32 1.442695, %v1132_v58 }
 0x8fd   : > { %v1142_v60 = vpop.permute.xlu0 %1141 }
 0x8fe   : > { %1789 = vpow2.f32 %v1133_v59  ;;  %v1147_v61 = vsel %vm672_vm4, %v1142_v60, 0 }
 0x8ff   : > { %1616 = vmatpush3.bf16.msra.mxu1 %v1147_v61 }
 0x908   : > { %v1790_v0 = vpop.eup %1789 }
 0x909   : > { %v1135_v23 = vsel %vm608_vm2, %v1790_v0, 0.0 }
 0x90a   : > { %1136 = vadd.xlane.f32.xlu1 %v1135_v23 }
 0x936   : > { %v1072_v1 = vpop.f32.mrb[16].mxu1 }
 0x937   : > { %v1078_v2 = vadd.f32 %v1072_v1, %v2662_v20  ;;  %v1607_v10 = vpop.f32.mrb[17].mxu1 }
 0x938   : > { %v1075_v4 = vpop.f32.mrb[18].mxu1 }
 0x939   : > { %v1608_v5 = vpop.f32.mrb[19].mxu1 }
 0x997   : > { %v1137_v6 = vpop.xlane.xlu1 %1136 }
 0x998   : > { %1791 = vrcp.f32 %v1137_v6 }
 0x9a2   : > { %v1792_v7 = vpop.eup %1791 }
 0x9a3   : > { %v1139_v8 = vmul.f32 %v1792_v7, %v1790_v0 }
 0x9a5   : > { %v1140_v9 = vpack.c.bf16 %v1139_v8, %v1139_v8 }
 0x9a7   : > { %1618 = vmatmul.mubr.msk.bf16.vlgmr.msra.gmra.mrb[20].mxu1 %vm608_vm2, %v1140_v9 }
 0xa7a   : > { %v1183_v11 = vpop.f32.mrb[20].mxu1 }
 0xa7b   : > { %v1189_v13 = vpack.c.bf16 %v1183_v11, %v1183_v11  ;;  %v1619_v14 = vpop.f32.mrb[21].mxu1 }
 0xa7c   : > { %v1186_v15 = vpop.f32.mrb[22].mxu1 }
 0xa7d   : > { %v1620_v16 = vpop.f32.mrb[23].mxu1  ;;  %1624 = vmatmul.mubr.msk.bf16.vlgmr.msra.gmra.mrb[24].mxu0 %vm608_vm2, %v1189_v13 }
 0xb50   : > { %v1230_v17 = vpop.f32.mrb[24].mxu0 }
 0xb51   : > { %v1236_v19 = vadd.f32 %v1230_v17, %v1078_v2  ;;  %v1625_v20 = vpop.f32.mrb[25].mxu0 }
 0xb52   : > { %v1233_v22 = vpop.f32.mrb[26].mxu0 }
 0xb53   : > { %v1244_v24 = vadd.f32 %v1513_v18, %v1236_v19  ;;  %v1626_v25 = vpop.f32.mrb[27].mxu0 }
 0xb55   : > { %v1246_v26 = vadd.f32 %v1245_v21, %v1244_v24 }
 0xb57   : > { %v1247_v27 = vsel %vm537_vm1, %v1246_v26, 0.0 }
 0xb58   : > { %1248 = vadd.xlane.f32.xlu1 %v1247_v27 }
 0xbe5   : > { %v1249_v28 = vpop.xlane.xlu1 %1248 }
 0xbe6   : > { %v1251_v29 = vmul.f32 0.03125, %v1249_v28 }
 0xbe8   : > { %v1252_v30 = vsub.f32 %v1246_v26, %v1251_v29 }
 0xbea   : > { %v1253_v31 = vmul.f32 %v1252_v30, %v1252_v30 }
 0xbec   : > { %v1254_v32 = vsel %vm537_vm1, %v1253_v31, 0.0 }
 0xbed   : > { %1255 = vadd.xlane.f32.xlu1 %v1254_v32 }
 0xc7a   : > { %v1256_v33 = vpop.xlane.xlu1 %1255 }
 0xc7b   : > { %v1257_v34 = vmul.f32 0.03125, %v1256_v33 }
 0xc7d   : > { %v1258_v35 = vadd.f32 1e-05, %v1257_v34 }
 0xc7f   : > { %1793 = vrsqrt.f32 %v1258_v35 }
 0xc89   : > { %v1794_v3 = vpop.eup %1793 }
 0xc8a   : > { %v1260_v37 = vmul.f32 %v1794_v3, %v1252_v30 }
 0xc8c   : > { %v1268_v12 = vmul.f32 %v1514_v36, %v1260_v37 }
 0xc8e   : > { %v1276_v39 = vadd.f32 %v1515_v38, %v1268_v12 }
 0xc90   : > { %v1277_v40 = vpack.c.bf16 %v1276_v39, %v1276_v39 }
 0xc92   : > { %1279 = vst.msk [vmem:[%s511_s25] sm:$0xf] %vm1278_vm5, %v1277_v40 }
 0xc93   : > { %2066 = shalt.err (!%p2063_p5)
}
 0xc94   : > { %s2067_s9 = scalar_lea.hbm %s2703_s16, 64  ;;  %s2071_s3 = scalar_lea.hbm %s2824_s24, 128 }
 0xc95   : > { %p2068_p8 = scmp.ne.s32.totalorder %s2703_s16, %s2067_s9  ;;  %p2072_p4 = scmp.lt.u32.totalorder %s2703_s16, %s2824_s24 }
 0xc96   : > { %p2073_p7 = scmp.lt.u32.totalorder %s2071_s3, %s2067_s9  ;;  %p2075_p11 = scmp.lt.u32.totalorder %s2067_s9, %s2703_s16 }
 0xc97   : > { %p2069_p3 = pnand %p2068_p8, %p2825_p2 }
 0xc98   : > { %p2074_p6 = por %p2073_p7, %p2072_p4 }
 0xc99   : > { %p2070_p13 = pneg %p2069_p3 }
 0xc9a   : > { %p2076_p12 = por %p2075_p11, %p2074_p6 }
 0xc9c   : > { %p2077_p1 = pnand %p2076_p12, %p2070_p13 }
 0xc9e   : > { %2080 = shalt.err (!%p2077_p1)
}
 0xc9f   : > { %1657 = dma.vmem_to_hbm [thread:$0]  (%p2825_p2), %s2705_s1, 64, %s2703_s16, %s1281_s15  }
 0xca0 PF: > { %s2826_s22 = sld [smem:[#allocation26_spill]]  ;;  %s1307_s21 = sand.u32 1, %s2131_s30  }
 0xca1   : > { %p2827_p9 = scmp.ne.s32.totalorder %s2803_s20, 0  ;;  %s1308_s26 = scalar_lea.sflag [#allocation4], %s1307_s21 }
 0xca6   : > { %p2828_p10 = scmp.ge.s32.totalorder %s2826_s22, 2 }
 0xca8   : > { %p1689_p0 = pnand %p2828_p10, %p2827_p9 }
 0xcaa   : > { %2126 = dma.done.wait (!%p1689_p0), %s1308_s26, 64  }
 0xcab   : > { %2128 = vsyncadd (!%p1689_p0), %s1308_s26, 4294967232  ;;  %s31_s14 = sadd.s32 1, %s2826_s22   ;;  %s2829_s11 = sld [smem:[#allocation24_spill]] }
 0xcac   : > { %p28_p5 = scmp.ge.s32.totalorder %s31_s14, 4   ;;  %s2830_s28 = sld [smem:[#allocation29_spill]] }
 0xcad   : > { %s2831_s25 = sld [smem:[#allocation28_spill]]  ;;  %s2832_s30 = smov %s2135_s10 }
 0xcae   : > { %s2835_s12 = smov %s2147_s13  ;;  %30 = sbr.rel (!%p28_p5) target bundleno = 17 (0x11), region = 149 }
 0xcb1   : > { %s2833_s10 = smov %s2829_s11 }
 0xcb2   : > { %s2834_s11 = smov %s2830_s28 }
 0xcb3   : > { %s2836_s13 = smov %s2831_s25 }
 0xcb5   :  { %1313 = vsyncpa [#allocation3], 1 }
 0xcb6   :  { %1315 = vsyncpa [#allocation3 + $0x1], 1 }
 0xcb7   :  { %1316 = vsyncpa [#allocation6], 1 }
 0xcb8   :  { %1318 = vsyncpa [#allocation6 + $0x1], 1 }
 0xcb9   :  { %1319 = vsyncpa [#allocation9], 1 }
 0xcba   :  { %1320 = vsyncpa [#allocation12], 1 }
 0xcbb   :  { %1321 = vsyncpa [#allocation15], 1 }
 0xcbc   :  { %1322 = vsyncpa [#allocation4], 1 }
 0xcbd   :  { %1324 = vsyncpa [#allocation4 + $0x1], 1 }

// kernel: _lambda_.11
= control target key start
LH: loop header
LB: loop body
LE: loop exit
PB: predicated region body
PF: predicated region fallthrough
CT: control target
= control target key end

     0   :  { %8 = vsyncpa [#allocation4], 0  ;;  %s511_s0 = inlined_call_operand.hbm [shape: bf16[16,32], index: 0, kind: input, shape index: {}]   ;;  %s512_s1 = inlined_call_operand.hbm [shape: bf16[32,512], index: 1, kind: input, shape index: {}]   ;;  %s513_s2 = inlined_call_operand.hbm [shape: f32[1,512], index: 2, kind: input, shape index: {}]   ;;  %s514_s3 = inlined_call_operand.hbm [shape: f32[16,512], index: 3, kind: output, shape index: {}]  }
   0x1   :  { %9 = vsyncpa [#allocation7], 0 }
   0x2   :  { %10 = vsyncpa [#allocation5], 0  ;;  %s432_s12 = smov [#allocation6]   ;;  %s338_s16 = scalar_lea.hbm %s512_s1, 1024 }
   0x3   :  { %s28_s13 = sshll.u32 %s432_s12, 4  ;;  %p339_p0 = scmp.ne.s32.totalorder %s512_s1, %s338_s16  ;;  %s29_s13 = int_to_ptr.vmem [resolvable:$true] %s28_s13 }
   0x4   :  { %p342_p1 = scmp.lt.u32.totalorder %s338_s16, %s512_s1 }
   0x6   :  { %p344_p2 = pnand %p342_p1, %p339_p0 }
   0x8   :  { %347 = shalt.err (!%p344_p2)
}
   0x9   :  { %s348_s21 = scalar_lea.vmem %s29_s13, 1024  ;;  %p353_p4 = scmp.lt.s32.totalorder %s29_s13, %s29_s13 }
   0xa   :  { %p349_p3 = scmp.ne.s32.totalorder %s29_s13, %s348_s21  ;;  %p354_p5 = scmp.lt.s32.totalorder %s348_s21, %s348_s21 }
   0xc   :  { %p355_p6 = por %p354_p5, %p353_p4 }
   0xe   :  { %p356_p7 = pnand %p355_p6, %p349_p3 }
  0x10   :  { %359 = shalt.err (!%p356_p7)
}
  0x11   :  { %s433_s22 = smov 256   ;;  %s434_s23 = smov 16  }
  0x12   :  { %34 = dma.hbm_to_vmem [thread:$0]  %s512_s1, 1024, %s29_s13, [#allocation7], %s433_s22, %s433_s22, %s434_s23  }
  0x13   :  { %s435_s26 = smov [#allocation3]   ;;  %s360_s30 = scalar_lea.hbm %s511_s0, 128 }
  0x14   :  { %s16_s27 = sshll.u32 %s435_s26, 4  ;;  %p361_p8 = scmp.ne.s32.totalorder %s511_s0, %s360_s30  ;;  %s17_s27 = int_to_ptr.vmem [resolvable:$true] %s16_s27 }
  0x15   :  { %p364_p9 = scmp.lt.u32.totalorder %s360_s30, %s511_s0 }
  0x17   :  { %p366_p10 = pnand %p364_p9, %p361_p8 }
  0x19   :  { %369 = shalt.err (!%p366_p10)
}
  0x1a   :  { %s370_s8 = scalar_lea.vmem %s17_s27, 128  ;;  %p375_p12 = scmp.lt.s32.totalorder %s17_s27, %s17_s27 }
  0x1b   :  { %p371_p11 = scmp.ne.s32.totalorder %s17_s27, %s370_s8  ;;  %p376_p13 = scmp.lt.s32.totalorder %s370_s8, %s370_s8 }
  0x1d   :  { %p377_p0 = por %p376_p13, %p375_p12 }
  0x1f   :  { %p378_p1 = pnand %p377_p0, %p371_p11 }
  0x21   :  { %381 = shalt.err (!%p378_p1)
}
  0x22   :  { %s436_s1 = smov 64   ;;  %s437_s9 = smov 4  }
  0x23   :  { %22 = dma.hbm_to_vmem [thread:$0]  %s511_s0, 128, %s17_s27, [#allocation4], %s436_s1, %s436_s1, %s437_s9  }
  0x24   :  { %s438_s12 = smov [#allocation8]   ;;  %s382_s16 = scalar_lea.hbm %s513_s2, 64 }
  0x25   :  { %s41_s13 = sshll.u32 %s438_s12, 4  ;;  %p383_p2 = scmp.ne.s32.totalorder %s513_s2, %s382_s16  ;;  %s42_s13 = int_to_ptr.vmem [resolvable:$true] %s41_s13 }
  0x26   :  { %p386_p3 = scmp.lt.u32.totalorder %s382_s16, %s513_s2 }
  0x28   :  { %p388_p4 = pnand %p386_p3, %p383_p2 }
  0x2a   :  { %391 = shalt.err (!%p388_p4)
}
  0x2b   :  { %s392_s21 = scalar_lea.vmem %s42_s13, 64  ;;  %p397_p6 = scmp.lt.s32.totalorder %s42_s13, %s42_s13 }
  0x2c   :  { %p393_p5 = scmp.ne.s32.totalorder %s42_s13, %s392_s21  ;;  %p398_p7 = scmp.lt.s32.totalorder %s392_s21, %s392_s21 }
  0x2e   :  { %p399_p8 = por %p398_p7, %p397_p6 }
  0x30   :  { %p400_p9 = pnand %p399_p8, %p393_p5 }
  0x32   :  { %403 = shalt.err (!%p400_p9)
}
  0x33   :  { %44 = dma.hbm_to_vmem [thread:$0]  %s513_s2, 64, %s42_s13, [#allocation7]  }
  0x34   :  { %426 = dma.done.wait [#allocation4], 128  }
  0x35   :  { %427 = vsyncadd [#allocation4], 4294967168 }
  0x36   :  { %428 = dma.done.wait [#allocation7], 1088  }
  0x37   :  { %429 = vsyncadd [#allocation7], 4294966208  ;;  %v439_v0 = vmov 0   ;;  %v325_v1 = vld [vmem:[#allocation6 + $0x4] ss:$16 sps:$4 sm:$0xff]   ;;  %v337_v9 = vld [vmem:[#allocation3] sm:$0xff]   ;;  %v249_v10 = vlaneseq }
  0x38   :  { %166 = vmatprep.mubr.bf16.mxu0 %v439_v0  ;;  %209 = vmatprep.mubr.bf16.mxu1 %v439_v0  ;;  %v327_v2 = vld [vmem:[#allocation6 + $0xc] ss:$16 sps:$4 sm:$0xff]   ;;  %v329_v3 = vld [vmem:[#allocation6] ss:$16 sps:$4 sm:$0xff]   ;;  %v330_v4 = vld [vmem:[#allocation6 + $0x8] ss:$16 sps:$4 sm:$0xff]  }
  0x39   :  { %134 = vmatprep.subr.bf16.mxu0 %v325_v1  ;;  %177 = vmatprep.subr.bf16.mxu1 %v327_v2  ;;  %v331_v5 = vld [vmem:[#allocation6 + $0x24] ss:$16 sps:$4 sm:$0xff]   ;;  %v333_v6 = vld [vmem:[#allocation6 + $0x2c] ss:$16 sps:$4 sm:$0xff]   ;;  %v335_v7 = vld [vmem:[#allocation6 + $0x20] ss:$16 sps:$4 sm:$0xff]  }
  0x3a   :  { %135 = vmatpush1.bf16.msra.mxu0 %v329_v3  ;;  %178 = vmatpush1.bf16.msra.mxu1 %v330_v4  ;;  %v336_v8 = vld [vmem:[#allocation6 + $0x28] ss:$16 sps:$4 sm:$0xff]   ;;  %vm130_vm0 = vcmask 261120   ;;  %v250_v11 = vshrl.u32 %v249_v10, 7  ;;  %v247_v14 = vld [vmem:[#allocation8] sm:$0xf] }
  0x3b   :  { %136 = vmatprep.subr.bf16.mxu0 %v331_v5  ;;  %179 = vmatprep.subr.bf16.mxu1 %v333_v6  ;;  %s440_s2 = smov [#allocation9]  }
  0x3c   :  { %v251_v12 = vsub.s32 0, %v250_v11  ;;  %v259_v13 = vsub.s32 2, %v250_v11  ;;  %v255_v15 = vsub.s32 1, %v250_v11  ;;  %v263_v16 = vsub.s32 3, %v250_v11  ;;  %s290_s23 = sshll.u32 %s440_s2, 4  ;;  %s291_s23 = int_to_ptr.vmem [resolvable:$true] %s290_s23 }
  0x3d   :  { %s404_s24 = scalar_lea.vmem %s291_s23, 1024  ;;  %p409_p11 = scmp.lt.s32.totalorder %s291_s23, %s291_s23 }
  0x3e   :  { %137 = vmatpush1.bf16.msra.mxu0 %v335_v7  ;;  %180 = vmatpush1.bf16.msra.mxu1 %v336_v8  ;;  %v252_v17 = vrot.slane %v247_v14, %v251_v12  ;;  %v260_v18 = vrot.slane %v247_v14, %v259_v13  ;;  %v256_v19 = vrot.slane %v247_v14, %v255_v15  ;;  %p405_p10 = scmp.ne.s32.totalorder %s291_s23, %s404_s24  ;;  %p410_p12 = scmp.lt.s32.totalorder %s404_s24, %s404_s24 }
  0x3f   :  { %v264_v20 = vrot.slane %v247_v14, %v263_v16 }
  0x40   :  { %p411_p13 = por %p410_p12, %p409_p11 }
  0x41   :  { %312 = vmatmul.mubr.msk.bf16.vlgmr.msra.gmra.mrb[0].mxu0 %vm130_vm0, %v337_v9  ;;  %313 = vmatmul.mubr.msk.bf16.vlgmr.msra.gmra.mrb[0].mxu1 %vm130_vm0, %v337_v9 }
  0x42   :  { %p412_p0 = pnand %p411_p13, %p405_p10 }
 0x114   :  { %v168_v21 = vpop.f32.mrb[0].mxu0  ;;  %v211_v22 = vpop.f32.mrb[0].mxu1 }
 0x115   :  { %v269_v23 = vadd.f32 %v252_v17, %v168_v21  ;;  %v271_v24 = vadd.f32 %v260_v18, %v211_v22  ;;  %v170_v25 = vpop.f32.mrb[1].mxu0  ;;  %v213_v26 = vpop.f32.mrb[1].mxu1 }
 0x116   :  { %v270_v27 = vadd.f32 %v256_v19, %v170_v25  ;;  %v272_v28 = vadd.f32 %v264_v20, %v213_v26  ;;  %v172_v29 = vpop.f32.mrb[2].mxu0  ;;  %v215_v30 = vpop.f32.mrb[2].mxu1 }
 0x117   :  { %277 = vst [vmem:[#allocation9] sm:$0xff] %v269_v23  ;;  %279 = vst [vmem:[#allocation9 + $0x10] sm:$0xff] %v271_v24  ;;  %v273_v31 = vadd.f32 %v252_v17, %v172_v29  ;;  %v275_v32 = vadd.f32 %v260_v18, %v215_v30  ;;  %v174_v33 = vpop.f32.mrb[3].mxu0  ;;  %v217_v34 = vpop.f32.mrb[3].mxu1 }
 0x118   :  { %278 = vst [vmem:[#allocation9 + $0x8] sm:$0xff] %v270_v27  ;;  %280 = vst [vmem:[#allocation9 + $0x18] sm:$0xff] %v272_v28  ;;  %v274_v35 = vadd.f32 %v256_v19, %v174_v33  ;;  %v276_v36 = vadd.f32 %v264_v20, %v217_v34 }
 0x119   :  { %281 = vst [vmem:[#allocation9 + $0x20] sm:$0xff] %v273_v31  ;;  %283 = vst [vmem:[#allocation9 + $0x30] sm:$0xff] %v275_v32 }
 0x11a   :  { %282 = vst [vmem:[#allocation9 + $0x28] sm:$0xff] %v274_v35  ;;  %284 = vst [vmem:[#allocation9 + $0x38] sm:$0xff] %v276_v36 }
 0x11b   :  { %415 = shalt.err (!%p412_p0)
}
 0x11c   :  { %s416_s27 = scalar_lea.hbm %s514_s3, 1024 }
 0x11d   :  { %p417_p1 = scmp.ne.s32.totalorder %s514_s3, %s416_s27  ;;  %p420_p2 = scmp.lt.u32.totalorder %s416_s27, %s514_s3 }
 0x11f   :  { %p422_p3 = pnand %p420_p2, %p417_p1 }
 0x121   :  { %425 = shalt.err (!%p422_p3)
}
 0x122   :  { %s441_s5 = smov 512   ;;  %s442_s6 = smov 32  }
 0x123   :  { %296 = dma.vmem_to_hbm [thread:$0]  %s291_s23, 1024, %s514_s3, [#allocation5], %s441_s5, %s441_s5, %s442_s6  }
 0x124   :  { %430 = dma.done.wait [#allocation5], 1024  }
 0x125   :  { %431 = vsyncadd [#allocation5], 4294966272 }
 0x126   :  { %300 = vsyncpa [#allocation4], 1 }
 0x127   :  { %301 = vsyncpa [#allocation7], 1 }
 0x128   :  { %302 = vsyncpa [#allocation5], 1 }

</bundles_post_ra>
